<compile_context>
chip_gen: v6e
topology: v6e:2x2x1
jax: 0.10.0
libtpu: 0.0.40
codegen_flags: <defaults>
</compile_context>

<pallas_src>
import functools

import jax
import jax.numpy as jnp
from jax import lax
from jax.experimental import pallas as pl
from jax.experimental.pallas import tpu as pltpu


def _round_up(x, m):
    return (x + m - 1) // m * m


def _tile(dim, cap, grain):
    """Largest tile <= cap that divides dim (dim assumed to be a multiple of grain)."""
    t = min(dim, cap)
    t -= t % grain
    t = max(t, grain)
    while dim % t:
        t -= grain
    return t


# ---------------------- tiled matmul + bias (K-accumulated) ----------------------
def _linear_kernel(x_ref, w_ref, b_ref, o_ref, acc_ref):
    @pl.when(pl.program_id(2) == 0)
    def _():
        acc_ref[...] = jnp.zeros_like(acc_ref)

    acc_ref[...] += jnp.dot(x_ref[...], w_ref[...],
                            preferred_element_type=jnp.float32)

    @pl.when(pl.program_id(2) == pl.num_programs(2) - 1)
    def _():
        o_ref[...] = (acc_ref[...] + b_ref[...]).astype(o_ref.dtype)


def linear(x, w, b, *, tm_cap=256, tn_cap=1024, tk_cap=512, out_dtype=jnp.float32):
    """x: (M, K), w: (K, N), b: (1, N) -> (M, N), tiled over (M, N, K)."""
    M, K = x.shape
    _, N = w.shape
    tm = _tile(M, tm_cap, 8)
    tn = _tile(N, tn_cap, 128)
    tk = _tile(K, tk_cap, 128)
    grid = (M // tm, N // tn, K // tk)
    # TODO(synk): on v7x set pltpu.CompilerParams(vmem_limit_bytes=...) and keep
    # (tm*tk + tk*tn + tm*tn) double-buffered tiles under the 64 MiB VMEM budget.
    return pl.pallas_call(
        _linear_kernel,
        grid_spec=pltpu.PrefetchScalarGridSpec(
            num_scalar_prefetch=0,
            grid=grid,
            in_specs=[
                pl.BlockSpec((tm, tk), lambda i, j, k: (i, k)),
                pl.BlockSpec((tk, tn), lambda i, j, k: (k, j)),
                pl.BlockSpec((1, tn), lambda i, j, k: (0, j)),
            ],
            out_specs=pl.BlockSpec((tm, tn), lambda i, j, k: (i, j)),
            scratch_shapes=[pltpu.VMEM((tm, tn), jnp.float32)],
        ),
        out_shape=jax.ShapeDtypeStruct((M, N), out_dtype),
        compiler_params=pltpu.CompilerParams(
            dimension_semantics=("parallel", "parallel", "arbitrary")),
    )(x, w, b)


# --------------------------- streaming LSTM recurrence ---------------------------
def _make_lstm_kernel(emit_hs, unroll):
    def kernel(hc0_ref, gx_ref, whh_ref, *rest):
        if emit_hs:
            hs_ref, hc_ref, h_sc, c_sc = rest
        else:
            hc_ref, h_sc, c_sc = rest
        Hp = h_sc.shape[-1]
        tc = gx_ref.shape[0]
        t = pl.program_id(1)

        @pl.when(t == 0)
        def _():
            h_sc[...] = hc0_ref[0]
            c_sc[...] = hc0_ref[1]

        def step(i, carry):
            h, c = carry
            # Only the recurrent matmul stays on the serial path (x@Wih hoisted).
            # Whh is streamed from VMEM inside the dot — not held across the loop.
            gates = gx_ref[i].astype(jnp.float32) + jnp.dot(
                h.astype(whh_ref.dtype), whh_ref[...],
                preferred_element_type=jnp.float32)
            # Gate blocks are 128-lane aligned (per-gate padding) -> free vreg views.
            i_g = jax.nn.sigmoid(gates[:, 0 * Hp:1 * Hp])
            f_g = jax.nn.sigmoid(gates[:, 1 * Hp:2 * Hp])
            g_g = jnp.tanh(gates[:, 2 * Hp:3 * Hp])
            o_g = jax.nn.sigmoid(gates[:, 3 * Hp:4 * Hp])
            c_new = f_g * c + i_g * g_g
            h_new = o_g * jnp.tanh(c_new)
            if emit_hs:
                hs_ref[i] = h_new.astype(hs_ref.dtype)
            return h_new, c_new

        h, c = lax.fori_loop(0, tc, step, (h_sc[...], c_sc[...]), unroll=unroll)
        h_sc[...] = h
        c_sc[...] = c

        # Final (h, c) stored only on the last chunk (block is resident across T).
        @pl.when(t == pl.num_programs(1) - 1)
        def _():
            hc_ref[0] = h
            hc_ref[1] = c

    return kernel


def lstm_scan(gx, whh, hc0, *, gate_col_block=0, emit_hs=True, t_chunk=None,
              batch_tile=None, hs_dtype=jnp.float32, unroll=4):
    """gx: (T, Bp, n_blocks*4Hp) fused gate slab; whh: (Hp, 4Hp); hc0: (2, Bp, Hp).
    `gate_col_block` selects which 4Hp-wide column block of gx feeds this LSTM.
    Returns (hs or None, hc_final)."""
    T, Bp, Gtot = gx.shape
    Hp = whh.shape[0]
    G = 4 * Hp
    assert Gtot % G == 0 and 0 <= gate_col_block < Gtot // G
    tc = t_chunk if t_chunk is not None else _tile(T, 32, 1)
    assert T % tc == 0
    tb = batch_tile if batch_tile is not None else Bp
    assert Bp % tb == 0 and tb % 8 == 0
    grid = (Bp // tb, T // tc)

    in_specs = [
        pl.BlockSpec((2, tb, Hp), lambda b, t: (0, b, 0)),                 # initial (h, c)
        pl.BlockSpec((tc, tb, G), lambda b, t: (t, b, gate_col_block)),    # gate slab chunk
        pl.BlockSpec((Hp, G), lambda b, t: (0, 0)),                        # recurrent weights
    ]
    hc_spec = pl.BlockSpec((2, tb, Hp), lambda b, t: (0, b, 0))
    hc_shape = jax.ShapeDtypeStruct((2, Bp, Hp), jnp.float32)
    if emit_hs:
        out_specs = (pl.BlockSpec((tc, tb, Hp), lambda b, t: (t, b, 0)), hc_spec)
        out_shape = (jax.ShapeDtypeStruct((T, Bp, Hp), hs_dtype), hc_shape)
    else:
        out_specs = hc_spec
        out_shape = hc_shape

    res = pl.pallas_call(
        _make_lstm_kernel(emit_hs, unroll),
        grid_spec=pltpu.PrefetchScalarGridSpec(
            num_scalar_prefetch=0,
            grid=grid,
            in_specs=in_specs,
            out_specs=out_specs,
            scratch_shapes=[
                pltpu.VMEM((tb, Hp), jnp.float32),   # h carry across T-chunks
                pltpu.VMEM((tb, Hp), jnp.float32),   # c carry across T-chunks
            ],
        ),
        out_shape=out_shape,
        compiler_params=pltpu.CompilerParams(
            dimension_semantics=("parallel", "arbitrary")),
    )(hc0, gx, whh)
    if emit_hs:
        return res
    return None, res


# ------------------------------------ forward ------------------------------------
def seq2seq_forward(tokens, pparams, *, vocab_size, hidden_units, t_chunk=None,
                    batch_tile=None, mxu_dtype=jnp.float32,
                    gx_dtype=jnp.float32, hs_dtype=jnp.float32):
    """tokens: int32 (B, T).  pparams: padded params.  Returns logits (B, T, V) f32."""
    del hidden_units  # padded sizes come from pparams
    B, T = tokens.shape
    V = vocab_size
    Ep = pparams["embedding"].shape[1]
    Hp = pparams["whh_enc"].shape[0]
    Vp = pparams["w_fc"].shape[1]
    Bp = _round_up(B, 8)

    cast = lambda a: a.astype(mxu_dtype)

    # Embedding gather (data-dependent row lookup) stays as plain-JAX glue.
    emb = jnp.take(pparams["embedding"], tokens, axis=0)           # (B, T, Ep)
    emb = jnp.pad(emb, ((0, Bp - B), (0, 0), (0, 0)))              # (Bp, T, Ep)
    x_flat = cast(jnp.transpose(emb, (1, 0, 2)).reshape(T * Bp, Ep))

    # Fused encoder+decoder input->gate matmul: x_flat is read once, output is
    # 8*Hp wide (enc gates | dec gates), split for free via the lstm_scan BlockSpec.
    gx = linear(x_flat, cast(pparams["wih_encdec"]), pparams["b_encdec"],
                tm_cap=256, tn_cap=1024, out_dtype=gx_dtype)
    gx = gx.reshape(T, Bp, 8 * Hp)

    hc0 = jnp.zeros((2, Bp, Hp), jnp.float32)
    # Encoder recurrence: hidden-state sequence is never written to HBM.
    _, hc_enc = lstm_scan(gx, cast(pparams["whh_enc"]), hc0, gate_col_block=0,
                          emit_hs=False, t_chunk=t_chunk, batch_tile=batch_tile)
    # Decoder recurrence seeded with the encoder's final state.
    hs_dec, _ = lstm_scan(gx, cast(pparams["whh_dec"]), hc_enc, gate_col_block=1,
                          emit_hs=True, hs_dtype=hs_dtype, t_chunk=t_chunk,
                          batch_tile=batch_tile)

    # Vocab projection on batch-major-flattened hidden states -> logits come out
    # batch-major directly (no logits transpose); lane-dense 1024-wide output tiles.
    hs_bm = cast(jnp.transpose(hs_dec, (1, 0, 2)).reshape(Bp * T, Hp))
    logits = linear(hs_bm, cast(pparams["w_fc"]), pparams["b_fc"],
                    tm_cap=512, tn_cap=1024)                        # (Bp*T, Vp)
    return logits.reshape(Bp, T, Vp)[:B, :, :V]


# ------------------------------- params & padding --------------------------------
def init_params(key, vocab_size, embedding_dim, hidden_units):
    ks = jax.random.split(key, 9)
    H, E, V = hidden_units, embedding_dim, vocab_size
    s = 1.0 / jnp.sqrt(jnp.float32(H))
    u = lambda k, shape: jax.random.uniform(k, shape, jnp.float32, -s, s)
    return {
        "embedding": jax.random.normal(ks[0], (V, E), jnp.float32),
        # PyTorch stores (4H, E)/(4H, H); kept pre-transposed for x @ W.
        "wih_enc": u(ks[1], (E, 4 * H)),
        "whh_enc": u(ks[2], (H, 4 * H)),
        "b_enc":   u(ks[3], (1, 4 * H)),     # b_ih + b_hh folded into one bias
        "wih_dec": u(ks[4], (E, 4 * H)),
        "whh_dec": u(ks[5], (H, 4 * H)),
        "b_dec":   u(ks[6], (1, 4 * H)),
        "w_fc":    u(ks[7], (H, V)),
        "b_fc":    u(ks[8], (1, V)),
    }


def pad_params(p, vocab_size, embedding_dim, hidden_units):
    """Zero-pad every operand to the (8, 128) grain.  The 4H gate axis is padded per
    gate so each i/f/g/o block is 128-lane aligned (zero padding keeps padded hidden
    lanes exactly 0 through the recurrence since h0=c0=0).  Encoder/decoder input
    weights and biases are fused along N into a single (Ep, 8*Hp) operand."""
    H, E, V = hidden_units, embedding_dim, vocab_size
    Hp, Ep, Vp = _round_up(H, 128), _round_up(E, 128), _round_up(V, 128)

    def pad2(a, rows, cols):
        return jnp.pad(a, ((0, rows - a.shape[0]), (0, cols - a.shape[1])))

    def pad_gate_cols(a, rows):
        a4 = a.reshape(a.shape[0], 4, H)
        a4 = jnp.pad(a4, ((0, rows - a.shape[0]), (0, 0), (0, Hp - H)))
        return a4.reshape(rows, 4 * Hp)

    wih_encdec = jnp.concatenate(
        [pad_gate_cols(p["wih_enc"], Ep), pad_gate_cols(p["wih_dec"], Ep)], axis=1)
    b_encdec = jnp.concatenate(
        [pad_gate_cols(p["b_enc"], 1), pad_gate_cols(p["b_dec"], 1)], axis=1)

    return {
        "embedding":  pad2(p["embedding"], V, Ep),
        "wih_encdec": wih_encdec,                 # (Ep, 8*Hp) fused enc|dec
        "b_encdec":   b_encdec,                   # (1, 8*Hp)
        "whh_enc":    pad_gate_cols(p["whh_enc"], Hp),
        "whh_dec":    pad_gate_cols(p["whh_dec"], Hp),
        "w_fc":       pad2(p["w_fc"], Hp, Vp),
        "b_fc":       pad2(p["b_fc"], 1, Vp),
    }


# ----------------- pure-JAX reference (mirrors torch semantics) ------------------
def _ref_forward(tokens, params):
    dotf = functools.partial(jnp.dot, precision=lax.Precision.HIGHEST)
    emb = jnp.take(params["embedding"], tokens, axis=0)            # (B, T, E)
    B, _, _ = emb.shape
    H = params["whh_enc"].shape[0]

    def lstm(x_seq, h0, c0, wih, whh, b):
        def step(carry, x_t):
            h, c = carry
            gates = dotf(x_t, wih) + dotf(h, whh) + b
            i = jax.nn.sigmoid(gates[:, 0 * H:1 * H])
            f = jax.nn.sigmoid(gates[:, 1 * H:2 * H])
            g = jnp.tanh(gates[:, 2 * H:3 * H])
            o = jax.nn.sigmoid(gates[:, 3 * H:4 * H])
            c_new = f * c + i * g
            h_new = o * jnp.tanh(c_new)
            return (h_new, c_new), h_new
        (h, c), hs = lax.scan(step, (h0, c0), jnp.transpose(x_seq, (1, 0, 2)))
        return jnp.transpose(hs, (1, 0, 2)), (h, c)

    h0 = jnp.zeros((B, H), jnp.float32)
    c0 = jnp.zeros((B, H), jnp.float32)
    _, (h, c) = lstm(emb, h0, c0, params["wih_enc"], params["whh_enc"], params["b_enc"])
    dec_out, _ = lstm(emb, h, c, params["wih_dec"], params["whh_dec"], params["b_dec"])
    return dotf(dec_out, params["w_fc"]) + params["b_fc"]


if __name__ == "__main__":
    # embedding_dim=256 / hidden_units=50 per the module spec; small vocab/batch/seq.
    VOCAB, EMB, HID = 1000, 256, 50
    BATCH, SEQ = 2, 8

    key = jax.random.PRNGKey(0)
    k_tok, k_par = jax.random.split(key)
    params = init_params(k_par, VOCAB, EMB, HID)
    pparams = pad_params(params, VOCAB, EMB, HID)
    tokens = jax.random.randint(k_tok, (BATCH, SEQ), 0, VOCAB, dtype=jnp.int32)

    # t_chunk=4 -> 2 time-chunks, exercising the streamed (h, c) carry + gated final
    # store.  batch_tile defaults to the full (padded) batch; on v7x pass batch_tile=8
    # with Bp>=16 to shard the recurrence across both TensorCores.
    # TODO(synk): for v6e/v7x production pass mxu_dtype=gx_dtype=hs_dtype=jnp.bfloat16
    # (halves weight/intermediate HBM traffic; requires a looser tolerance).
    fwd = jax.jit(functools.partial(
        seq2seq_forward, vocab_size=VOCAB, hidden_units=HID, t_chunk=4))
    out = jax.block_until_ready(fwd(tokens, pparams))
    ref = jax.block_until_ready(_ref_forward(tokens, params))

    assert out.shape == (BATCH, SEQ, VOCAB), out.shape
    err = float(jnp.max(jnp.abs(out - ref)))
    assert jnp.allclose(out, ref, atol=2e-4, rtol=2e-4), f"mismatch vs reference: {err}"
    print("KERNEL_OK")
</pallas_src>

<mosaic_0001>
module attributes {stable_mosaic.version = 11 : i64} {
  func.func @kernel(%arg0: i32, %arg1: i32, %arg2: memref<2x8x128xf32, #tpu.memory_space<vmem>>, %arg3: memref<4x8x512xf32, #tpu.memory_space<vmem>>, %arg4: memref<128x512xf32, #tpu.memory_space<vmem>>, %arg5: memref<2x8x128xf32, #tpu.memory_space<vmem>>, %arg6: memref<8x128xf32, #tpu.memory_space<vmem>>, %arg7: memref<8x128xf32, #tpu.memory_space<vmem>>) attributes {dimension_semantics = [#tpu.dimension_semantics<parallel>, #tpu.dimension_semantics<arbitrary>], iteration_bounds = array<i64: 1, 2>, scalar_prefetch = 0 : i64, scratch_operands = 2 : i64, tpu.core_type = #tpu.core_type<tc>, window_params = [{transform_indices = @transform_0, window_bounds = array<i64: 2, 8, 128>}, {transform_indices = @transform_1, window_bounds = array<i64: 4, 8, 512>}, {pipeline_mode = #tpu.pipeline_mode<synchronous>, transform_indices = @transform_2, window_bounds = array<i64: 128, 512>}, {transform_indices = @transform_3, window_bounds = array<i64: 2, 8, 128>}]} {
    %c0_i32 = arith.constant 0 : i32
    %0 = arith.cmpi eq, %arg1, %c0_i32 : i32
    %1 = arith.extui %0 : i1 to i32
    %c0_i32_0 = arith.constant 0 : i32
    %2 = arith.cmpi ne, %1, %c0_i32_0 : i32
    scf.if %2 {
      %c0_42 = arith.constant 0 : index
      %c0_43 = arith.constant 0 : index
      %c0_44 = arith.constant 0 : index
      %134 = vector.load %arg2[%c0_42, %c0_43, %c0_44] : memref<2x8x128xf32, #tpu.memory_space<vmem>>, vector<1x8x128xf32>
      %135 = vector.shape_cast %134 : vector<1x8x128xf32> to vector<8x128xf32>
      %c0_45 = arith.constant 0 : index
      %c0_46 = arith.constant 0 : index
      %136 = vector.load %arg6[%c0_45, %c0_46] : memref<8x128xf32, #tpu.memory_space<vmem>>, vector<8x128xf32>
      tpu.vector_store %arg6[%c0_45, %c0_46], %135 {strides = array<i32>} : memref<8x128xf32, #tpu.memory_space<vmem>>, vector<8x128xf32>,
      %c1 = arith.constant 1 : index
      %c0_47 = arith.constant 0 : index
      %c0_48 = arith.constant 0 : index
      %137 = vector.load %arg2[%c1, %c0_47, %c0_48] : memref<2x8x128xf32, #tpu.memory_space<vmem>>, vector<1x8x128xf32>
      %138 = vector.shape_cast %137 : vector<1x8x128xf32> to vector<8x128xf32>
      %c0_49 = arith.constant 0 : index
      %c0_50 = arith.constant 0 : index
      %139 = vector.load %arg7[%c0_49, %c0_50] : memref<8x128xf32, #tpu.memory_space<vmem>>, vector<8x128xf32>
      tpu.vector_store %arg7[%c0_49, %c0_50], %138 {strides = array<i32>} : memref<8x128xf32, #tpu.memory_space<vmem>>, vector<8x128xf32>,
    } else {
    }
    %c0 = arith.constant 0 : index
    %c0_1 = arith.constant 0 : index
    %3 = vector.load %arg6[%c0, %c0_1] : memref<8x128xf32, #tpu.memory_space<vmem>>, vector<8x128xf32>
    %c0_2 = arith.constant 0 : index
    %c0_3 = arith.constant 0 : index
    %4 = vector.load %arg7[%c0_2, %c0_3] : memref<8x128xf32, #tpu.memory_space<vmem>>, vector<8x128xf32>
    %c0_i32_4 = arith.constant 0 : i32
    %5 = arith.index_cast %c0_i32_4 : i32 to index
    %c0_5 = arith.constant 0 : index
    %c0_6 = arith.constant 0 : index
    %6 = vector.load %arg3[%5, %c0_5, %c0_6] : memref<4x8x512xf32, #tpu.memory_space<vmem>>, vector<1x8x512xf32>
    %7 = vector.shape_cast %6 : vector<1x8x512xf32> to vector<8x512xf32>
    %c0_7 = arith.constant 0 : index
    %c0_8 = arith.constant 0 : index
    %8 = vector.load %arg4[%c0_7, %c0_8] : memref<128x512xf32, #tpu.memory_space<vmem>>, vector<128x512xf32>
    %cst = arith.constant dense<0.000000e+00> : vector<8x512xf32>
    %9 = tpu.matmul %3, %8, %cst {dimension_numbers = #tpu.dot_dimension_numbers<[1], [0], [0], [1], [0, 0, 1, 1], [], []>} : vector<8x128xf32>, vector<128x512xf32>, vector<8x512xf32> -> vector<8x512xf32>
    %10 = arith.addf %7, %9 : vector<8x512xf32>
    %11 = vector.extract_strided_slice %10 {offsets = [0, 0], sizes = [8, 128], strides = [1, 1]} : vector<8x512xf32> to vector<8x128xf32>
    %12 = arith.negf %11 : vector<8x128xf32>
    %13 = math.exp %12 : vector<8x128xf32>
    %cst_9 = arith.constant 1.000000e+00 : f32
    %14 = vector.broadcast %cst_9 : f32 to vector<8x128xf32>
    %15 = arith.addf %14, %13 : vector<8x128xf32>
    %16 = arith.divf %14, %15 : vector<8x128xf32>
    %17 = vector.extract_strided_slice %10 {offsets = [0, 128], sizes = [8, 128], strides = [1, 1]} : vector<8x512xf32> to vector<8x128xf32>
    %18 = arith.negf %17 : vector<8x128xf32>
    %19 = math.exp %18 : vector<8x128xf32>
    %cst_10 = arith.constant 1.000000e+00 : f32
    %20 = vector.broadcast %cst_10 : f32 to vector<8x128xf32>
    %21 = arith.addf %20, %19 : vector<8x128xf32>
    %22 = arith.divf %20, %21 : vector<8x128xf32>
    %23 = vector.extract_strided_slice %10 {offsets = [0, 256], sizes = [8, 128], strides = [1, 1]} : vector<8x512xf32> to vector<8x128xf32>
    %24 = math.tanh %23 : vector<8x128xf32>
    %25 = vector.extract_strided_slice %10 {offsets = [0, 384], sizes = [8, 128], strides = [1, 1]} : vector<8x512xf32> to vector<8x128xf32>
    %26 = arith.negf %25 : vector<8x128xf32>
    %27 = math.exp %26 : vector<8x128xf32>
    %cst_11 = arith.constant 1.000000e+00 : f32
    %28 = vector.broadcast %cst_11 : f32 to vector<8x128xf32>
    %29 = arith.addf %28, %27 : vector<8x128xf32>
    %30 = arith.divf %28, %29 : vector<8x128xf32>
    %31 = arith.mulf %22, %4 : vector<8x128xf32>
    %32 = arith.mulf %16, %24 : vector<8x128xf32>
    %33 = arith.addf %31, %32 : vector<8x128xf32>
    %34 = math.tanh %33 : vector<8x128xf32>
    %35 = arith.mulf %30, %34 : vector<8x128xf32>
    %c1_i32 = arith.constant 1 : i32
    %36 = arith.index_cast %c1_i32 : i32 to index
    %c0_12 = arith.constant 0 : index
    %c0_13 = arith.constant 0 : index
    %37 = vector.load %arg3[%36, %c0_12, %c0_13] : memref<4x8x512xf32, #tpu.memory_space<vmem>>, vector<1x8x512xf32>
    %38 = vector.shape_cast %37 : vector<1x8x512xf32> to vector<8x512xf32>
    %c0_14 = arith.constant 0 : index
    %c0_15 = arith.constant 0 : index
    %39 = vector.load %arg4[%c0_14, %c0_15] : memref<128x512xf32, #tpu.memory_space<vmem>>, vector<128x512xf32>
    %cst_16 = arith.constant dense<0.000000e+00> : vector<8x512xf32>
    %40 = tpu.matmul %35, %39, %cst_16 {dimension_numbers = #tpu.dot_dimension_numbers<[1], [0], [0], [1], [0, 0, 1, 1], [], []>} : vector<8x128xf32>, vector<128x512xf32>, vector<8x512xf32> -> vector<8x512xf32>
    %41 = arith.addf %38, %40 : vector<8x512xf32>
    %42 = vector.extract_strided_slice %41 {offsets = [0, 0], sizes = [8, 128], strides = [1, 1]} : vector<8x512xf32> to vector<8x128xf32>
    %43 = arith.negf %42 : vector<8x128xf32>
    %44 = math.exp %43 : vector<8x128xf32>
    %cst_17 = arith.constant 1.000000e+00 : f32
    %45 = vector.broadcast %cst_17 : f32 to vector<8x128xf32>
    %46 = arith.addf %45, %44 : vector<8x128xf32>
    %47 = arith.divf %45, %46 : vector<8x128xf32>
    %48 = vector.extract_strided_slice %41 {offsets = [0, 128], sizes = [8, 128], strides = [1, 1]} : vector<8x512xf32> to vector<8x128xf32>
    %49 = arith.negf %48 : vector<8x128xf32>
    %50 = math.exp %49 : vector<8x128xf32>
    %cst_18 = arith.constant 1.000000e+00 : f32
    %51 = vector.broadcast %cst_18 : f32 to vector<8x128xf32>
    %52 = arith.addf %51, %50 : vector<8x128xf32>
    %53 = arith.divf %51, %52 : vector<8x128xf32>
    %54 = vector.extract_strided_slice %41 {offsets = [0, 256], sizes = [8, 128], strides = [1, 1]} : vector<8x512xf32> to vector<8x128xf32>
    %55 = math.tanh %54 : vector<8x128xf32>
    %56 = vector.extract_strided_slice %41 {offsets = [0, 384], sizes = [8, 128], strides = [1, 1]} : vector<8x512xf32> to vector<8x128xf32>
    %57 = arith.negf %56 : vector<8x128xf32>
    %58 = math.exp %57 : vector<8x128xf32>
    %cst_19 = arith.constant 1.000000e+00 : f32
    %59 = vector.broadcast %cst_19 : f32 to vector<8x128xf32>
    %60 = arith.addf %59, %58 : vector<8x128xf32>
    %61 = arith.divf %59, %60 : vector<8x128xf32>
    %62 = arith.mulf %53, %33 : vector<8x128xf32>
    %63 = arith.mulf %47, %55 : vector<8x128xf32>
    %64 = arith.addf %62, %63 : vector<8x128xf32>
    %65 = math.tanh %64 : vector<8x128xf32>
    %66 = arith.mulf %61, %65 : vector<8x128xf32>
    %c2_i32 = arith.constant 2 : i32
    %67 = arith.index_cast %c2_i32 : i32 to index
    %c0_20 = arith.constant 0 : index
    %c0_21 = arith.constant 0 : index
    %68 = vector.load %arg3[%67, %c0_20, %c0_21] : memref<4x8x512xf32, #tpu.memory_space<vmem>>, vector<1x8x512xf32>
    %69 = vector.shape_cast %68 : vector<1x8x512xf32> to vector<8x512xf32>
    %c0_22 = arith.constant 0 : index
    %c0_23 = arith.constant 0 : index
    %70 = vector.load %arg4[%c0_22, %c0_23] : memref<128x512xf32, #tpu.memory_space<vmem>>, vector<128x512xf32>
    %cst_24 = arith.constant dense<0.000000e+00> : vector<8x512xf32>
    %71 = tpu.matmul %66, %70, %cst_24 {dimension_numbers = #tpu.dot_dimension_numbers<[1], [0], [0], [1], [0, 0, 1, 1], [], []>} : vector<8x128xf32>, vector<128x512xf32>, vector<8x512xf32> -> vector<8x512xf32>
    %72 = arith.addf %69, %71 : vector<8x512xf32>
    %73 = vector.extract_strided_slice %72 {offsets = [0, 0], sizes = [8, 128], strides = [1, 1]} : vector<8x512xf32> to vector<8x128xf32>
    %74 = arith.negf %73 : vector<8x128xf32>
    %75 = math.exp %74 : vector<8x128xf32>
    %cst_25 = arith.constant 1.000000e+00 : f32
    %76 = vector.broadcast %cst_25 : f32 to vector<8x128xf32>
    %77 = arith.addf %76, %75 : vector<8x128xf32>
    %78 = arith.divf %76, %77 : vector<8x128xf32>
    %79 = vector.extract_strided_slice %72 {offsets = [0, 128], sizes = [8, 128], strides = [1, 1]} : vector<8x512xf32> to vector<8x128xf32>
    %80 = arith.negf %79 : vector<8x128xf32>
    %81 = math.exp %80 : vector<8x128xf32>
    %cst_26 = arith.constant 1.000000e+00 : f32
    %82 = vector.broadcast %cst_26 : f32 to vector<8x128xf32>
    %83 = arith.addf %82, %81 : vector<8x128xf32>
    %84 = arith.divf %82, %83 : vector<8x128xf32>
    %85 = vector.extract_strided_slice %72 {offsets = [0, 256], sizes = [8, 128], strides = [1, 1]} : vector<8x512xf32> to vector<8x128xf32>
    %86 = math.tanh %85 : vector<8x128xf32>
    %87 = vector.extract_strided_slice %72 {offsets = [0, 384], sizes = [8, 128], strides = [1, 1]} : vector<8x512xf32> to vector<8x128xf32>
    %88 = arith.negf %87 : vector<8x128xf32>
    %89 = math.exp %88 : vector<8x128xf32>
    %cst_27 = arith.constant 1.000000e+00 : f32
    %90 = vector.broadcast %cst_27 : f32 to vector<8x128xf32>
    %91 = arith.addf %90, %89 : vector<8x128xf32>
    %92 = arith.divf %90, %91 : vector<8x128xf32>
    %93 = arith.mulf %84, %64 : vector<8x128xf32>
    %94 = arith.mulf %78, %86 : vector<8x128xf32>
    %95 = arith.addf %93, %94 : vector<8x128xf32>
    %96 = math.tanh %95 : vector<8x128xf32>
    %97 = arith.mulf %92, %96 : vector<8x128xf32>
    %c3_i32 = arith.constant 3 : i32
    %98 = arith.index_cast %c3_i32 : i32 to index
    %c0_28 = arith.constant 0 : index
    %c0_29 = arith.constant 0 : index
    %99 = vector.load %arg3[%98, %c0_28, %c0_29] : memref<4x8x512xf32, #tpu.memory_space<vmem>>, vector<1x8x512xf32>
    %100 = vector.shape_cast %99 : vector<1x8x512xf32> to vector<8x512xf32>
    %c0_30 = arith.constant 0 : index
    %c0_31 = arith.constant 0 : index
    %101 = vector.load %arg4[%c0_30, %c0_31] : memref<128x512xf32, #tpu.memory_space<vmem>>, vector<128x512xf32>
    %cst_32 = arith.constant dense<0.000000e+00> : vector<8x512xf32>
    %102 = tpu.matmul %97, %101, %cst_32 {dimension_numbers = #tpu.dot_dimension_numbers<[1], [0], [0], [1], [0, 0, 1, 1], [], []>} : vector<8x128xf32>, vector<128x512xf32>, vector<8x512xf32> -> vector<8x512xf32>
    %103 = arith.addf %100, %102 : vector<8x512xf32>
    %104 = vector.extract_strided_slice %103 {offsets = [0, 0], sizes = [8, 128], strides = [1, 1]} : vector<8x512xf32> to vector<8x128xf32>
    %105 = arith.negf %104 : vector<8x128xf32>
    %106 = math.exp %105 : vector<8x128xf32>
    %cst_33 = arith.constant 1.000000e+00 : f32
    %107 = vector.broadcast %cst_33 : f32 to vector<8x128xf32>
    %108 = arith.addf %107, %106 : vector<8x128xf32>
    %109 = arith.divf %107, %108 : vector<8x128xf32>
    %110 = vector.extract_strided_slice %103 {offsets = [0, 128], sizes = [8, 128], strides = [1, 1]} : vector<8x512xf32> to vector<8x128xf32>
    %111 = arith.negf %110 : vector<8x128xf32>
    %112 = math.exp %111 : vector<8x128xf32>
    %cst_34 = arith.constant 1.000000e+00 : f32
    %113 = vector.broadcast %cst_34 : f32 to vector<8x128xf32>
    %114 = arith.addf %113, %112 : vector<8x128xf32>
    %115 = arith.divf %113, %114 : vector<8x128xf32>
    %116 = vector.extract_strided_slice %103 {offsets = [0, 256], sizes = [8, 128], strides = [1, 1]} : vector<8x512xf32> to vector<8x128xf32>
    %117 = math.tanh %116 : vector<8x128xf32>
    %118 = vector.extract_strided_slice %103 {offsets = [0, 384], sizes = [8, 128], strides = [1, 1]} : vector<8x512xf32> to vector<8x128xf32>
    %119 = arith.negf %118 : vector<8x128xf32>
    %120 = math.exp %119 : vector<8x128xf32>
    %cst_35 = arith.constant 1.000000e+00 : f32
    %121 = vector.broadcast %cst_35 : f32 to vector<8x128xf32>
    %122 = arith.addf %121, %120 : vector<8x128xf32>
    %123 = arith.divf %121, %122 : vector<8x128xf32>
    %124 = arith.mulf %115, %95 : vector<8x128xf32>
    %125 = arith.mulf %109, %117 : vector<8x128xf32>
    %126 = arith.addf %124, %125 : vector<8x128xf32>
    %127 = math.tanh %126 : vector<8x128xf32>
    %128 = arith.mulf %123, %127 : vector<8x128xf32>
    %c4_i32 = arith.constant 4 : i32
    %c0_36 = arith.constant 0 : index
    %c0_37 = arith.constant 0 : index
    %129 = vector.load %arg6[%c0_36, %c0_37] : memref<8x128xf32, #tpu.memory_space<vmem>>, vector<8x128xf32>
    tpu.vector_store %arg6[%c0_36, %c0_37], %128 {strides = array<i32>} : memref<8x128xf32, #tpu.memory_space<vmem>>, vector<8x128xf32>,
    %c0_38 = arith.constant 0 : index
    %c0_39 = arith.constant 0 : index
    %130 = vector.load %arg7[%c0_38, %c0_39] : memref<8x128xf32, #tpu.memory_space<vmem>>, vector<8x128xf32>
    tpu.vector_store %arg7[%c0_38, %c0_39], %126 {strides = array<i32>} : memref<8x128xf32, #tpu.memory_space<vmem>>, vector<8x128xf32>,
    %c1_i32_40 = arith.constant 1 : i32
    %131 = arith.cmpi eq, %arg1, %c1_i32_40 : i32
    %132 = arith.extui %131 : i1 to i32
    %c0_i32_41 = arith.constant 0 : i32
    %133 = arith.cmpi ne, %132, %c0_i32_41 : i32
    scf.if %133 {
      %c0_42 = arith.constant 0 : index
      %c0_43 = arith.constant 0 : index
      %c0_44 = arith.constant 0 : index
      %134 = vector.load %arg5[%c0_42, %c0_43, %c0_44] : memref<2x8x128xf32, #tpu.memory_space<vmem>>, vector<1x8x128xf32>
      %135 = vector.shape_cast %134 : vector<1x8x128xf32> to vector<8x128xf32>
      %136 = vector.shape_cast %128 : vector<8x128xf32> to vector<1x8x128xf32>
      tpu.vector_store %arg5[%c0_42, %c0_43, %c0_44], %136 {strides = array<i32>} : memref<2x8x128xf32, #tpu.memory_space<vmem>>, vector<1x8x128xf32>,
      %c1 = arith.constant 1 : index
      %c0_45 = arith.constant 0 : index
      %c0_46 = arith.constant 0 : index
      %137 = vector.load %arg5[%c1, %c0_45, %c0_46] : memref<2x8x128xf32, #tpu.memory_space<vmem>>, vector<1x8x128xf32>
      %138 = vector.shape_cast %137 : vector<1x8x128xf32> to vector<8x128xf32>
      %139 = vector.shape_cast %126 : vector<8x128xf32> to vector<1x8x128xf32>
      tpu.vector_store %arg5[%c1, %c0_45, %c0_46], %139 {strides = array<i32>} : memref<2x8x128xf32, #tpu.memory_space<vmem>>, vector<1x8x128xf32>,
    } else {
    }
    return
  }
  func.func @transform_0(%arg0: i32, %arg1: i32) -> (i32, i32, i32) {
    %c0_i32 = arith.constant 0 : i32
    %c0_i32_0 = arith.constant 0 : i32
    %c0_i32_1 = arith.constant 0 : i32
    return %c0_i32, %arg0, %c0_i32_0 : i32, i32, i32
  }
  func.func @transform_1(%arg0: i32, %arg1: i32) -> (i32, i32, i32) {
    %c0_i32 = arith.constant 0 : i32
    %c0_i32_0 = arith.constant 0 : i32
    return %arg1, %arg0, %c0_i32 : i32, i32, i32
  }
  func.func @transform_2(%arg0: i32, %arg1: i32) -> (i32, i32) {
    %c0_i32 = arith.constant 0 : i32
    %c0_i32_0 = arith.constant 0 : i32
    %c0_i32_1 = arith.constant 0 : i32
    return %c0_i32, %c0_i32_0 : i32, i32
  }
  func.func @transform_3(%arg0: i32, %arg1: i32) -> (i32, i32, i32) {
    %c0_i32 = arith.constant 0 : i32
    %c0_i32_0 = arith.constant 0 : i32
    %c0_i32_1 = arith.constant 0 : i32
    return %c0_i32, %arg0, %c0_i32_0 : i32, i32, i32
  }
}

module attributes {stable_mosaic.version = 11 : i64} {
  func.func @_linear_kernel(%arg0: i32, %arg1: i32, %arg2: i32, %arg3: memref<64x256xf32, #tpu.memory_space<vmem>>, %arg4: memref<256x1024xf32, #tpu.memory_space<vmem>>, %arg5: memref<1x1024xf32, #tpu.memory_space<vmem>>, %arg6: memref<64x1024xf32, #tpu.memory_space<vmem>>, %arg7: memref<64x1024xf32, #tpu.memory_space<vmem>>) attributes {dimension_semantics = [#tpu.dimension_semantics<parallel>, #tpu.dimension_semantics<parallel>, #tpu.dimension_semantics<arbitrary>], iteration_bounds = array<i64: 1, 1, 1>, scalar_prefetch = 0 : i64, scratch_operands = 1 : i64, tpu.core_type = #tpu.core_type<tc>, window_params = [{transform_indices = @transform_0, window_bounds = array<i64: 64, 256>}, {transform_indices = @transform_1, window_bounds = array<i64: 256, 1024>}, {transform_indices = @transform_2, window_bounds = array<i64: 1, 1024>}, {transform_indices = @transform_3, window_bounds = array<i64: 64, 1024>}]} {
    %c0_i32 = arith.constant 0 : i32
    %0 = arith.cmpi eq, %arg2, %c0_i32 : i32
    %1 = arith.extui %0 : i1 to i32
    %c0_i32_0 = arith.constant 0 : i32
    %2 = arith.cmpi ne, %1, %c0_i32_0 : i32
    scf.if %2 {
      %cst_10 = arith.constant 0.000000e+00 : f32
      %12 = vector.broadcast %cst_10 : f32 to vector<64x1024xf32>
      %c0_11 = arith.constant 0 : index
      %c0_12 = arith.constant 0 : index
      %13 = vector.load %arg7[%c0_11, %c0_12] : memref<64x1024xf32, #tpu.memory_space<vmem>>, vector<64x1024xf32>
      tpu.vector_store %arg7[%c0_11, %c0_12], %12 {strides = array<i32>} : memref<64x1024xf32, #tpu.memory_space<vmem>>, vector<64x1024xf32>,
    } else {
    }
    %c0 = arith.constant 0 : index
    %c0_1 = arith.constant 0 : index
    %3 = vector.load %arg7[%c0, %c0_1] : memref<64x1024xf32, #tpu.memory_space<vmem>>, vector<64x1024xf32>
    %c0_2 = arith.constant 0 : index
    %c0_3 = arith.constant 0 : index
    %4 = vector.load %arg3[%c0_2, %c0_3] : memref<64x256xf32, #tpu.memory_space<vmem>>, vector<64x256xf32>
    %c0_4 = arith.constant 0 : index
    %c0_5 = arith.constant 0 : index
    %5 = vector.load %arg4[%c0_4, %c0_5] : memref<256x1024xf32, #tpu.memory_space<vmem>>, vector<256x1024xf32>
    %cst = arith.constant dense<0.000000e+00> : vector<64x1024xf32>
    %6 = tpu.matmul %4, %5, %cst {dimension_numbers = #tpu.dot_dimension_numbers<[1], [0], [0], [1], [0, 0, 1, 1], [], []>} : vector<64x256xf32>, vector<256x1024xf32>, vector<64x1024xf32> -> vector<64x1024xf32>
    %7 = arith.addf %3, %6 : vector<64x1024xf32>
    %c0_6 = arith.constant 0 : index
    %c0_7 = arith.constant 0 : index
    %8 = vector.load %arg7[%c0_6, %c0_7] : memref<64x1024xf32, #tpu.memory_space<vmem>>, vector<64x1024xf32>
    tpu.vector_store %arg7[%c0_6, %c0_7], %7 {strides = array<i32>} : memref<64x1024xf32, #tpu.memory_space<vmem>>, vector<64x1024xf32>,
    %c0_i32_8 = arith.constant 0 : i32
    %9 = arith.cmpi eq, %arg2, %c0_i32_8 : i32
    %10 = arith.extui %9 : i1 to i32
    %c0_i32_9 = arith.constant 0 : i32
    %11 = arith.cmpi ne, %10, %c0_i32_9 : i32
    scf.if %11 {
      %c0_10 = arith.constant 0 : index
      %c0_11 = arith.constant 0 : index
      %12 = vector.load %arg7[%c0_10, %c0_11] : memref<64x1024xf32, #tpu.memory_space<vmem>>, vector<64x1024xf32>
      %c0_12 = arith.constant 0 : index
      %c0_13 = arith.constant 0 : index
      %13 = vector.load %arg5[%c0_12, %c0_13] : memref<1x1024xf32, #tpu.memory_space<vmem>>, vector<1x1024xf32>
      %14 = vector.broadcast %13 : vector<1x1024xf32> to vector<64x1024xf32>
      %15 = arith.addf %12, %14 : vector<64x1024xf32>
      %c0_14 = arith.constant 0 : index
      %c0_15 = arith.constant 0 : index
      %16 = vector.load %arg6[%c0_14, %c0_15] : memref<64x1024xf32, #tpu.memory_space<vmem>>, vector<64x1024xf32>
      tpu.vector_store %arg6[%c0_14, %c0_15], %15 {strides = array<i32>} : memref<64x1024xf32, #tpu.memory_space<vmem>>, vector<64x1024xf32>,
    } else {
    }
    return
  }
  func.func @transform_0(%arg0: i32, %arg1: i32, %arg2: i32) -> (i32, i32) {
    %c0_i32 = arith.constant 0 : i32
    return %arg0, %arg2 : i32, i32
  }
  func.func @transform_1(%arg0: i32, %arg1: i32, %arg2: i32) -> (i32, i32) {
    %c0_i32 = arith.constant 0 : i32
    return %arg2, %arg1 : i32, i32
  }
  func.func @transform_2(%arg0: i32, %arg1: i32, %arg2: i32) -> (i32, i32) {
    %c0_i32 = arith.constant 0 : i32
    %c0_i32_0 = arith.constant 0 : i32
    return %c0_i32, %arg1 : i32, i32
  }
  func.func @transform_3(%arg0: i32, %arg1: i32, %arg2: i32) -> (i32, i32) {
    %c0_i32 = arith.constant 0 : i32
    return %arg0, %arg1 : i32, i32
  }
}

module attributes {stable_mosaic.version = 11 : i64} {
  func.func @kernel(%arg0: i32, %arg1: i32, %arg2: memref<2x8x128xf32, #tpu.memory_space<vmem>>, %arg3: memref<4x8x512xf32, #tpu.memory_space<vmem>>, %arg4: memref<128x512xf32, #tpu.memory_space<vmem>>, %arg5: memref<4x8x128xf32, #tpu.memory_space<vmem>>, %arg6: memref<2x8x128xf32, #tpu.memory_space<vmem>>, %arg7: memref<8x128xf32, #tpu.memory_space<vmem>>, %arg8: memref<8x128xf32, #tpu.memory_space<vmem>>) attributes {dimension_semantics = [#tpu.dimension_semantics<parallel>, #tpu.dimension_semantics<arbitrary>], iteration_bounds = array<i64: 1, 2>, scalar_prefetch = 0 : i64, scratch_operands = 2 : i64, tpu.core_type = #tpu.core_type<tc>, window_params = [{transform_indices = @transform_0, window_bounds = array<i64: 2, 8, 128>}, {transform_indices = @transform_1, window_bounds = array<i64: 4, 8, 512>}, {pipeline_mode = #tpu.pipeline_mode<synchronous>, transform_indices = @transform_2, window_bounds = array<i64: 128, 512>}, {transform_indices = @transform_3, window_bounds = array<i64: 4, 8, 128>}, {transform_indices = @transform_4, window_bounds = array<i64: 2, 8, 128>}]} {
    %c0_i32 = arith.constant 0 : i32
    %0 = arith.cmpi eq, %arg1, %c0_i32 : i32
    %1 = arith.extui %0 : i1 to i32
    %c0_i32_0 = arith.constant 0 : i32
    %2 = arith.cmpi ne, %1, %c0_i32_0 : i32
    scf.if %2 {
      %c0_50 = arith.constant 0 : index
      %c0_51 = arith.constant 0 : index
      %c0_52 = arith.constant 0 : index
      %150 = vector.load %arg2[%c0_50, %c0_51, %c0_52] : memref<2x8x128xf32, #tpu.memory_space<vmem>>, vector<1x8x128xf32>
      %151 = vector.shape_cast %150 : vector<1x8x128xf32> to vector<8x128xf32>
      %c0_53 = arith.constant 0 : index
      %c0_54 = arith.constant 0 : index
      %152 = vector.load %arg7[%c0_53, %c0_54] : memref<8x128xf32, #tpu.memory_space<vmem>>, vector<8x128xf32>
      tpu.vector_store %arg7[%c0_53, %c0_54], %151 {strides = array<i32>} : memref<8x128xf32, #tpu.memory_space<vmem>>, vector<8x128xf32>,
      %c1 = arith.constant 1 : index
      %c0_55 = arith.constant 0 : index
      %c0_56 = arith.constant 0 : index
      %153 = vector.load %arg2[%c1, %c0_55, %c0_56] : memref<2x8x128xf32, #tpu.memory_space<vmem>>, vector<1x8x128xf32>
      %154 = vector.shape_cast %153 : vector<1x8x128xf32> to vector<8x128xf32>
      %c0_57 = arith.constant 0 : index
      %c0_58 = arith.constant 0 : index
      %155 = vector.load %arg8[%c0_57, %c0_58] : memref<8x128xf32, #tpu.memory_space<vmem>>, vector<8x128xf32>
      tpu.vector_store %arg8[%c0_57, %c0_58], %154 {strides = array<i32>} : memref<8x128xf32, #tpu.memory_space<vmem>>, vector<8x128xf32>,
    } else {
    }
    %c0 = arith.constant 0 : index
    %c0_1 = arith.constant 0 : index
    %3 = vector.load %arg7[%c0, %c0_1] : memref<8x128xf32, #tpu.memory_space<vmem>>, vector<8x128xf32>
    %c0_2 = arith.constant 0 : index
    %c0_3 = arith.constant 0 : index
    %4 = vector.load %arg8[%c0_2, %c0_3] : memref<8x128xf32, #tpu.memory_space<vmem>>, vector<8x128xf32>
    %c0_i32_4 = arith.constant 0 : i32
    %5 = arith.index_cast %c0_i32_4 : i32 to index
    %c0_5 = arith.constant 0 : index
    %c0_6 = arith.constant 0 : index
    %6 = vector.load %arg3[%5, %c0_5, %c0_6] : memref<4x8x512xf32, #tpu.memory_space<vmem>>, vector<1x8x512xf32>
    %7 = vector.shape_cast %6 : vector<1x8x512xf32> to vector<8x512xf32>
    %c0_7 = arith.constant 0 : index
    %c0_8 = arith.constant 0 : index
    %8 = vector.load %arg4[%c0_7, %c0_8] : memref<128x512xf32, #tpu.memory_space<vmem>>, vector<128x512xf32>
    %cst = arith.constant dense<0.000000e+00> : vector<8x512xf32>
    %9 = tpu.matmul %3, %8, %cst {dimension_numbers = #tpu.dot_dimension_numbers<[1], [0], [0], [1], [0, 0, 1, 1], [], []>} : vector<8x128xf32>, vector<128x512xf32>, vector<8x512xf32> -> vector<8x512xf32>
    %10 = arith.addf %7, %9 : vector<8x512xf32>
    %11 = vector.extract_strided_slice %10 {offsets = [0, 0], sizes = [8, 128], strides = [1, 1]} : vector<8x512xf32> to vector<8x128xf32>
    %12 = arith.negf %11 : vector<8x128xf32>
    %13 = math.exp %12 : vector<8x128xf32>
    %cst_9 = arith.constant 1.000000e+00 : f32
    %14 = vector.broadcast %cst_9 : f32 to vector<8x128xf32>
    %15 = arith.addf %14, %13 : vector<8x128xf32>
    %16 = arith.divf %14, %15 : vector<8x128xf32>
    %17 = vector.extract_strided_slice %10 {offsets = [0, 128], sizes = [8, 128], strides = [1, 1]} : vector<8x512xf32> to vector<8x128xf32>
    %18 = arith.negf %17 : vector<8x128xf32>
    %19 = math.exp %18 : vector<8x128xf32>
    %cst_10 = arith.constant 1.000000e+00 : f32
    %20 = vector.broadcast %cst_10 : f32 to vector<8x128xf32>
    %21 = arith.addf %20, %19 : vector<8x128xf32>
    %22 = arith.divf %20, %21 : vector<8x128xf32>
    %23 = vector.extract_strided_slice %10 {offsets = [0, 256], sizes = [8, 128], strides = [1, 1]} : vector<8x512xf32> to vector<8x128xf32>
    %24 = math.tanh %23 : vector<8x128xf32>
    %25 = vector.extract_strided_slice %10 {offsets = [0, 384], sizes = [8, 128], strides = [1, 1]} : vector<8x512xf32> to vector<8x128xf32>
    %26 = arith.negf %25 : vector<8x128xf32>
    %27 = math.exp %26 : vector<8x128xf32>
    %cst_11 = arith.constant 1.000000e+00 : f32
    %28 = vector.broadcast %cst_11 : f32 to vector<8x128xf32>
    %29 = arith.addf %28, %27 : vector<8x128xf32>
    %30 = arith.divf %28, %29 : vector<8x128xf32>
    %31 = arith.mulf %22, %4 : vector<8x128xf32>
    %32 = arith.mulf %16, %24 : vector<8x128xf32>
    %33 = arith.addf %31, %32 : vector<8x128xf32>
    %34 = math.tanh %33 : vector<8x128xf32>
    %35 = arith.mulf %30, %34 : vector<8x128xf32>
    %36 = arith.index_cast %c0_i32_4 : i32 to index
    %c0_12 = arith.constant 0 : index
    %c0_13 = arith.constant 0 : index
    %37 = vector.load %arg5[%36, %c0_12, %c0_13] : memref<4x8x128xf32, #tpu.memory_space<vmem>>, vector<1x8x128xf32>
    %38 = vector.shape_cast %37 : vector<1x8x128xf32> to vector<8x128xf32>
    %39 = vector.shape_cast %35 : vector<8x128xf32> to vector<1x8x128xf32>
    tpu.vector_store %arg5[%36, %c0_12, %c0_13], %39 {strides = array<i32>} : memref<4x8x128xf32, #tpu.memory_space<vmem>>, vector<1x8x128xf32>,
    %c1_i32 = arith.constant 1 : i32
    %40 = arith.index_cast %c1_i32 : i32 to index
    %c0_14 = arith.constant 0 : index
    %c0_15 = arith.constant 0 : index
    %41 = vector.load %arg3[%40, %c0_14, %c0_15] : memref<4x8x512xf32, #tpu.memory_space<vmem>>, vector<1x8x512xf32>
    %42 = vector.shape_cast %41 : vector<1x8x512xf32> to vector<8x512xf32>
    %c0_16 = arith.constant 0 : index
    %c0_17 = arith.constant 0 : index
    %43 = vector.load %arg4[%c0_16, %c0_17] : memref<128x512xf32, #tpu.memory_space<vmem>>, vector<128x512xf32>
    %cst_18 = arith.constant dense<0.000000e+00> : vector<8x512xf32>
    %44 = tpu.matmul %35, %43, %cst_18 {dimension_numbers = #tpu.dot_dimension_numbers<[1], [0], [0], [1], [0, 0, 1, 1], [], []>} : vector<8x128xf32>, vector<128x512xf32>, vector<8x512xf32> -> vector<8x512xf32>
    %45 = arith.addf %42, %44 : vector<8x512xf32>
    %46 = vector.extract_strided_slice %45 {offsets = [0, 0], sizes = [8, 128], strides = [1, 1]} : vector<8x512xf32> to vector<8x128xf32>
    %47 = arith.negf %46 : vector<8x128xf32>
    %48 = math.exp %47 : vector<8x128xf32>
    %cst_19 = arith.constant 1.000000e+00 : f32
    %49 = vector.broadcast %cst_19 : f32 to vector<8x128xf32>
    %50 = arith.addf %49, %48 : vector<8x128xf32>
    %51 = arith.divf %49, %50 : vector<8x128xf32>
    %52 = vector.extract_strided_slice %45 {offsets = [0, 128], sizes = [8, 128], strides = [1, 1]} : vector<8x512xf32> to vector<8x128xf32>
    %53 = arith.negf %52 : vector<8x128xf32>
    %54 = math.exp %53 : vector<8x128xf32>
    %cst_20 = arith.constant 1.000000e+00 : f32
    %55 = vector.broadcast %cst_20 : f32 to vector<8x128xf32>
    %56 = arith.addf %55, %54 : vector<8x128xf32>
    %57 = arith.divf %55, %56 : vector<8x128xf32>
    %58 = vector.extract_strided_slice %45 {offsets = [0, 256], sizes = [8, 128], strides = [1, 1]} : vector<8x512xf32> to vector<8x128xf32>
    %59 = math.tanh %58 : vector<8x128xf32>
    %60 = vector.extract_strided_slice %45 {offsets = [0, 384], sizes = [8, 128], strides = [1, 1]} : vector<8x512xf32> to vector<8x128xf32>
    %61 = arith.negf %60 : vector<8x128xf32>
    %62 = math.exp %61 : vector<8x128xf32>
    %cst_21 = arith.constant 1.000000e+00 : f32
    %63 = vector.broadcast %cst_21 : f32 to vector<8x128xf32>
    %64 = arith.addf %63, %62 : vector<8x128xf32>
    %65 = arith.divf %63, %64 : vector<8x128xf32>
    %66 = arith.mulf %57, %33 : vector<8x128xf32>
    %67 = arith.mulf %51, %59 : vector<8x128xf32>
    %68 = arith.addf %66, %67 : vector<8x128xf32>
    %69 = math.tanh %68 : vector<8x128xf32>
    %70 = arith.mulf %65, %69 : vector<8x128xf32>
    %71 = arith.index_cast %c1_i32 : i32 to index
    %c0_22 = arith.constant 0 : index
    %c0_23 = arith.constant 0 : index
    %72 = vector.load %arg5[%71, %c0_22, %c0_23] : memref<4x8x128xf32, #tpu.memory_space<vmem>>, vector<1x8x128xf32>
    %73 = vector.shape_cast %72 : vector<1x8x128xf32> to vector<8x128xf32>
    %74 = vector.shape_cast %70 : vector<8x128xf32> to vector<1x8x128xf32>
    tpu.vector_store %arg5[%71, %c0_22, %c0_23], %74 {strides = array<i32>} : memref<4x8x128xf32, #tpu.memory_space<vmem>>, vector<1x8x128xf32>,
    %c2_i32 = arith.constant 2 : i32
    %75 = arith.index_cast %c2_i32 : i32 to index
    %c0_24 = arith.constant 0 : index
    %c0_25 = arith.constant 0 : index
    %76 = vector.load %arg3[%75, %c0_24, %c0_25] : memref<4x8x512xf32, #tpu.memory_space<vmem>>, vector<1x8x512xf32>
    %77 = vector.shape_cast %76 : vector<1x8x512xf32> to vector<8x512xf32>
    %c0_26 = arith.constant 0 : index
    %c0_27 = arith.constant 0 : index
    %78 = vector.load %arg4[%c0_26, %c0_27] : memref<128x512xf32, #tpu.memory_space<vmem>>, vector<128x512xf32>
    %cst_28 = arith.constant dense<0.000000e+00> : vector<8x512xf32>
    %79 = tpu.matmul %70, %78, %cst_28 {dimension_numbers = #tpu.dot_dimension_numbers<[1], [0], [0], [1], [0, 0, 1, 1], [], []>} : vector<8x128xf32>, vector<128x512xf32>, vector<8x512xf32> -> vector<8x512xf32>
    %80 = arith.addf %77, %79 : vector<8x512xf32>
    %81 = vector.extract_strided_slice %80 {offsets = [0, 0], sizes = [8, 128], strides = [1, 1]} : vector<8x512xf32> to vector<8x128xf32>
    %82 = arith.negf %81 : vector<8x128xf32>
    %83 = math.exp %82 : vector<8x128xf32>
    %cst_29 = arith.constant 1.000000e+00 : f32
    %84 = vector.broadcast %cst_29 : f32 to vector<8x128xf32>
    %85 = arith.addf %84, %83 : vector<8x128xf32>
    %86 = arith.divf %84, %85 : vector<8x128xf32>
    %87 = vector.extract_strided_slice %80 {offsets = [0, 128], sizes = [8, 128], strides = [1, 1]} : vector<8x512xf32> to vector<8x128xf32>
    %88 = arith.negf %87 : vector<8x128xf32>
    %89 = math.exp %88 : vector<8x128xf32>
    %cst_30 = arith.constant 1.000000e+00 : f32
    %90 = vector.broadcast %cst_30 : f32 to vector<8x128xf32>
    %91 = arith.addf %90, %89 : vector<8x128xf32>
    %92 = arith.divf %90, %91 : vector<8x128xf32>
    %93 = vector.extract_strided_slice %80 {offsets = [0, 256], sizes = [8, 128], strides = [1, 1]} : vector<8x512xf32> to vector<8x128xf32>
    %94 = math.tanh %93 : vector<8x128xf32>
    %95 = vector.extract_strided_slice %80 {offsets = [0, 384], sizes = [8, 128], strides = [1, 1]} : vector<8x512xf32> to vector<8x128xf32>
    %96 = arith.negf %95 : vector<8x128xf32>
    %97 = math.exp %96 : vector<8x128xf32>
    %cst_31 = arith.constant 1.000000e+00 : f32
    %98 = vector.broadcast %cst_31 : f32 to vector<8x128xf32>
    %99 = arith.addf %98, %97 : vector<8x128xf32>
    %100 = arith.divf %98, %99 : vector<8x128xf32>
    %101 = arith.mulf %92, %68 : vector<8x128xf32>
    %102 = arith.mulf %86, %94 : vector<8x128xf32>
    %103 = arith.addf %101, %102 : vector<8x128xf32>
    %104 = math.tanh %103 : vector<8x128xf32>
    %105 = arith.mulf %100, %104 : vector<8x128xf32>
    %106 = arith.index_cast %c2_i32 : i32 to index
    %c0_32 = arith.constant 0 : index
    %c0_33 = arith.constant 0 : index
    %107 = vector.load %arg5[%106, %c0_32, %c0_33] : memref<4x8x128xf32, #tpu.memory_space<vmem>>, vector<1x8x128xf32>
    %108 = vector.shape_cast %107 : vector<1x8x128xf32> to vector<8x128xf32>
    %109 = vector.shape_cast %105 : vector<8x128xf32> to vector<1x8x128xf32>
    tpu.vector_store %arg5[%106, %c0_32, %c0_33], %109 {strides = array<i32>} : memref<4x8x128xf32, #tpu.memory_space<vmem>>, vector<1x8x128xf32>,
    %c3_i32 = arith.constant 3 : i32
    %110 = arith.index_cast %c3_i32 : i32 to index
    %c0_34 = arith.constant 0 : index
    %c0_35 = arith.constant 0 : index
    %111 = vector.load %arg3[%110, %c0_34, %c0_35] : memref<4x8x512xf32, #tpu.memory_space<vmem>>, vector<1x8x512xf32>
    %112 = vector.shape_cast %111 : vector<1x8x512xf32> to vector<8x512xf32>
    %c0_36 = arith.constant 0 : index
    %c0_37 = arith.constant 0 : index
    %113 = vector.load %arg4[%c0_36, %c0_37] : memref<128x512xf32, #tpu.memory_space<vmem>>, vector<128x512xf32>
    %cst_38 = arith.constant dense<0.000000e+00> : vector<8x512xf32>
    %114 = tpu.matmul %105, %113, %cst_38 {dimension_numbers = #tpu.dot_dimension_numbers<[1], [0], [0], [1], [0, 0, 1, 1], [], []>} : vector<8x128xf32>, vector<128x512xf32>, vector<8x512xf32> -> vector<8x512xf32>
    %115 = arith.addf %112, %114 : vector<8x512xf32>
    %116 = vector.extract_strided_slice %115 {offsets = [0, 0], sizes = [8, 128], strides = [1, 1]} : vector<8x512xf32> to vector<8x128xf32>
    %117 = arith.negf %116 : vector<8x128xf32>
    %118 = math.exp %117 : vector<8x128xf32>
    %cst_39 = arith.constant 1.000000e+00 : f32
    %119 = vector.broadcast %cst_39 : f32 to vector<8x128xf32>
    %120 = arith.addf %119, %118 : vector<8x128xf32>
    %121 = arith.divf %119, %120 : vector<8x128xf32>
    %122 = vector.extract_strided_slice %115 {offsets = [0, 128], sizes = [8, 128], strides = [1, 1]} : vector<8x512xf32> to vector<8x128xf32>
    %123 = arith.negf %122 : vector<8x128xf32>
    %124 = math.exp %123 : vector<8x128xf32>
    %cst_40 = arith.constant 1.000000e+00 : f32
    %125 = vector.broadcast %cst_40 : f32 to vector<8x128xf32>
    %126 = arith.addf %125, %124 : vector<8x128xf32>
    %127 = arith.divf %125, %126 : vector<8x128xf32>
    %128 = vector.extract_strided_slice %115 {offsets = [0, 256], sizes = [8, 128], strides = [1, 1]} : vector<8x512xf32> to vector<8x128xf32>
    %129 = math.tanh %128 : vector<8x128xf32>
    %130 = vector.extract_strided_slice %115 {offsets = [0, 384], sizes = [8, 128], strides = [1, 1]} : vector<8x512xf32> to vector<8x128xf32>
    %131 = arith.negf %130 : vector<8x128xf32>
    %132 = math.exp %131 : vector<8x128xf32>
    %cst_41 = arith.constant 1.000000e+00 : f32
    %133 = vector.broadcast %cst_41 : f32 to vector<8x128xf32>
    %134 = arith.addf %133, %132 : vector<8x128xf32>
    %135 = arith.divf %133, %134 : vector<8x128xf32>
    %136 = arith.mulf %127, %103 : vector<8x128xf32>
    %137 = arith.mulf %121, %129 : vector<8x128xf32>
    %138 = arith.addf %136, %137 : vector<8x128xf32>
    %139 = math.tanh %138 : vector<8x128xf32>
    %140 = arith.mulf %135, %139 : vector<8x128xf32>
    %141 = arith.index_cast %c3_i32 : i32 to index
    %c0_42 = arith.constant 0 : index
    %c0_43 = arith.constant 0 : index
    %142 = vector.load %arg5[%141, %c0_42, %c0_43] : memref<4x8x128xf32, #tpu.memory_space<vmem>>, vector<1x8x128xf32>
    %143 = vector.shape_cast %142 : vector<1x8x128xf32> to vector<8x128xf32>
    %144 = vector.shape_cast %140 : vector<8x128xf32> to vector<1x8x128xf32>
    tpu.vector_store %arg5[%141, %c0_42, %c0_43], %144 {strides = array<i32>} : memref<4x8x128xf32, #tpu.memory_space<vmem>>, vector<1x8x128xf32>,
    %c4_i32 = arith.constant 4 : i32
    %c0_44 = arith.constant 0 : index
    %c0_45 = arith.constant 0 : index
    %145 = vector.load %arg7[%c0_44, %c0_45] : memref<8x128xf32, #tpu.memory_space<vmem>>, vector<8x128xf32>
    tpu.vector_store %arg7[%c0_44, %c0_45], %140 {strides = array<i32>} : memref<8x128xf32, #tpu.memory_space<vmem>>, vector<8x128xf32>,
    %c0_46 = arith.constant 0 : index
    %c0_47 = arith.constant 0 : index
    %146 = vector.load %arg8[%c0_46, %c0_47] : memref<8x128xf32, #tpu.memory_space<vmem>>, vector<8x128xf32>
    tpu.vector_store %arg8[%c0_46, %c0_47], %138 {strides = array<i32>} : memref<8x128xf32, #tpu.memory_space<vmem>>, vector<8x128xf32>,
    %c1_i32_48 = arith.constant 1 : i32
    %147 = arith.cmpi eq, %arg1, %c1_i32_48 : i32
    %148 = arith.extui %147 : i1 to i32
    %c0_i32_49 = arith.constant 0 : i32
    %149 = arith.cmpi ne, %148, %c0_i32_49 : i32
    scf.if %149 {
      %c0_50 = arith.constant 0 : index
      %c0_51 = arith.constant 0 : index
      %c0_52 = arith.constant 0 : index
      %150 = vector.load %arg6[%c0_50, %c0_51, %c0_52] : memref<2x8x128xf32, #tpu.memory_space<vmem>>, vector<1x8x128xf32>
      %151 = vector.shape_cast %150 : vector<1x8x128xf32> to vector<8x128xf32>
      %152 = vector.shape_cast %140 : vector<8x128xf32> to vector<1x8x128xf32>
      tpu.vector_store %arg6[%c0_50, %c0_51, %c0_52], %152 {strides = array<i32>} : memref<2x8x128xf32, #tpu.memory_space<vmem>>, vector<1x8x128xf32>,
      %c1 = arith.constant 1 : index
      %c0_53 = arith.constant 0 : index
      %c0_54 = arith.constant 0 : index
      %153 = vector.load %arg6[%c1, %c0_53, %c0_54] : memref<2x8x128xf32, #tpu.memory_space<vmem>>, vector<1x8x128xf32>
      %154 = vector.shape_cast %153 : vector<1x8x128xf32> to vector<8x128xf32>
      %155 = vector.shape_cast %138 : vector<8x128xf32> to vector<1x8x128xf32>
      tpu.vector_store %arg6[%c1, %c0_53, %c0_54], %155 {strides = array<i32>} : memref<2x8x128xf32, #tpu.memory_space<vmem>>, vector<1x8x128xf32>,
    } else {
    }
    return
  }
  func.func @transform_0(%arg0: i32, %arg1: i32) -> (i32, i32, i32) {
    %c0_i32 = arith.constant 0 : i32
    %c0_i32_0 = arith.constant 0 : i32
    %c0_i32_1 = arith.constant 0 : i32
    return %c0_i32, %arg0, %c0_i32_0 : i32, i32, i32
  }
  func.func @transform_1(%arg0: i32, %arg1: i32) -> (i32, i32, i32) {
    %c1_i32 = arith.constant 1 : i32
    %c0_i32 = arith.constant 0 : i32
    return %arg1, %arg0, %c1_i32 : i32, i32, i32
  }
  func.func @transform_2(%arg0: i32, %arg1: i32) -> (i32, i32) {
    %c0_i32 = arith.constant 0 : i32
    %c0_i32_0 = arith.constant 0 : i32
    %c0_i32_1 = arith.constant 0 : i32
    return %c0_i32, %c0_i32_0 : i32, i32
  }
  func.func @transform_3(%arg0: i32, %arg1: i32) -> (i32, i32, i32) {
    %c0_i32 = arith.constant 0 : i32
    %c0_i32_0 = arith.constant 0 : i32
    return %arg1, %arg0, %c0_i32 : i32, i32, i32
  }
  func.func @transform_4(%arg0: i32, %arg1: i32) -> (i32, i32, i32) {
    %c0_i32 = arith.constant 0 : i32
    %c0_i32_0 = arith.constant 0 : i32
    %c0_i32_1 = arith.constant 0 : i32
    return %c0_i32, %arg0, %c0_i32_0 : i32, i32, i32
  }
}

module attributes {stable_mosaic.version = 11 : i64} {
  func.func @_linear_kernel(%arg0: i32, %arg1: i32, %arg2: i32, %arg3: memref<64x128xf32, #tpu.memory_space<vmem>>, %arg4: memref<128x1024xf32, #tpu.memory_space<vmem>>, %arg5: memref<1x1024xf32, #tpu.memory_space<vmem>>, %arg6: memref<64x1024xf32, #tpu.memory_space<vmem>>, %arg7: memref<64x1024xf32, #tpu.memory_space<vmem>>) attributes {dimension_semantics = [#tpu.dimension_semantics<parallel>, #tpu.dimension_semantics<parallel>, #tpu.dimension_semantics<arbitrary>], iteration_bounds = array<i64: 1, 1, 1>, scalar_prefetch = 0 : i64, scratch_operands = 1 : i64, tpu.core_type = #tpu.core_type<tc>, window_params = [{transform_indices = @transform_0, window_bounds = array<i64: 64, 128>}, {transform_indices = @transform_1, window_bounds = array<i64: 128, 1024>}, {transform_indices = @transform_2, window_bounds = array<i64: 1, 1024>}, {transform_indices = @transform_3, window_bounds = array<i64: 64, 1024>}]} {
    %c0_i32 = arith.constant 0 : i32
    %0 = arith.cmpi eq, %arg2, %c0_i32 : i32
    %1 = arith.extui %0 : i1 to i32
    %c0_i32_0 = arith.constant 0 : i32
    %2 = arith.cmpi ne, %1, %c0_i32_0 : i32
    scf.if %2 {
      %cst_10 = arith.constant 0.000000e+00 : f32
      %12 = vector.broadcast %cst_10 : f32 to vector<64x1024xf32>
      %c0_11 = arith.constant 0 : index
      %c0_12 = arith.constant 0 : index
      %13 = vector.load %arg7[%c0_11, %c0_12] : memref<64x1024xf32, #tpu.memory_space<vmem>>, vector<64x1024xf32>
      tpu.vector_store %arg7[%c0_11, %c0_12], %12 {strides = array<i32>} : memref<64x1024xf32, #tpu.memory_space<vmem>>, vector<64x1024xf32>,
    } else {
    }
    %c0 = arith.constant 0 : index
    %c0_1 = arith.constant 0 : index
    %3 = vector.load %arg7[%c0, %c0_1] : memref<64x1024xf32, #tpu.memory_space<vmem>>, vector<64x1024xf32>
    %c0_2 = arith.constant 0 : index
    %c0_3 = arith.constant 0 : index
    %4 = vector.load %arg3[%c0_2, %c0_3] : memref<64x128xf32, #tpu.memory_space<vmem>>, vector<64x128xf32>
    %c0_4 = arith.constant 0 : index
    %c0_5 = arith.constant 0 : index
    %5 = vector.load %arg4[%c0_4, %c0_5] : memref<128x1024xf32, #tpu.memory_space<vmem>>, vector<128x1024xf32>
    %cst = arith.constant dense<0.000000e+00> : vector<64x1024xf32>
    %6 = tpu.matmul %4, %5, %cst {dimension_numbers = #tpu.dot_dimension_numbers<[1], [0], [0], [1], [0, 0, 1, 1], [], []>} : vector<64x128xf32>, vector<128x1024xf32>, vector<64x1024xf32> -> vector<64x1024xf32>
    %7 = arith.addf %3, %6 : vector<64x1024xf32>
    %c0_6 = arith.constant 0 : index
    %c0_7 = arith.constant 0 : index
    %8 = vector.load %arg7[%c0_6, %c0_7] : memref<64x1024xf32, #tpu.memory_space<vmem>>, vector<64x1024xf32>
    tpu.vector_store %arg7[%c0_6, %c0_7], %7 {strides = array<i32>} : memref<64x1024xf32, #tpu.memory_space<vmem>>, vector<64x1024xf32>,
    %c0_i32_8 = arith.constant 0 : i32
    %9 = arith.cmpi eq, %arg2, %c0_i32_8 : i32
    %10 = arith.extui %9 : i1 to i32
    %c0_i32_9 = arith.constant 0 : i32
    %11 = arith.cmpi ne, %10, %c0_i32_9 : i32
    scf.if %11 {
      %c0_10 = arith.constant 0 : index
      %c0_11 = arith.constant 0 : index
      %12 = vector.load %arg7[%c0_10, %c0_11] : memref<64x1024xf32, #tpu.memory_space<vmem>>, vector<64x1024xf32>
      %c0_12 = arith.constant 0 : index
      %c0_13 = arith.constant 0 : index
      %13 = vector.load %arg5[%c0_12, %c0_13] : memref<1x1024xf32, #tpu.memory_space<vmem>>, vector<1x1024xf32>
      %14 = vector.broadcast %13 : vector<1x1024xf32> to vector<64x1024xf32>
      %15 = arith.addf %12, %14 : vector<64x1024xf32>
      %c0_14 = arith.constant 0 : index
      %c0_15 = arith.constant 0 : index
      %16 = vector.load %arg6[%c0_14, %c0_15] : memref<64x1024xf32, #tpu.memory_space<vmem>>, vector<64x1024xf32>
      tpu.vector_store %arg6[%c0_14, %c0_15], %15 {strides = array<i32>} : memref<64x1024xf32, #tpu.memory_space<vmem>>, vector<64x1024xf32>,
    } else {
    }
    return
  }
  func.func @transform_0(%arg0: i32, %arg1: i32, %arg2: i32) -> (i32, i32) {
    %c0_i32 = arith.constant 0 : i32
    return %arg0, %arg2 : i32, i32
  }
  func.func @transform_1(%arg0: i32, %arg1: i32, %arg2: i32) -> (i32, i32) {
    %c0_i32 = arith.constant 0 : i32
    return %arg2, %arg1 : i32, i32
  }
  func.func @transform_2(%arg0: i32, %arg1: i32, %arg2: i32) -> (i32, i32) {
    %c0_i32 = arith.constant 0 : i32
    %c0_i32_0 = arith.constant 0 : i32
    return %c0_i32, %arg1 : i32, i32
  }
  func.func @transform_3(%arg0: i32, %arg1: i32, %arg2: i32) -> (i32, i32) {
    %c0_i32 = arith.constant 0 : i32
    return %arg0, %arg1 : i32, i32
  }
}

</mosaic_0001>

<bundles_post_ra>
// kernel: seq2seq_forward.5
= control target key start
LH: loop header
LB: loop body
LE: loop exit
PB: predicated region body
PF: predicated region fallthrough
CT: control target
= control target key end

     0   :  { %s1329_s12 = smov 0   ;;  %s1331_s13 = smov 0   ;;  %s2032_s0 = inlined_call_operand.vmem [shape: f32[2,8,128], index: 0, kind: input, shape index: {}]   ;;  %s2033_s1 = inlined_call_operand.vmem [shape: f32[8,8,1024], index: 1, kind: input, shape index: {}]   ;;  %s2034_s2 = inlined_call_operand.vmem [shape: f32[128,512], index: 2, kind: input, shape index: {}]   ;;  %s2035_s3 = inlined_call_operand.vmem [shape: f32[2,8,128], index: 3, kind: output, shape index: {}]  }
   0x1   :  { %s1333_s14 = smov 0   ;;  %s1335_s15 = smov 0  }
   0x2   :  { %s1337_s16 = smov 0  }
   0x3 LB: > { %s22_s17 = sadd.s32 1, %s1302_s15  ;;  %p67_p1 = scmp.ne.s32.totalorder %s1294_s13, %s1290_s12  ;;  %s1306_s16 = sphi %s1337_s16, %s13_s16   ;;  %s1302_s15 = sphi %s1335_s15, %s2143_s15   ;;  %s1298_s14 = sphi %s1333_s14, %s2142_s14   ;;  %s1294_s13 = sphi %s1331_s13, %s2141_s13   ;;  %s1290_s12 = sphi %s1329_s12, %s2140_s12  }
   0x4   : > { %p23_p0 = scmp.ge.s32.totalorder %s22_s17, 2  ;;  %p68_p2 = scmp.eq.s32.totalorder %s1306_s16, 0 }
   0x5   : > { %s60_s19 = sadd.s32 1, %s1294_s13  ;;  %p1123_p5 = scmp.ge.s32.totalorder %s1306_s16, 2 }
   0x6   : > { %s2145_s17 = smov (%p23_p0, %s22_s17), 0  ;;  %p69_p3 = por %p68_p2, %p67_p1 }
   0x7   : > { %s55_s18 = ssub.s32 %s1302_s15, %s2145_s17  ;;  %150 = sbr.rel (%p1123_p5) target bundleno = 24 (0x18), region = 24 }
   0x8   : > { %p58_p4 = scmp.eq.s32.totalorder %s55_s18, 0 }
   0xa   : > { %s1364_s20 = scalar_select %p58_p4, %s1294_s13, %s60_s19  }
   0xc   : > { %153 = sbr.rel (!%p69_p3) target bundleno = 24 (0x18), region = 28  ;;  %s155_s21 = sand.u32 (%p69_p3), 1, %s1294_s13  }
   0xd   : > { %s1162_s22 = sshll.u32 (%p69_p3), %s1302_s15, 8  ;;  %s1124_s23 = sshll.u32 (%p69_p3), %s155_s21, 7 }
   0xe   : > { %s1372_s26 = scalar_lea.vmem (%p69_p3), %s2033_s1, %s1162_s22  ;;  %s157_s27 = scalar_lea.vmem (%p69_p3), [#allocation4], %s1124_s23 }
   0xf   : > { %v176_v0 = vld [vmem:[%s1372_s26] sm:$0xff] (%p69_p3)  ;;  %v178_v1 = vld [vmem:[%s1372_s26 + $0x8] sm:$0xff] (%p69_p3)  ;;  %v180_v2 = vld [vmem:[%s1372_s26 + $0x10] sm:$0xff] (%p69_p3) }
  0x10   : > { %177 = vst [vmem:[%s157_s27] sm:$0xff] (%p69_p3), %v176_v0  ;;  %179 = vst [vmem:[%s157_s27 + $0x8] sm:$0xff] (%p69_p3), %v178_v1  ;;  %v182_v3 = vld [vmem:[%s1372_s26 + $0x18] sm:$0xff] (%p69_p3)  ;;  %v184_v4 = vld [vmem:[%s1372_s26 + $0x40] sm:$0xff] (%p69_p3) }
  0x11   : > { %181 = vst [vmem:[%s157_s27 + $0x10] sm:$0xff] %v180_v2  ;;  %v186_v5 = vld [vmem:[%s1372_s26 + $0x48] sm:$0xff]  ;;  %183 = vst [vmem:[%s157_s27 + $0x18] sm:$0xff] %v182_v3  ;;  %v188_v6 = vld [vmem:[%s1372_s26 + $0x50] sm:$0xff] }
  0x12   : > { %185 = vst [vmem:[%s157_s27 + $0x20] sm:$0xff] %v184_v4  ;;  %187 = vst [vmem:[%s157_s27 + $0x28] sm:$0xff] %v186_v5  ;;  %v190_v7 = vld [vmem:[%s1372_s26 + $0x58] sm:$0xff]  ;;  %v192_v8 = vld [vmem:[%s1372_s26 + $0x80] sm:$0xff] }
  0x13   : > { %189 = vst [vmem:[%s157_s27 + $0x30] sm:$0xff] %v188_v6  ;;  %191 = vst [vmem:[%s157_s27 + $0x38] sm:$0xff] %v190_v7  ;;  %v194_v9 = vld [vmem:[%s1372_s26 + $0x88] sm:$0xff]  ;;  %v196_v10 = vld [vmem:[%s1372_s26 + $0x90] sm:$0xff] }
  0x14   : > { %193 = vst [vmem:[%s157_s27 + $0x40] sm:$0xff] %v192_v8  ;;  %v198_v11 = vld [vmem:[%s1372_s26 + $0x98] sm:$0xff]  ;;  %195 = vst [vmem:[%s157_s27 + $0x48] sm:$0xff] %v194_v9  ;;  %v200_v12 = vld [vmem:[%s1372_s26 + $0xc0] sm:$0xff] }
  0x15   : > { %197 = vst [vmem:[%s157_s27 + $0x50] sm:$0xff] %v196_v10  ;;  %199 = vst [vmem:[%s157_s27 + $0x58] sm:$0xff] %v198_v11  ;;  %v202_v13 = vld [vmem:[%s1372_s26 + $0xc8] sm:$0xff]  ;;  %v204_v14 = vld [vmem:[%s1372_s26 + $0xd0] sm:$0xff] }
  0x16   : > { %201 = vst [vmem:[%s157_s27 + $0x60] sm:$0xff] %v200_v12  ;;  %203 = vst [vmem:[%s157_s27 + $0x68] sm:$0xff] %v202_v13  ;;  %v206_v15 = vld [vmem:[%s1372_s26 + $0xd8] sm:$0xff] }
  0x17   : > { %205 = vst [vmem:[%s157_s27 + $0x70] sm:$0xff] %v204_v14  ;;  %207 = vst [vmem:[%s157_s27 + $0x78] sm:$0xff] %v206_v15 }
  0x18 PF: > { %p1128_p6 = scmp.ge.s32.totalorder %s1306_s16, 1  ;;  %p212_p7 = scmp.lt.s32.totalorder %s1306_s16, 3 }
  0x1a   : > { %p213_p8 = pnand %p1128_p6, %p212_p7 }
  0x1c   : > { %216 = sbr.rel (%p213_p8) target bundleno = 1073 (0x431), region = 51 }
  0x21   : > { %s219_s28 = sand.u32 1, %s1290_s12   ;;  %p1130_p9 = scmp.ne.s32.totalorder %s1298_s14, 0 }
  0x22   : > { %s1129_s29 = sshll.u32 %s219_s28, 7 }
  0x23   : > { %s1393_s30 = scalar_lea.vmem [#allocation4], %s1129_s29  ;;  %257 = sbr.rel (%p1130_p9) target bundleno = 42 (0x2a), region = 59 }
  0x28   : > { %v258_v16 = vld [vmem:[%s2032_s0] sm:$0xff]  ;;  %v1131_v17 = vld [vmem:[%s2032_s0 + $0x8] sm:$0xff] }
  0x29   : > { %259 = vst [vmem:[#allocation2] sm:$0xff] %v258_v16  ;;  %262 = vst [vmem:[#allocation3] sm:$0xff] %v1131_v17 }
  0x2a PF: > { %v1405_v18 = vld [vmem:[%s2034_s2 + $0x1e8] sm:$0xff]  ;;  %v1410_v19 = vld [vmem:[%s2034_s2 + $0x1e0] sm:$0xff]  ;;  %v2036_v22 = vmov 0.0   ;;  %v1452_v27 = vld [vmem:[%s2034_s2 + $0x1f8] sm:$0xff]  ;;  %p1156_p10 = scmp.ne.s32.totalorder %s1298_s14, 1 }
  0x2b   : > { %2078 = vst [vmem:[#allocation5_spill] sm:$0xff] %v1405_v18  ;;  %v1415_v20 = vld [vmem:[%s2034_s2 + $0x1c8] sm:$0xff]  ;;  %333 = vmatprep.subr.mxu0 %v1405_v18  ;;  %v1421_v21 = vld [vmem:[%s2034_s2 + $0x1c0] sm:$0xff]  ;;  %397 = vmatprep.mubr.f32.mxu0 %v2036_v22  ;;  %2079 = vst [vmem:[#allocation6_spill] sm:$0xff] %v1452_v27 }
  0x2c   : > { %334 = vmatpush1.msra.mxu0 %v1410_v19  ;;  %v1428_v23 = vld [vmem:[%s2034_s2 + $0x1a8] sm:$0xff]  ;;  %468 = vmatprep.mubr.f32.mxu1 %v2036_v22  ;;  %v1435_v24 = vld [vmem:[%s2034_s2 + $0x1a0] sm:$0xff]  ;;  %v1464_v29 = vld [vmem:[%s2034_s2 + $0x1f0] sm:$0xff] }
  0x2d   : > { %335 = vmatprep.subr.mxu0 %v1415_v20  ;;  %v1441_v25 = vld [vmem:[%s2034_s2 + $0x188] sm:$0xff]  ;;  %v1447_v26 = vld [vmem:[%s2034_s2 + $0x180] sm:$0xff]  ;;  %404 = vmatprep.subr.mxu1 %v1452_v27  ;;  %v1476_v31 = vld [vmem:[%s2034_s2 + $0x1d8] sm:$0xff] }
  0x2e   : > { %336 = vmatpush1.msra.mxu0 %v1421_v21  ;;  %v1458_v28 = vld [vmem:[%s2034_s2 + $0x168] sm:$0xff]  ;;  %v1470_v30 = vld [vmem:[%s2034_s2 + $0x160] sm:$0xff]  ;;  %405 = vmatpush1.msra.mxu1 %v1464_v29  ;;  %v1481_v32 = vld [vmem:[%s2034_s2 + $0x1d0] sm:$0xff] }
  0x2f   : > { %337 = vmatprep.subr.mxu0 %v1428_v23  ;;  %v1487_v33 = vld [vmem:[%s2034_s2 + $0x148] sm:$0xff]  ;;  %406 = vmatprep.subr.mxu1 %v1476_v31  ;;  %v1493_v34 = vld [vmem:[%s2034_s2 + $0x1b8] sm:$0xff]  ;;  %v1499_v35 = vld [vmem:[%s2034_s2 + $0x140] sm:$0xff] }
  0x30   : > { %338 = vmatpush1.msra.mxu0 %v1435_v24  ;;  %407 = vmatpush1.msra.mxu1 %v1481_v32  ;;  %v1505_v36 = vld [vmem:[%s2034_s2 + $0x1b0] sm:$0xff]  ;;  %v1510_v37 = vld [vmem:[%s2034_s2 + $0x198] sm:$0xff]  ;;  %v1516_v38 = vld [vmem:[%s2034_s2 + $0x128] sm:$0xff] }
  0x31   : > { %339 = vmatprep.subr.mxu0 %v1441_v25  ;;  %408 = vmatprep.subr.mxu1 %v1493_v34  ;;  %v1522_v39 = vld [vmem:[%s2034_s2 + $0x190] sm:$0xff]  ;;  %v1528_v40 = vld [vmem:[%s2034_s2 + $0x120] sm:$0xff]  ;;  %v1534_v41 = vld [vmem:[%s2034_s2 + $0x178] sm:$0xff] }
  0x32   : > { %340 = vmatpush1.msra.mxu0 %v1447_v26  ;;  %409 = vmatpush1.msra.mxu1 %v1505_v36  ;;  %v1540_v42 = vld [vmem:[%s2034_s2 + $0x108] sm:$0xff]  ;;  %v1546_v43 = vld [vmem:[%s2034_s2 + $0x170] sm:$0xff]  ;;  %v1552_v44 = vld [vmem:[%s2034_s2 + $0x100] sm:$0xff] }
  0x33   : > { %341 = vmatprep.subr.mxu0 %v1458_v28  ;;  %410 = vmatprep.subr.mxu1 %v1510_v37  ;;  %v1558_v45 = vld [vmem:[%s2034_s2 + $0x158] sm:$0xff]  ;;  %v1564_v46 = vld [vmem:[%s2034_s2 + $0xe8] sm:$0xff]  ;;  %v1570_v47 = vld [vmem:[%s2034_s2 + $0x150] sm:$0xff] }
  0x34   : > { %342 = vmatpush1.msra.mxu0 %v1470_v30  ;;  %411 = vmatpush1.msra.mxu1 %v1522_v39  ;;  %v1576_v48 = vld [vmem:[%s2034_s2 + $0xe0] sm:$0xff]  ;;  %v1582_v49 = vld [vmem:[%s2034_s2 + $0x138] sm:$0xff]  ;;  %v1588_v50 = vld [vmem:[%s2034_s2 + $0xc8] sm:$0xff] }
  0x35   : > { %343 = vmatprep.subr.mxu0 %v1487_v33  ;;  %412 = vmatprep.subr.mxu1 %v1534_v41  ;;  %v1594_v51 = vld [vmem:[%s2034_s2 + $0x130] sm:$0xff]  ;;  %v1600_v52 = vld [vmem:[%s2034_s2 + $0xc0] sm:$0xff]  ;;  %v1606_v53 = vld [vmem:[%s2034_s2 + $0x118] sm:$0xff] }
  0x36   : > { %344 = vmatpush1.msra.mxu0 %v1499_v35  ;;  %413 = vmatpush1.msra.mxu1 %v1546_v43  ;;  %v1612_v54 = vld [vmem:[%s2034_s2 + $0xa8] sm:$0xff]  ;;  %v1618_v55 = vld [vmem:[%s2034_s2 + $0x110] sm:$0xff]  ;;  %v1624_v56 = vld [vmem:[%s2034_s2 + $0xa0] sm:$0xff] }
  0x37   : > { %345 = vmatprep.subr.mxu0 %v1516_v38  ;;  %414 = vmatprep.subr.mxu1 %v1558_v45  ;;  %v1630_v57 = vld [vmem:[%s2034_s2 + $0xf8] sm:$0xff]  ;;  %v1636_v58 = vld [vmem:[%s2034_s2 + $0x88] sm:$0xff]  ;;  %v1642_v59 = vld [vmem:[%s2034_s2 + $0xf0] sm:$0xff] }
  0x38   : > { %346 = vmatpush1.msra.mxu0 %v1528_v40  ;;  %415 = vmatpush1.msra.mxu1 %v1570_v47  ;;  %v1648_v60 = vld [vmem:[%s2034_s2 + $0x80] sm:$0xff]  ;;  %v1654_v61 = vld [vmem:[%s2034_s2 + $0xd8] sm:$0xff]  ;;  %v1660_v62 = vld [vmem:[%s2034_s2 + $0x68] sm:$0xff] }
  0x39   : > { %347 = vmatprep.subr.mxu0 %v1540_v42  ;;  %416 = vmatprep.subr.mxu1 %v1582_v49  ;;  %2080 = vst [vmem:[#allocation7_spill] sm:$0xff] %v1648_v60  ;;  %2081 = vst [vmem:[#allocation8_spill] sm:$0xff] %v1660_v62  ;;  %v1666_v63 = vld [vmem:[%s2034_s2 + $0xd0] sm:$0xff]  ;;  %v1672_v0 = vld [vmem:[%s2034_s2 + $0x60] sm:$0xff] }
  0x3a   : > { %348 = vmatpush1.msra.mxu0 %v1552_v44  ;;  %417 = vmatpush1.msra.mxu1 %v1594_v51  ;;  %2082 = vst [vmem:[#allocation9_spill] sm:$0xff] %v1672_v0  ;;  %v1678_v1 = vld [vmem:[%s2034_s2 + $0xb8] sm:$0xff]  ;;  %v1684_v2 = vld [vmem:[%s2034_s2 + $0x48] sm:$0xff]  ;;  %v1690_v3 = vld [vmem:[%s2034_s2 + $0xb0] sm:$0xff] }
  0x3b   : > { %349 = vmatprep.subr.mxu0 %v1564_v46  ;;  %418 = vmatprep.subr.mxu1 %v1606_v53  ;;  %2083 = vst [vmem:[#allocation10_spill] sm:$0xff] %v1684_v2  ;;  %v1696_v4 = vld [vmem:[%s2034_s2 + $0x40] sm:$0xff]  ;;  %v1702_v5 = vld [vmem:[%s2034_s2 + $0x98] sm:$0xff]  ;;  %v1708_v6 = vld [vmem:[%s2034_s2 + $0x28] sm:$0xff] }
  0x3c   : > { %350 = vmatpush1.msra.mxu0 %v1576_v48  ;;  %419 = vmatpush1.msra.mxu1 %v1618_v55  ;;  %2084 = vst [vmem:[#allocation11_spill] sm:$0xff] %v1696_v4  ;;  %2085 = vst [vmem:[#allocation12_spill] sm:$0xff] %v1708_v6  ;;  %v1714_v7 = vld [vmem:[%s2034_s2 + $0x90] sm:$0xff]  ;;  %v1720_v8 = vld [vmem:[%s2034_s2 + $0x20] sm:$0xff] }
  0x3d   : > { %351 = vmatprep.subr.mxu0 %v1588_v50  ;;  %420 = vmatprep.subr.mxu1 %v1630_v57  ;;  %2086 = vst [vmem:[#allocation13_spill] sm:$0xff] %v1714_v7  ;;  %2087 = vst [vmem:[#allocation14_spill] sm:$0xff] %v1720_v8  ;;  %v1726_v9 = vld [vmem:[%s2034_s2 + $0x78] sm:$0xff]  ;;  %v1732_v10 = vld [vmem:[%s2034_s2 + $0x8] sm:$0xff] }
  0x3e   : > { %352 = vmatpush1.msra.mxu0 %v1600_v52  ;;  %421 = vmatpush1.msra.mxu1 %v1642_v59  ;;  %2088 = vst [vmem:[#allocation15_spill] sm:$0xff] %v1726_v9  ;;  %2089 = vst [vmem:[#allocation16_spill] sm:$0xff] %v1732_v10  ;;  %v1738_v11 = vld [vmem:[%s2034_s2 + $0x70] sm:$0xff]  ;;  %v1744_v12 = vld [vmem:[%s2034_s2] sm:$0xff] }
  0x3f   : > { %353 = vmatprep.subr.mxu0 %v1612_v54  ;;  %422 = vmatprep.subr.mxu1 %v1654_v61  ;;  %2090 = vst [vmem:[#allocation17_spill] sm:$0xff] %v1738_v11  ;;  %2091 = vst [vmem:[#allocation18_spill] sm:$0xff] %v1744_v12  ;;  %v1750_v13 = vld [vmem:[%s2034_s2 + $0x58] sm:$0xff]  ;;  %v263_v14 = vld [vmem:[#allocation2] sm:$0xff] }
  0x40   : > { %354 = vmatpush1.msra.mxu0 %v1624_v56  ;;  %423 = vmatpush1.msra.mxu1 %v1666_v63  ;;  %2092 = vst [vmem:[#allocation19_spill] sm:$0xff] %v1750_v13  ;;  %v1757_v15 = vld [vmem:[%s2034_s2 + $0x50] sm:$0xff]  ;;  %v1764_v16 = vld [vmem:[%s2034_s2 + $0x38] sm:$0xff] }
  0x41   : > { %355 = vmatprep.subr.mxu0 %v1636_v58  ;;  %424 = vmatprep.subr.mxu1 %v1678_v1  ;;  %2093 = vst [vmem:[#allocation20_spill] sm:$0xff] %v1757_v15  ;;  %2094 = vst [vmem:[#allocation21_spill] sm:$0xff] %v1764_v16  ;;  %v1771_v17 = vld [vmem:[%s2034_s2 + $0x30] sm:$0xff]  ;;  %v1777_v22 = vld [vmem:[%s2034_s2 + $0x18] sm:$0xff] }
  0x42   : > { %356 = vmatpush1.msra.mxu0 %v1648_v60  ;;  %425 = vmatpush1.msra.mxu1 %v1690_v3  ;;  %2095 = vst [vmem:[#allocation22_spill] sm:$0xff] %v1771_v17  ;;  %2096 = vst [vmem:[#allocation23_spill] sm:$0xff] %v1777_v22 }
  0x43   : > { %357 = vmatprep.subr.mxu0 %v1660_v62  ;;  %426 = vmatprep.subr.mxu1 %v1702_v5 }
  0x44   : > { %358 = vmatpush1.msra.mxu0 %v1672_v0  ;;  %427 = vmatpush1.msra.mxu1 %v1714_v7 }
  0x45   : > { %359 = vmatprep.subr.mxu0 %v1684_v2  ;;  %428 = vmatprep.subr.mxu1 %v1726_v9 }
  0x46   : > { %360 = vmatpush1.msra.mxu0 %v1696_v4  ;;  %429 = vmatpush1.msra.mxu1 %v1738_v11 }
  0x47   : > { %361 = vmatprep.subr.mxu0 %v1708_v6  ;;  %430 = vmatprep.subr.mxu1 %v1750_v13 }
  0x48   : > { %362 = vmatpush1.msra.mxu0 %v1720_v8  ;;  %431 = vmatpush1.msra.mxu1 %v1757_v15 }
  0x49   : > { %363 = vmatprep.subr.mxu0 %v1732_v10  ;;  %432 = vmatprep.subr.mxu1 %v1764_v16 }
  0x4a   : > { %364 = vmatpush1.msra.mxu0 %v1744_v12  ;;  %v1783_v12 = vld [vmem:[%s2034_s2 + $0x10] sm:$0xff]  ;;  %433 = vmatpush1.msra.mxu1 %v1771_v17 }
  0x4b   : > { %398 = vmatmul.mubr.f32.vlgmr.msra.gmra.mxu0 %v263_v14  ;;  %2097 = vst [vmem:[#allocation24_spill] sm:$0xff] %v1783_v12  ;;  %508 = vmatprep.subr.mxu0 %v1405_v18 }
  0x4c   : > { %509 = vmatpush1.msra.mxu0 %v1410_v19  ;;  %434 = vmatprep.subr.mxu1 %v1777_v22 }
  0x4d   : > { %510 = vmatprep.subr.mxu0 %v1415_v20  ;;  %435 = vmatpush1.msra.mxu1 %v1783_v12 }
  0x4e   : > { %511 = vmatpush1.msra.mxu0 %v1421_v21  ;;  %469 = vmatmul.mubr.f32.vlgmr.msra.gmra.mxu1 %v263_v14  ;;  %v2098_v14 = vld [vmem:[#allocation18_spill] sm:$0xff] }
  0x4f   : > { %579 = vmatprep.subr.mxu1 %v1452_v27  ;;  %512 = vmatprep.subr.mxu0 %v1428_v23 }
  0x50   : > { %580 = vmatpush1.msra.mxu1 %v1464_v29  ;;  %513 = vmatpush1.msra.mxu0 %v1435_v24 }
  0x51   : > { %581 = vmatprep.subr.mxu1 %v1476_v31  ;;  %514 = vmatprep.subr.mxu0 %v1441_v25 }
  0x52   : > { %582 = vmatpush1.msra.mxu1 %v1481_v32  ;;  %515 = vmatpush1.msra.mxu0 %v1447_v26 }
  0x53   : > { %583 = vmatprep.subr.mxu1 %v1493_v34  ;;  %516 = vmatprep.subr.mxu0 %v1458_v28 }
  0x54   : > { %584 = vmatpush1.msra.mxu1 %v1505_v36  ;;  %517 = vmatpush1.msra.mxu0 %v1470_v30 }
  0x55   : > { %585 = vmatprep.subr.mxu1 %v1510_v37  ;;  %518 = vmatprep.subr.mxu0 %v1487_v33 }
  0x56   : > { %586 = vmatpush1.msra.mxu1 %v1522_v39  ;;  %519 = vmatpush1.msra.mxu0 %v1499_v35 }
  0x57   : > { %587 = vmatprep.subr.mxu1 %v1534_v41  ;;  %520 = vmatprep.subr.mxu0 %v1516_v38 }
  0x58   : > { %588 = vmatpush1.msra.mxu1 %v1546_v43  ;;  %521 = vmatpush1.msra.mxu0 %v1528_v40 }
  0x59   : > { %589 = vmatprep.subr.mxu1 %v1558_v45  ;;  %522 = vmatprep.subr.mxu0 %v1540_v42 }
  0x5a   : > { %590 = vmatpush1.msra.mxu1 %v1570_v47  ;;  %523 = vmatpush1.msra.mxu0 %v1552_v44 }
  0x5b   : > { %591 = vmatprep.subr.mxu1 %v1582_v49  ;;  %524 = vmatprep.subr.mxu0 %v1564_v46 }
  0x5c   : > { %592 = vmatpush1.msra.mxu1 %v1594_v51  ;;  %525 = vmatpush1.msra.mxu0 %v1576_v48 }
  0x5d   : > { %593 = vmatprep.subr.mxu1 %v1606_v53  ;;  %526 = vmatprep.subr.mxu0 %v1588_v50 }
  0x5e   : > { %594 = vmatpush1.msra.mxu1 %v1618_v55  ;;  %527 = vmatpush1.msra.mxu0 %v1600_v52 }
  0x5f   : > { %595 = vmatprep.subr.mxu1 %v1630_v57  ;;  %528 = vmatprep.subr.mxu0 %v1612_v54 }
  0x60   : > { %596 = vmatpush1.msra.mxu1 %v1642_v59  ;;  %529 = vmatpush1.msra.mxu0 %v1624_v56 }
  0x61   : > { %597 = vmatprep.subr.mxu1 %v1654_v61  ;;  %530 = vmatprep.subr.mxu0 %v1636_v58 }
  0x62   : > { %598 = vmatpush1.msra.mxu1 %v1666_v63  ;;  %531 = vmatpush1.msra.mxu0 %v1648_v60 }
  0x63   : > { %599 = vmatprep.subr.mxu1 %v1678_v1  ;;  %532 = vmatprep.subr.mxu0 %v1660_v62 }
  0x64   : > { %600 = vmatpush1.msra.mxu1 %v1690_v3  ;;  %533 = vmatpush1.msra.mxu0 %v1672_v0 }
  0x65   : > { %601 = vmatprep.subr.mxu1 %v1702_v5  ;;  %534 = vmatprep.subr.mxu0 %v1684_v2  ;;  %v268_v2 = vld [vmem:[%s1393_s30 + $0x18] sm:$0xff] }
  0x66   : > { %602 = vmatpush1.msra.mxu1 %v1714_v7  ;;  %535 = vmatpush1.msra.mxu0 %v1696_v4  ;;  %v2099_v4 = vmov 0.0  }
  0x67   : > { %603 = vmatprep.subr.mxu1 %v1726_v9  ;;  %536 = vmatprep.subr.mxu0 %v1708_v6 }
  0x68   : > { %604 = vmatpush1.msra.mxu1 %v1738_v11  ;;  %537 = vmatpush1.msra.mxu0 %v1720_v8  ;;  %v267_v11 = vld [vmem:[%s1393_s30 + $0x10] sm:$0xff] }
  0x69   : > { %605 = vmatprep.subr.mxu1 %v1750_v13  ;;  %538 = vmatprep.subr.mxu0 %v1732_v10  ;;  %v265_v10 = vld [vmem:[%s1393_s30] sm:$0xff] }
  0x6a   : > { %606 = vmatpush1.msra.mxu1 %v1757_v15  ;;  %539 = vmatpush1.msra.mxu0 %v2098_v14 }
  0x6b   : > { %607 = vmatprep.subr.mxu1 %v1764_v16  ;;  %572 = vmatprep.mubr.f32.mxu0 %v2099_v4  ;;  %v266_v16 = vld [vmem:[%s1393_s30 + $0x8] sm:$0xff] }
  0x6c   : > { %608 = vmatpush1.msra.mxu1 %v1771_v17  ;;  %643 = vmatprep.mubr.f32.mxu1 %v2099_v4 }
  0x6d   : > { %609 = vmatprep.subr.mxu1 %v1777_v22  ;;  %683 = vmatprep.subr.mxu0 %v1405_v18 }
  0x6e   : > { %610 = vmatpush1.msra.mxu1 %v1783_v12 }
  0x6f   : > { %754 = vmatprep.subr.mxu1 %v1452_v27 }
 0x10b   : > { %v399_v8 = vpop.f32.mrf.mxu0 }
 0x10c   : > { %v475_v14 = vadd.f32 %v399_v8, %v265_v10 }
 0x10d   : > { %v401_v6 = vpop.f32.mrf.mxu0 }
 0x10e   : > { %v1132_v17 = vmul.f32 -1.442695, %v475_v14  ;;  %v476_v15 = vadd.f32 %v401_v6, %v266_v16  ;;  %v470_v22 = vpop.f32.mrf.mxu1 }
 0x10f   : > { %v477_v0 = vadd.f32 %v470_v22, %v267_v11  ;;  %v2106_v11 = vld [vmem:[#allocation10_spill] sm:$0xff] }
 0x110   : > { %1204 = vpow2.f32 %v1132_v17  ;;  %v1133_v13 = vmul.f32 -1.442695, %v476_v15  ;;  %v472_v4 = vpop.f32.mrf.mxu1  ;;  %v264_v15 = vld [vmem:[#allocation3] sm:$0xff] }
 0x111   : > { %v478_v12 = vadd.f32 %v472_v4, %v268_v2  ;;  %v2102_v2 = vld [vmem:[#allocation8_spill] sm:$0xff]  ;;  %v2103_v4 = vld [vmem:[#allocation15_spill] sm:$0xff] }
 0x112   : > { %1206 = vpow2.f32 %v1133_v13 }
 0x113   : > { %v1134_v9 = vmul.f32 -1.442695, %v478_v12  ;;  %1208 = vtanh.f32 %v477_v0  ;;  %v2107_v12 = vld [vmem:[#allocation19_spill] sm:$0xff] }
 0x115   : > { %1210 = vpow2.f32 %v1134_v9  ;;  %v2105_v9 = vld [vmem:[#allocation17_spill] sm:$0xff] }
 0x11d   : > { %v1205_v18 = vpop.eup %1204 }
 0x11e   : > { %v482_v62 = vadd.f32 1.0, %v1205_v18 }
 0x11f   : > { %v1207_v27 = vpop.eup %1206 }
 0x120   : > { %1212 = vrcp.f32 %v482_v62  ;;  %v488_v8 = vadd.f32 1.0, %v1207_v27  ;;  %v1209_v10 = vpop.eup %1208  ;;  %v2100_v27 = vld [vmem:[#allocation7_spill] sm:$0xff]  ;;  %v2101_v62 = vld [vmem:[#allocation13_spill] sm:$0xff] }
 0x122   : > { %1214 = vrcp.f32 %v488_v8  ;;  %v1211_v6 = vpop.eup %1210  ;;  %v2108_v8 = vld [vmem:[#allocation11_spill] sm:$0xff] }
 0x123   : > { %v495_v13 = vadd.f32 1.0, %v1211_v6  ;;  %v2110_v6 = vld [vmem:[#allocation12_spill] sm:$0xff] }
 0x125   : > { %1216 = vrcp.f32 %v495_v13  ;;  %v2114_v13 = vld [vmem:[#allocation16_spill] sm:$0xff] }
 0x12d   : > { %v1213_v16 = vpop.eup %1212 }
 0x12e   : > { %v499_v7 = vmul.f32 %v1213_v16, %v1209_v10  ;;  %v2109_v10 = vld [vmem:[#allocation20_spill] sm:$0xff]  ;;  %v2111_v16 = vld [vmem:[#allocation21_spill] sm:$0xff] }
 0x12f   : > { %v1215_v17 = vpop.eup %1214 }
 0x130   : > { %v498_v14 = vmul.f32 %v1215_v17, %v264_v15  ;;  %v2112_v15 = vld [vmem:[#allocation14_spill] sm:$0xff] }
 0x131   : > { %v2113_v17 = vld [vmem:[#allocation22_spill] sm:$0xff] }
 0x132   : > { %v1860_v60 = vadd.f32 %v499_v7, %v498_v14  ;;  %v1217_v18 = vpop.eup %1216  ;;  %v2104_v7 = vld [vmem:[#allocation9_spill] sm:$0xff]  ;;  %v2115_v14 = vld [vmem:[#allocation23_spill] sm:$0xff] }
 0x134   : > { %1218 = vtanh.f32 %v1860_v60 }
 0x141   : > { %v1219_v22 = vpop.eup %1218 }
 0x142   : > { %v502_v0 = vmul.f32 %v1219_v22, %v1217_v18  ;;  %v2116_v18 = vld [vmem:[#allocation18_spill] sm:$0xff]  ;;  %v2117_v22 = vmov 0.0  }
 0x144   : > { %573 = vmatmul.mubr.f32.vlgmr.msra.gmra.mxu0 %v502_v0  ;;  %644 = vmatmul.mubr.f32.vlgmr.msra.gmra.mxu1 %v502_v0  ;;  %v2118_v0 = vld [vmem:[#allocation24_spill] sm:$0xff] }
 0x145   : > { %684 = vmatpush1.msra.mxu0 %v1410_v19  ;;  %755 = vmatpush1.msra.mxu1 %v1464_v29 }
 0x146   : > { %685 = vmatprep.subr.mxu0 %v1415_v20  ;;  %756 = vmatprep.subr.mxu1 %v1476_v31 }
 0x147   : > { %686 = vmatpush1.msra.mxu0 %v1421_v21  ;;  %757 = vmatpush1.msra.mxu1 %v1481_v32 }
 0x148   : > { %687 = vmatprep.subr.mxu0 %v1428_v23  ;;  %758 = vmatprep.subr.mxu1 %v1493_v34 }
 0x149   : > { %688 = vmatpush1.msra.mxu0 %v1435_v24  ;;  %759 = vmatpush1.msra.mxu1 %v1505_v36 }
 0x14a   : > { %689 = vmatprep.subr.mxu0 %v1441_v25  ;;  %760 = vmatprep.subr.mxu1 %v1510_v37 }
 0x14b   : > { %690 = vmatpush1.msra.mxu0 %v1447_v26  ;;  %761 = vmatpush1.msra.mxu1 %v1522_v39 }
 0x14c   : > { %691 = vmatprep.subr.mxu0 %v1458_v28  ;;  %762 = vmatprep.subr.mxu1 %v1534_v41 }
 0x14d   : > { %692 = vmatpush1.msra.mxu0 %v1470_v30  ;;  %763 = vmatpush1.msra.mxu1 %v1546_v43 }
 0x14e   : > { %693 = vmatprep.subr.mxu0 %v1487_v33  ;;  %764 = vmatprep.subr.mxu1 %v1558_v45 }
 0x14f   : > { %694 = vmatpush1.msra.mxu0 %v1499_v35  ;;  %765 = vmatpush1.msra.mxu1 %v1570_v47 }
 0x150   : > { %695 = vmatprep.subr.mxu0 %v1516_v38  ;;  %766 = vmatprep.subr.mxu1 %v1582_v49 }
 0x151   : > { %696 = vmatpush1.msra.mxu0 %v1528_v40  ;;  %767 = vmatpush1.msra.mxu1 %v1594_v51 }
 0x152   : > { %697 = vmatprep.subr.mxu0 %v1540_v42  ;;  %768 = vmatprep.subr.mxu1 %v1606_v53 }
 0x153   : > { %698 = vmatpush1.msra.mxu0 %v1552_v44  ;;  %769 = vmatpush1.msra.mxu1 %v1618_v55 }
 0x154   : > { %699 = vmatprep.subr.mxu0 %v1564_v46  ;;  %770 = vmatprep.subr.mxu1 %v1630_v57 }
 0x155   : > { %700 = vmatpush1.msra.mxu0 %v1576_v48  ;;  %771 = vmatpush1.msra.mxu1 %v1642_v59 }
 0x156   : > { %701 = vmatprep.subr.mxu0 %v1588_v50  ;;  %772 = vmatprep.subr.mxu1 %v1654_v61 }
 0x157   : > { %702 = vmatpush1.msra.mxu0 %v1600_v52  ;;  %773 = vmatpush1.msra.mxu1 %v1666_v63 }
 0x158   : > { %703 = vmatprep.subr.mxu0 %v1612_v54  ;;  %774 = vmatprep.subr.mxu1 %v1678_v1 }
 0x159   : > { %704 = vmatpush1.msra.mxu0 %v1624_v56  ;;  %775 = vmatpush1.msra.mxu1 %v1690_v3 }
 0x15a   : > { %705 = vmatprep.subr.mxu0 %v1636_v58  ;;  %776 = vmatprep.subr.mxu1 %v1702_v5 }
 0x15b   : > { %706 = vmatpush1.msra.mxu0 %v2100_v27  ;;  %777 = vmatpush1.msra.mxu1 %v2101_v62 }
 0x15c   : > { %707 = vmatprep.subr.mxu0 %v2102_v2  ;;  %778 = vmatprep.subr.mxu1 %v2103_v4 }
 0x15d   : > { %708 = vmatpush1.msra.mxu0 %v2104_v7  ;;  %779 = vmatpush1.msra.mxu1 %v2105_v9  ;;  %v1138_v9 = vld [vmem:[%s1393_s30 + $0x38] sm:$0xff] }
 0x15e   : > { %709 = vmatprep.subr.mxu0 %v2106_v11  ;;  %780 = vmatprep.subr.mxu1 %v2107_v12 }
 0x15f   : > { %710 = vmatpush1.msra.mxu0 %v2108_v8  ;;  %781 = vmatpush1.msra.mxu1 %v2109_v10  ;;  %v1136_v10 = vld [vmem:[%s1393_s30 + $0x28] sm:$0xff] }
 0x160   : > { %711 = vmatprep.subr.mxu0 %v2110_v6  ;;  %782 = vmatprep.subr.mxu1 %v2111_v16  ;;  %v2119_v6 = vld [vmem:[#allocation5_spill] sm:$0xff]  ;;  %v2120_v16 = vld [vmem:[#allocation6_spill] sm:$0xff] }
 0x161   : > { %712 = vmatpush1.msra.mxu0 %v2112_v15  ;;  %783 = vmatpush1.msra.mxu1 %v2113_v17  ;;  %v1135_v15 = vld [vmem:[%s1393_s30 + $0x20] sm:$0xff] }
 0x162   : > { %713 = vmatprep.subr.mxu0 %v2114_v13  ;;  %784 = vmatprep.subr.mxu1 %v2115_v14 }
 0x163   : > { %714 = vmatpush1.msra.mxu0 %v2116_v18  ;;  %747 = vmatprep.mubr.f32.mxu0 %v2117_v22 }
 0x164   : > { %785 = vmatpush1.msra.mxu1 %v2118_v0  ;;  %818 = vmatprep.mubr.f32.mxu1 %v2117_v22  ;;  %v1137_v22 = vld [vmem:[%s1393_s30 + $0x30] sm:$0xff] }
 0x165   : > { %858 = vmatprep.subr.mxu0 %v2119_v6  ;;  %929 = vmatprep.subr.mxu1 %v2120_v16 }
 0x204   : > { %v574_v17 = vpop.f32.mrf.mxu0  ;;  %v645_v18 = vpop.f32.mrf.mxu1 }
 0x205   : > { %v650_v13 = vadd.f32 %v1135_v15, %v574_v17  ;;  %v652_v2 = vadd.f32 %v1137_v22, %v645_v18  ;;  %v1149_v22 = vld [vmem:[%s1393_s30 + $0x60] sm:$0xff] }
 0x206   : > { %v576_v8 = vpop.f32.mrf.mxu0  ;;  %v647_v0 = vpop.f32.mrf.mxu1 }
 0x207   : > { %v1139_v14 = vmul.f32 -1.442695, %v650_v13  ;;  %v651_v12 = vadd.f32 %v1136_v10, %v576_v8  ;;  %v653_v7 = vadd.f32 %v1138_v9, %v647_v0 }
 0x209   : > { %1220 = vpow2.f32 %v1139_v14  ;;  %v1140_v11 = vmul.f32 -1.442695, %v651_v12  ;;  %v1141_v4 = vmul.f32 -1.442695, %v653_v7 }
 0x20b   : > { %1222 = vpow2.f32 %v1140_v11 }
 0x20c   : > { %1224 = vpow2.f32 %v1141_v4 }
 0x216   : > { %v1221_v6 = vpop.eup %1220 }
 0x217   : > { %v657_v62 = vadd.f32 1.0, %v1221_v6  ;;  %v1150_v6 = vld [vmem:[%s1393_s30 + $0x68] sm:$0xff] }
 0x218   : > { %v1223_v16 = vpop.eup %1222 }
 0x219   : > { %1226 = vrcp.f32 %v657_v62  ;;  %v663_v27 = vadd.f32 1.0, %v1223_v16  ;;  %v1225_v15 = vpop.eup %1224 }
 0x21a   : > { %1228 = vtanh.f32 %v652_v2  ;;  %v670_v12 = vadd.f32 1.0, %v1225_v15 }
 0x21b   : > { %1230 = vrcp.f32 %v663_v27 }
 0x21c   : > { %1232 = vrcp.f32 %v670_v12 }
 0x226   : > { %v1227_v8 = vpop.eup %1226 }
 0x227   : > { %v1229_v10 = vpop.eup %1228 }
 0x228   : > { %v1231_v17 = vpop.eup %1230  ;;  %v674_v11 = vmul.f32 %v1229_v10, %v1227_v8 }
 0x229   : > { %v673_v13 = vmul.f32 %v1231_v17, %v1860_v60  ;;  %v1233_v7 = vpop.eup %1232 }
 0x22b   : > { %v1934_v9 = vadd.f32 %v674_v11, %v673_v13  ;;  %v1152_v11 = vld [vmem:[%s1393_s30 + $0x78] sm:$0xff] }
 0x22d   : > { %1234 = vtanh.f32 %v1934_v9 }
 0x23a   : > { %v1235_v14 = vpop.eup %1234 }
 0x23b   : > { %v677_v4 = vmul.f32 %v1235_v14, %v1233_v7  ;;  %v1151_v7 = vld [vmem:[%s1393_s30 + $0x70] sm:$0xff] }
 0x23d   : > { %748 = vmatmul.mubr.f32.vlgmr.msra.gmra.mxu0 %v677_v4  ;;  %819 = vmatmul.mubr.f32.vlgmr.msra.gmra.mxu1 %v677_v4 }
 0x23e   : > { %859 = vmatpush1.msra.mxu0 %v1410_v19  ;;  %930 = vmatpush1.msra.mxu1 %v1464_v29  ;;  %v2121_v19 = vld [vmem:[#allocation7_spill] sm:$0xff] }
 0x23f   : > { %860 = vmatprep.subr.mxu0 %v1415_v20  ;;  %931 = vmatprep.subr.mxu1 %v1476_v31  ;;  %v2122_v20 = vld [vmem:[#allocation13_spill] sm:$0xff]  ;;  %v2129_v29 = vld [vmem:[#allocation11_spill] sm:$0xff]  ;;  %v2131_v31 = vld [vmem:[#allocation12_spill] sm:$0xff] }
 0x240   : > { %861 = vmatpush1.msra.mxu0 %v1421_v21  ;;  %932 = vmatpush1.msra.mxu1 %v1481_v32  ;;  %v2123_v21 = vld [vmem:[#allocation8_spill] sm:$0xff]  ;;  %v2132_v32 = vld [vmem:[#allocation21_spill] sm:$0xff] }
 0x241   : > { %862 = vmatprep.subr.mxu0 %v1428_v23  ;;  %933 = vmatprep.subr.mxu1 %v1493_v34  ;;  %v2124_v23 = vld [vmem:[#allocation15_spill] sm:$0xff]  ;;  %v2134_v34 = vld [vmem:[#allocation22_spill] sm:$0xff] }
 0x242   : > { %863 = vmatpush1.msra.mxu0 %v1435_v24  ;;  %934 = vmatpush1.msra.mxu1 %v1505_v36  ;;  %v2125_v24 = vld [vmem:[#allocation9_spill] sm:$0xff]  ;;  %v2136_v36 = vld [vmem:[#allocation23_spill] sm:$0xff] }
 0x243   : > { %864 = vmatprep.subr.mxu0 %v1441_v25  ;;  %935 = vmatprep.subr.mxu1 %v1510_v37  ;;  %v2126_v25 = vld [vmem:[#allocation17_spill] sm:$0xff]  ;;  %v2137_v37 = vld [vmem:[#allocation18_spill] sm:$0xff] }
 0x244   : > { %865 = vmatpush1.msra.mxu0 %v1447_v26  ;;  %936 = vmatpush1.msra.mxu1 %v1522_v39  ;;  %v2127_v26 = vld [vmem:[#allocation10_spill] sm:$0xff]  ;;  %v2139_v39 = vld [vmem:[#allocation24_spill] sm:$0xff] }
 0x245   : > { %866 = vmatprep.subr.mxu0 %v1458_v28  ;;  %937 = vmatprep.subr.mxu1 %v1534_v41  ;;  %v2128_v28 = vld [vmem:[#allocation19_spill] sm:$0xff] }
 0x246   : > { %867 = vmatpush1.msra.mxu0 %v1470_v30  ;;  %938 = vmatpush1.msra.mxu1 %v1546_v43  ;;  %v2130_v30 = vld [vmem:[#allocation20_spill] sm:$0xff] }
 0x247   : > { %868 = vmatprep.subr.mxu0 %v1487_v33  ;;  %939 = vmatprep.subr.mxu1 %v1558_v45  ;;  %v2133_v33 = vld [vmem:[#allocation14_spill] sm:$0xff] }
 0x248   : > { %869 = vmatpush1.msra.mxu0 %v1499_v35  ;;  %940 = vmatpush1.msra.mxu1 %v1570_v47  ;;  %v2135_v35 = vld [vmem:[#allocation16_spill] sm:$0xff] }
 0x249   : > { %870 = vmatprep.subr.mxu0 %v1516_v38  ;;  %941 = vmatprep.subr.mxu1 %v1582_v49  ;;  %v2138_v38 = vmov 0.0   ;;  %v1145_v49 = vld [vmem:[%s1393_s30 + $0x58] sm:$0xff] }
 0x24a   : > { %871 = vmatpush1.msra.mxu0 %v1528_v40  ;;  %942 = vmatpush1.msra.mxu1 %v1594_v51  ;;  %v1142_v40 = vld [vmem:[%s1393_s30 + $0x40] sm:$0xff] }
 0x24b   : > { %872 = vmatprep.subr.mxu0 %v1540_v42  ;;  %943 = vmatprep.subr.mxu1 %v1606_v53  ;;  %v1143_v42 = vld [vmem:[%s1393_s30 + $0x48] sm:$0xff] }
 0x24c   : > { %873 = vmatpush1.msra.mxu0 %v1552_v44  ;;  %944 = vmatpush1.msra.mxu1 %v1618_v55 }
 0x24d   : > { %874 = vmatprep.subr.mxu0 %v1564_v46  ;;  %945 = vmatprep.subr.mxu1 %v1630_v57 }
 0x24e   : > { %875 = vmatpush1.msra.mxu0 %v1576_v48  ;;  %946 = vmatpush1.msra.mxu1 %v1642_v59 }
 0x24f   : > { %876 = vmatprep.subr.mxu0 %v1588_v50  ;;  %947 = vmatprep.subr.mxu1 %v1654_v61 }
 0x250   : > { %877 = vmatpush1.msra.mxu0 %v1600_v52  ;;  %948 = vmatpush1.msra.mxu1 %v1666_v63  ;;  %v1144_v52 = vld [vmem:[%s1393_s30 + $0x50] sm:$0xff] }
 0x251   : > { %878 = vmatprep.subr.mxu0 %v1612_v54  ;;  %949 = vmatprep.subr.mxu1 %v1678_v1 }
 0x252   : > { %879 = vmatpush1.msra.mxu0 %v1624_v56  ;;  %950 = vmatpush1.msra.mxu1 %v1690_v3 }
 0x253   : > { %880 = vmatprep.subr.mxu0 %v1636_v58  ;;  %951 = vmatprep.subr.mxu1 %v1702_v5 }
 0x254   : > { %881 = vmatpush1.msra.mxu0 %v2121_v19  ;;  %952 = vmatpush1.msra.mxu1 %v2122_v20 }
 0x255   : > { %882 = vmatprep.subr.mxu0 %v2123_v21  ;;  %953 = vmatprep.subr.mxu1 %v2124_v23 }
 0x256   : > { %883 = vmatpush1.msra.mxu0 %v2125_v24  ;;  %954 = vmatpush1.msra.mxu1 %v2126_v25 }
 0x257   : > { %884 = vmatprep.subr.mxu0 %v2127_v26  ;;  %955 = vmatprep.subr.mxu1 %v2128_v28 }
 0x258   : > { %885 = vmatpush1.msra.mxu0 %v2129_v29  ;;  %956 = vmatpush1.msra.mxu1 %v2130_v30 }
 0x259   : > { %886 = vmatprep.subr.mxu0 %v2131_v31  ;;  %957 = vmatprep.subr.mxu1 %v2132_v32 }
 0x25a   : > { %887 = vmatpush1.msra.mxu0 %v2133_v33  ;;  %958 = vmatpush1.msra.mxu1 %v2134_v34 }
 0x25b   : > { %888 = vmatprep.subr.mxu0 %v2135_v35  ;;  %959 = vmatprep.subr.mxu1 %v2136_v36 }
 0x25c   : > { %889 = vmatpush1.msra.mxu0 %v2137_v37  ;;  %922 = vmatprep.mubr.f32.mxu0 %v2138_v38 }
 0x25d   : > { %960 = vmatpush1.msra.mxu1 %v2139_v39  ;;  %993 = vmatprep.mubr.f32.mxu1 %v2138_v38 }
 0x2fd   : > { %v749_v41 = vpop.f32.mrf.mxu0  ;;  %v820_v47 = vpop.f32.mrf.mxu1 }
 0x2fe   : > { %v825_v43 = vadd.f32 %v1142_v40, %v749_v41  ;;  %v827_v55 = vadd.f32 %v1144_v52, %v820_v47 }
 0x2ff   : > { %v751_v44 = vpop.f32.mrf.mxu0  ;;  %v822_v50 = vpop.f32.mrf.mxu1 }
 0x300   : > { %v1146_v45 = vmul.f32 -1.442695, %v825_v43  ;;  %v826_v46 = vadd.f32 %v1143_v42, %v751_v44  ;;  %v828_v51 = vadd.f32 %v1145_v49, %v822_v50 }
 0x302   : > { %1236 = vpow2.f32 %v1146_v45  ;;  %v1147_v48 = vmul.f32 -1.442695, %v826_v46  ;;  %v1148_v53 = vmul.f32 -1.442695, %v828_v51 }
 0x304   : > { %1238 = vpow2.f32 %v1147_v48 }
 0x305   : > { %1240 = vpow2.f32 %v1148_v53 }
 0x30f   : > { %v1237_v54 = vpop.eup %1236 }
 0x310   : > { %v832_v56 = vadd.f32 1.0, %v1237_v54 }
 0x311   : > { %v1239_v57 = vpop.eup %1238 }
 0x312   : > { %1242 = vrcp.f32 %v832_v56  ;;  %v838_v58 = vadd.f32 1.0, %v1239_v57  ;;  %v1241_v59 = vpop.eup %1240 }
 0x313   : > { %1244 = vtanh.f32 %v827_v55  ;;  %v845_v1 = vadd.f32 1.0, %v1241_v59 }
 0x314   : > { %1246 = vrcp.f32 %v838_v58 }
 0x315   : > { %1248 = vrcp.f32 %v845_v1 }
 0x31f   : > { %v1243_v60 = vpop.eup %1242 }
 0x320   : > { %v1245_v61 = vpop.eup %1244 }
 0x321   : > { %v1247_v63 = vpop.eup %1246  ;;  %v849_v3 = vmul.f32 %v1245_v61, %v1243_v60 }
 0x322   : > { %v848_v5 = vmul.f32 %v1247_v63, %v1934_v9  ;;  %v1249_v62 = vpop.eup %1248 }
 0x324   : > { %v850_v27 = vadd.f32 %v849_v3, %v848_v5 }
 0x326   : > { %1250 = vtanh.f32 %v850_v27 }
 0x333   : > { %v1251_v2 = vpop.eup %1250 }
 0x334   : > { %v852_v18 = vmul.f32 %v1251_v2, %v1249_v62 }
 0x336   : > { %923 = vmatmul.mubr.f32.vlgmr.msra.gmra.mxu0 %v852_v18  ;;  %994 = vmatmul.mubr.f32.vlgmr.msra.gmra.mxu1 %v852_v18 }
 0x3f6   : > { %v924_v0 = vpop.f32.mrf.mxu0  ;;  %v995_v17 = vpop.f32.mrf.mxu1 }
 0x3f7   : > { %v1000_v16 = vadd.f32 %v1149_v22, %v924_v0  ;;  %v1002_v19 = vadd.f32 %v1151_v7, %v995_v17 }
 0x3f8   : > { %v926_v15 = vpop.f32.mrf.mxu0  ;;  %v997_v13 = vpop.f32.mrf.mxu1 }
 0x3f9   : > { %v1153_v8 = vmul.f32 -1.442695, %v1000_v16  ;;  %v1001_v10 = vadd.f32 %v1150_v6, %v926_v15  ;;  %v1003_v9 = vadd.f32 %v1152_v11, %v997_v13 }
 0x3fb   : > { %1252 = vpow2.f32 %v1153_v8  ;;  %v1154_v12 = vmul.f32 -1.442695, %v1001_v10  ;;  %v1155_v14 = vmul.f32 -1.442695, %v1003_v9 }
 0x3fd   : > { %1254 = vpow2.f32 %v1154_v12 }
 0x3fe   : > { %1256 = vpow2.f32 %v1155_v14 }
 0x408   : > { %v1253_v4 = vpop.eup %1252 }
 0x409   : > { %v1007_v20 = vadd.f32 1.0, %v1253_v4 }
 0x40a   : > { %v1255_v21 = vpop.eup %1254 }
 0x40b   : > { %1258 = vrcp.f32 %v1007_v20  ;;  %v1013_v23 = vadd.f32 1.0, %v1255_v21  ;;  %v1257_v24 = vpop.eup %1256 }
 0x40c   : > { %1260 = vtanh.f32 %v1002_v19  ;;  %v1020_v29 = vadd.f32 1.0, %v1257_v24 }
 0x40d   : > { %1262 = vrcp.f32 %v1013_v23 }
 0x40e   : > { %1264 = vrcp.f32 %v1020_v29 }
 0x418   : > { %v1259_v25 = vpop.eup %1258 }
 0x419   : > { %v1261_v26 = vpop.eup %1260 }
 0x41a   : > { %v1263_v28 = vpop.eup %1262  ;;  %v1024_v30 = vmul.f32 %v1261_v26, %v1259_v25 }
 0x41b   : > { %v1023_v31 = vmul.f32 %v1263_v28, %v850_v27  ;;  %v1265_v33 = vpop.eup %1264 }
 0x41d   : > { %v1025_v32 = vadd.f32 %v1024_v30, %v1023_v31 }
 0x41f   : > { %1266 = vtanh.f32 %v1025_v32  ;;  %1029 = vst [vmem:[#allocation3] sm:$0xff] %v1025_v32 }
 0x42b   : > { %1033 = sbr.rel (%p1156_p10) target bundleno = 1073 (0x431), region = 63 }
 0x42c   : > { %v1267_v34 = vpop.eup %1266 }
 0x42d   : > { %v1027_v35 = vmul.f32 %v1267_v34, %v1265_v33 }
 0x42f   : > { %1028 = vst [vmem:[#allocation2] sm:$0xff] %v1027_v35 }
 0x430   : > { %1034 = vst [vmem:[%s2035_s3] sm:$0xff] %v1027_v35  ;;  %1157 = vst [vmem:[%s2035_s3 + $0x8] sm:$0xff] %v1025_v32 }
 0x431 PF: > { %s13_s16 = sadd.s32 1, %s1306_s16   ;;  %s2140_s12 = smov %s1294_s13 }
 0x432   : > { %p10_p11 = scmp.ge.s32.totalorder %s13_s16, 4   ;;  %s2141_s13 = smov %s1364_s20 }
 0x433   : > { %s2142_s14 = smov %s1302_s15  ;;  %s2143_s15 = smov %s2145_s17 }
 0x434   :  { %12 = sbr.rel (!%p10_p11) target bundleno = 3 (0x3), region = 106 }

// kernel: seq2seq_forward.6
= control target key start
LH: loop header
LB: loop body
LE: loop exit
PB: predicated region body
PF: predicated region fallthrough
CT: control target
= control target key end

     0   :  { %10 = vsyncpa [#allocation6], 0  ;;  %s1683_s15 = smov 0   ;;  %s1685_s16 = smov 0   ;;  %s2448_s0 = inlined_call_operand.vmem [shape: f32[2,8,128], index: 0, kind: input, shape index: {}]   ;;  %s2449_s1 = inlined_call_operand.vmem [shape: f32[8,8,1024], index: 1, kind: input, shape index: {}]   ;;  %s2450_s2 = inlined_call_operand.vmem [shape: f32[128,512], index: 2, kind: input, shape index: {}]   ;;  %s2451_s3 = inlined_call_operand.vmem [shape: f32[8,8,128], index: 3, kind: output, shape index: {0}]   ;;  %s2452_s4 = inlined_call_operand.hbm [shape: f32[2,8,128], index: 4, kind: output, shape index: {1}]  }
   0x1   :  { %s1687_s17 = smov 0   ;;  %s1689_s18 = smov 0  }
   0x2   :  { %s1691_s19 = smov 0  }
   0x3 LB: > { %s1409_s20 = sadd.s32 4294967295, %s1652_s19   ;;  %s25_s21 = sadd.s32 1, %s1648_s18  ;;  %s1652_s19 = sphi %s1691_s19, %s16_s19   ;;  %s1648_s18 = sphi %s1689_s18, %s2530_s18   ;;  %s1644_s17 = sphi %s1687_s17, %s2529_s17   ;;  %s1640_s16 = sphi %s1685_s16, %s2528_s16   ;;  %s1636_s15 = sphi %s1683_s15, %s2527_s15  }
   0x4   : > { %p26_p0 = scmp.ge.s32.totalorder %s25_s21, 2  ;;  %p70_p1 = scmp.ne.s32.totalorder %s1640_s16, %s1636_s15 }
   0x5   : > { %p71_p2 = scmp.eq.s32.totalorder %s1652_s19, 0  ;;  %s63_s23 = sadd.s32 1, %s1640_s16 }
   0x6   : > { %s2532_s21 = smov (%p26_p0, %s25_s21), 0  ;;  %p1413_p5 = scmp.ge.s32.totalorder %s1652_s19, 2 }
   0x7   : > { %p72_p3 = por %p71_p2, %p70_p1  ;;  %s58_s22 = ssub.s32 %s1648_s18, %s2532_s21 }
   0x8   : > { %p61_p4 = scmp.eq.s32.totalorder %s58_s22, 0  ;;  %181 = sbr.rel (%p1413_p5) target bundleno = 25 (0x19), region = 24 }
   0xa   : > { %s1719_s24 = scalar_select %p61_p4, %s1640_s16, %s63_s23  }
   0xd   : > { %184 = sbr.rel (!%p72_p3) target bundleno = 25 (0x19), region = 28  ;;  %s186_s25 = sand.u32 (%p72_p3), 1, %s1640_s16  }
   0xe   : > { %s1471_s26 = sshll.u32 (%p72_p3), %s1648_s18, 8  ;;  %s1414_s27 = sshll.u32 (%p72_p3), %s186_s25, 7 }
   0xf   : > { %s1727_s30 = scalar_lea.vmem (%p72_p3), %s2449_s1, %s1471_s26  ;;  %s188_s5 = scalar_lea.vmem (%p72_p3), [#allocation4], %s1414_s27 }
  0x10   : > { %v1417_v0 = vld [vmem:[%s1727_s30 + $0x20] sm:$0xff] (%p72_p3)  ;;  %v1418_v1 = vld [vmem:[%s1727_s30 + $0x28] sm:$0xff] (%p72_p3)  ;;  %v1419_v2 = vld [vmem:[%s1727_s30 + $0x30] sm:$0xff] (%p72_p3) }
  0x11   : > { %209 = vst [vmem:[%s188_s5] sm:$0xff] (%p72_p3), %v1417_v0  ;;  %211 = vst [vmem:[%s188_s5 + $0x8] sm:$0xff] (%p72_p3), %v1418_v1  ;;  %v1420_v3 = vld [vmem:[%s1727_s30 + $0x38] sm:$0xff] (%p72_p3)  ;;  %v1421_v4 = vld [vmem:[%s1727_s30 + $0x60] sm:$0xff] (%p72_p3) }
  0x12   : > { %213 = vst [vmem:[%s188_s5 + $0x10] sm:$0xff] %v1419_v2  ;;  %v1422_v5 = vld [vmem:[%s1727_s30 + $0x68] sm:$0xff]  ;;  %215 = vst [vmem:[%s188_s5 + $0x18] sm:$0xff] %v1420_v3  ;;  %v1423_v6 = vld [vmem:[%s1727_s30 + $0x70] sm:$0xff] }
  0x13   : > { %217 = vst [vmem:[%s188_s5 + $0x20] sm:$0xff] %v1421_v4  ;;  %219 = vst [vmem:[%s188_s5 + $0x28] sm:$0xff] %v1422_v5  ;;  %v1424_v7 = vld [vmem:[%s1727_s30 + $0x78] sm:$0xff]  ;;  %v1425_v8 = vld [vmem:[%s1727_s30 + $0xa0] sm:$0xff] }
  0x14   : > { %221 = vst [vmem:[%s188_s5 + $0x30] sm:$0xff] %v1423_v6  ;;  %223 = vst [vmem:[%s188_s5 + $0x38] sm:$0xff] %v1424_v7  ;;  %v1426_v9 = vld [vmem:[%s1727_s30 + $0xa8] sm:$0xff]  ;;  %v1427_v10 = vld [vmem:[%s1727_s30 + $0xb0] sm:$0xff] }
  0x15   : > { %225 = vst [vmem:[%s188_s5 + $0x40] sm:$0xff] %v1425_v8  ;;  %v1428_v11 = vld [vmem:[%s1727_s30 + $0xb8] sm:$0xff]  ;;  %227 = vst [vmem:[%s188_s5 + $0x48] sm:$0xff] %v1426_v9  ;;  %v1429_v12 = vld [vmem:[%s1727_s30 + $0xe0] sm:$0xff] }
  0x16   : > { %229 = vst [vmem:[%s188_s5 + $0x50] sm:$0xff] %v1427_v10  ;;  %231 = vst [vmem:[%s188_s5 + $0x58] sm:$0xff] %v1428_v11  ;;  %v1430_v13 = vld [vmem:[%s1727_s30 + $0xe8] sm:$0xff]  ;;  %v1431_v14 = vld [vmem:[%s1727_s30 + $0xf0] sm:$0xff] }
  0x17   : > { %233 = vst [vmem:[%s188_s5 + $0x60] sm:$0xff] %v1429_v12  ;;  %235 = vst [vmem:[%s188_s5 + $0x68] sm:$0xff] %v1430_v13  ;;  %v1432_v15 = vld [vmem:[%s1727_s30 + $0xf8] sm:$0xff] }
  0x18   : > { %237 = vst [vmem:[%s188_s5 + $0x70] sm:$0xff] %v1431_v14  ;;  %239 = vst [vmem:[%s188_s5 + $0x78] sm:$0xff] %v1432_v15 }
  0x19 PF: > { %p1433_p6 = scmp.ge.s32.totalorder %s1652_s19, 1  ;;  %p244_p7 = scmp.lt.s32.totalorder %s1652_s19, 3 }
  0x1b   : > { %p245_p8 = pnand %p1433_p6, %p244_p7 }
  0x1d   : > { %248 = sbr.rel (%p245_p8) target bundleno = 1092 (0x444), region = 51 }
  0x22   : > { %s251_s6 = sand.u32 1, %s1636_s15   ;;  %s1435_s7 = sshll.u32 %s1644_s17, 2 }
  0x23   : > { %s1434_s8 = sshll.u32 %s251_s6, 7  ;;  %p289_p9 = scmp.lt.s32.totalorder %s1435_s7, 7 }
  0x24   : > { %s1754_s13 = scalar_lea.vmem [#allocation4], %s1434_s8  ;;  %p1437_p10 = scmp.ne.s32.totalorder %s1644_s17, 0 }
  0x25   : > { %s2534_s7 = smov (!%p289_p9, %s1435_s7), 7 }
  0x26   : > { %s1436_s9 = sshll.u32 %s2534_s7, 3  ;;  %300 = sbr.rel (%p1437_p10) target bundleno = 45 (0x2d), region = 59 }
  0x27   : > { %s1752_s12 = scalar_lea.vmem %s2451_s3, %s1436_s9 }
  0x2b   : > { %v301_v16 = vld [vmem:[%s2448_s0] sm:$0xff]  ;;  %v1438_v17 = vld [vmem:[%s2448_s0 + $0x8] sm:$0xff] }
  0x2c   : > { %302 = vst [vmem:[#allocation2] sm:$0xff] %v301_v16  ;;  %305 = vst [vmem:[#allocation3] sm:$0xff] %v1438_v17 }
  0x2d PF: > { %v1766_v18 = vld [vmem:[%s2450_s2 + $0x1e8] sm:$0xff]  ;;  %v1771_v19 = vld [vmem:[%s2450_s2 + $0x1e0] sm:$0xff]  ;;  %v2453_v22 = vmov 0.0   ;;  %v1813_v27 = vld [vmem:[%s2450_s2 + $0x1f8] sm:$0xff]  ;;  %p1466_p11 = scmp.ne.s32.totalorder %s1644_s17, 1 }
  0x2e   : > { %2485 = vst [vmem:[#allocation8_spill] sm:$0xff] %v1766_v18  ;;  %v1776_v20 = vld [vmem:[%s2450_s2 + $0x1c8] sm:$0xff]  ;;  %376 = vmatprep.subr.mxu0 %v1766_v18  ;;  %v1782_v21 = vld [vmem:[%s2450_s2 + $0x1c0] sm:$0xff]  ;;  %440 = vmatprep.mubr.f32.mxu0 %v2453_v22  ;;  %2486 = vst [vmem:[#allocation9_spill] sm:$0xff] %v1813_v27 }
  0x2f   : > { %377 = vmatpush1.msra.mxu0 %v1771_v19  ;;  %v1789_v23 = vld [vmem:[%s2450_s2 + $0x1a8] sm:$0xff]  ;;  %511 = vmatprep.mubr.f32.mxu1 %v2453_v22  ;;  %v1796_v24 = vld [vmem:[%s2450_s2 + $0x1a0] sm:$0xff]  ;;  %v1825_v29 = vld [vmem:[%s2450_s2 + $0x1f0] sm:$0xff] }
  0x30   : > { %378 = vmatprep.subr.mxu0 %v1776_v20  ;;  %v1802_v25 = vld [vmem:[%s2450_s2 + $0x188] sm:$0xff]  ;;  %v1808_v26 = vld [vmem:[%s2450_s2 + $0x180] sm:$0xff]  ;;  %447 = vmatprep.subr.mxu1 %v1813_v27  ;;  %v1837_v31 = vld [vmem:[%s2450_s2 + $0x1d8] sm:$0xff] }
  0x31   : > { %379 = vmatpush1.msra.mxu0 %v1782_v21  ;;  %v1819_v28 = vld [vmem:[%s2450_s2 + $0x168] sm:$0xff]  ;;  %v1831_v30 = vld [vmem:[%s2450_s2 + $0x160] sm:$0xff]  ;;  %448 = vmatpush1.msra.mxu1 %v1825_v29  ;;  %v1842_v32 = vld [vmem:[%s2450_s2 + $0x1d0] sm:$0xff] }
  0x32   : > { %380 = vmatprep.subr.mxu0 %v1789_v23  ;;  %v1848_v33 = vld [vmem:[%s2450_s2 + $0x148] sm:$0xff]  ;;  %449 = vmatprep.subr.mxu1 %v1837_v31  ;;  %v1854_v34 = vld [vmem:[%s2450_s2 + $0x1b8] sm:$0xff]  ;;  %v1860_v35 = vld [vmem:[%s2450_s2 + $0x140] sm:$0xff] }
  0x33   : > { %381 = vmatpush1.msra.mxu0 %v1796_v24  ;;  %450 = vmatpush1.msra.mxu1 %v1842_v32  ;;  %v1866_v36 = vld [vmem:[%s2450_s2 + $0x1b0] sm:$0xff]  ;;  %v1871_v37 = vld [vmem:[%s2450_s2 + $0x198] sm:$0xff]  ;;  %v1877_v38 = vld [vmem:[%s2450_s2 + $0x128] sm:$0xff] }
  0x34   : > { %382 = vmatprep.subr.mxu0 %v1802_v25  ;;  %451 = vmatprep.subr.mxu1 %v1854_v34  ;;  %v1883_v39 = vld [vmem:[%s2450_s2 + $0x190] sm:$0xff]  ;;  %v1889_v40 = vld [vmem:[%s2450_s2 + $0x120] sm:$0xff]  ;;  %v1895_v41 = vld [vmem:[%s2450_s2 + $0x178] sm:$0xff] }
  0x35   : > { %383 = vmatpush1.msra.mxu0 %v1808_v26  ;;  %452 = vmatpush1.msra.mxu1 %v1866_v36  ;;  %v1901_v42 = vld [vmem:[%s2450_s2 + $0x108] sm:$0xff]  ;;  %v1907_v43 = vld [vmem:[%s2450_s2 + $0x170] sm:$0xff]  ;;  %v1913_v44 = vld [vmem:[%s2450_s2 + $0x100] sm:$0xff] }
  0x36   : > { %384 = vmatprep.subr.mxu0 %v1819_v28  ;;  %453 = vmatprep.subr.mxu1 %v1871_v37  ;;  %v1919_v45 = vld [vmem:[%s2450_s2 + $0x158] sm:$0xff]  ;;  %v1925_v46 = vld [vmem:[%s2450_s2 + $0xe8] sm:$0xff]  ;;  %v1931_v47 = vld [vmem:[%s2450_s2 + $0x150] sm:$0xff] }
  0x37   : > { %385 = vmatpush1.msra.mxu0 %v1831_v30  ;;  %454 = vmatpush1.msra.mxu1 %v1883_v39  ;;  %v1937_v48 = vld [vmem:[%s2450_s2 + $0xe0] sm:$0xff]  ;;  %v1943_v49 = vld [vmem:[%s2450_s2 + $0x138] sm:$0xff]  ;;  %v1949_v50 = vld [vmem:[%s2450_s2 + $0xc8] sm:$0xff] }
  0x38   : > { %386 = vmatprep.subr.mxu0 %v1848_v33  ;;  %455 = vmatprep.subr.mxu1 %v1895_v41  ;;  %v1955_v51 = vld [vmem:[%s2450_s2 + $0x130] sm:$0xff]  ;;  %v1961_v52 = vld [vmem:[%s2450_s2 + $0xc0] sm:$0xff]  ;;  %v1967_v53 = vld [vmem:[%s2450_s2 + $0x118] sm:$0xff] }
  0x39   : > { %387 = vmatpush1.msra.mxu0 %v1860_v35  ;;  %456 = vmatpush1.msra.mxu1 %v1907_v43  ;;  %v1973_v54 = vld [vmem:[%s2450_s2 + $0xa8] sm:$0xff]  ;;  %v1979_v55 = vld [vmem:[%s2450_s2 + $0x110] sm:$0xff]  ;;  %v1985_v56 = vld [vmem:[%s2450_s2 + $0xa0] sm:$0xff] }
  0x3a   : > { %388 = vmatprep.subr.mxu0 %v1877_v38  ;;  %457 = vmatprep.subr.mxu1 %v1919_v45  ;;  %v1991_v57 = vld [vmem:[%s2450_s2 + $0xf8] sm:$0xff]  ;;  %v1997_v58 = vld [vmem:[%s2450_s2 + $0x88] sm:$0xff]  ;;  %v2003_v59 = vld [vmem:[%s2450_s2 + $0xf0] sm:$0xff] }
  0x3b   : > { %389 = vmatpush1.msra.mxu0 %v1889_v40  ;;  %458 = vmatpush1.msra.mxu1 %v1931_v47  ;;  %v2009_v60 = vld [vmem:[%s2450_s2 + $0x80] sm:$0xff]  ;;  %v2015_v61 = vld [vmem:[%s2450_s2 + $0xd8] sm:$0xff]  ;;  %v2021_v62 = vld [vmem:[%s2450_s2 + $0x68] sm:$0xff] }
  0x3c   : > { %390 = vmatprep.subr.mxu0 %v1901_v42  ;;  %459 = vmatprep.subr.mxu1 %v1943_v49  ;;  %2487 = vst [vmem:[#allocation10_spill] sm:$0xff] %v2021_v62  ;;  %v2027_v63 = vld [vmem:[%s2450_s2 + $0xd0] sm:$0xff]  ;;  %v2033_v0 = vld [vmem:[%s2450_s2 + $0x60] sm:$0xff]  ;;  %v2039_v1 = vld [vmem:[%s2450_s2 + $0xb8] sm:$0xff] }
  0x3d   : > { %391 = vmatpush1.msra.mxu0 %v1913_v44  ;;  %460 = vmatpush1.msra.mxu1 %v1955_v51  ;;  %2488 = vst [vmem:[#allocation11_spill] sm:$0xff] %v2033_v0  ;;  %v2045_v2 = vld [vmem:[%s2450_s2 + $0x48] sm:$0xff]  ;;  %v2051_v3 = vld [vmem:[%s2450_s2 + $0xb0] sm:$0xff]  ;;  %v2057_v4 = vld [vmem:[%s2450_s2 + $0x40] sm:$0xff] }
  0x3e   : > { %392 = vmatprep.subr.mxu0 %v1925_v46  ;;  %461 = vmatprep.subr.mxu1 %v1967_v53  ;;  %2489 = vst [vmem:[#allocation12_spill] sm:$0xff] %v2045_v2  ;;  %2490 = vst [vmem:[#allocation13_spill] sm:$0xff] %v2057_v4  ;;  %v2063_v5 = vld [vmem:[%s2450_s2 + $0x98] sm:$0xff]  ;;  %v2069_v6 = vld [vmem:[%s2450_s2 + $0x28] sm:$0xff] }
  0x3f   : > { %393 = vmatpush1.msra.mxu0 %v1937_v48  ;;  %462 = vmatpush1.msra.mxu1 %v1979_v55  ;;  %2491 = vst [vmem:[#allocation14_spill] sm:$0xff] %v2069_v6  ;;  %v2075_v7 = vld [vmem:[%s2450_s2 + $0x90] sm:$0xff]  ;;  %v2081_v8 = vld [vmem:[%s2450_s2 + $0x20] sm:$0xff]  ;;  %v2087_v9 = vld [vmem:[%s2450_s2 + $0x78] sm:$0xff] }
  0x40   : > { %394 = vmatprep.subr.mxu0 %v1949_v50  ;;  %463 = vmatprep.subr.mxu1 %v1991_v57  ;;  %2492 = vst [vmem:[#allocation15_spill] sm:$0xff] %v2075_v7  ;;  %2493 = vst [vmem:[#allocation16_spill] sm:$0xff] %v2081_v8  ;;  %v2093_v10 = vld [vmem:[%s2450_s2 + $0x8] sm:$0xff]  ;;  %v2099_v11 = vld [vmem:[%s2450_s2 + $0x70] sm:$0xff] }
  0x41   : > { %395 = vmatpush1.msra.mxu0 %v1961_v52  ;;  %464 = vmatpush1.msra.mxu1 %v2003_v59  ;;  %2494 = vst [vmem:[#allocation17_spill] sm:$0xff] %v2087_v9  ;;  %2495 = vst [vmem:[#allocation18_spill] sm:$0xff] %v2093_v10  ;;  %v2105_v12 = vld [vmem:[%s2450_s2] sm:$0xff]  ;;  %v2111_v13 = vld [vmem:[%s2450_s2 + $0x58] sm:$0xff] }
  0x42   : > { %396 = vmatprep.subr.mxu0 %v1973_v54  ;;  %465 = vmatprep.subr.mxu1 %v2015_v61  ;;  %2496 = vst [vmem:[#allocation19_spill] sm:$0xff] %v2099_v11  ;;  %2497 = vst [vmem:[#allocation20_spill] sm:$0xff] %v2105_v12  ;;  %v306_v14 = vld [vmem:[#allocation2] sm:$0xff]  ;;  %v2118_v15 = vld [vmem:[%s2450_s2 + $0x50] sm:$0xff] }
  0x43   : > { %397 = vmatpush1.msra.mxu0 %v1985_v56  ;;  %466 = vmatpush1.msra.mxu1 %v2027_v63  ;;  %2498 = vst [vmem:[#allocation21_spill] sm:$0xff] %v2111_v13  ;;  %2499 = vst [vmem:[#allocation22_spill] sm:$0xff] %v2118_v15  ;;  %v2125_v16 = vld [vmem:[%s2450_s2 + $0x38] sm:$0xff]  ;;  %v2132_v17 = vld [vmem:[%s2450_s2 + $0x30] sm:$0xff] }
  0x44   : > { %398 = vmatprep.subr.mxu0 %v1997_v58  ;;  %467 = vmatprep.subr.mxu1 %v2039_v1  ;;  %2500 = vst [vmem:[#allocation23_spill] sm:$0xff] %v2125_v16  ;;  %2501 = vst [vmem:[#allocation24_spill] sm:$0xff] %v2132_v17  ;;  %v2138_v22 = vld [vmem:[%s2450_s2 + $0x18] sm:$0xff] }
  0x45   : > { %399 = vmatpush1.msra.mxu0 %v2009_v60  ;;  %468 = vmatpush1.msra.mxu1 %v2051_v3  ;;  %2502 = vst [vmem:[#allocation25_spill] sm:$0xff] %v2138_v22 }
  0x46   : > { %400 = vmatprep.subr.mxu0 %v2021_v62  ;;  %469 = vmatprep.subr.mxu1 %v2063_v5 }
  0x47   : > { %401 = vmatpush1.msra.mxu0 %v2033_v0  ;;  %470 = vmatpush1.msra.mxu1 %v2075_v7 }
  0x48   : > { %402 = vmatprep.subr.mxu0 %v2045_v2  ;;  %471 = vmatprep.subr.mxu1 %v2087_v9 }
  0x49   : > { %403 = vmatpush1.msra.mxu0 %v2057_v4  ;;  %472 = vmatpush1.msra.mxu1 %v2099_v11 }
  0x4a   : > { %404 = vmatprep.subr.mxu0 %v2069_v6  ;;  %473 = vmatprep.subr.mxu1 %v2111_v13 }
  0x4b   : > { %405 = vmatpush1.msra.mxu0 %v2081_v8  ;;  %474 = vmatpush1.msra.mxu1 %v2118_v15 }
  0x4c   : > { %406 = vmatprep.subr.mxu0 %v2093_v10  ;;  %475 = vmatprep.subr.mxu1 %v2125_v16 }
  0x4d   : > { %407 = vmatpush1.msra.mxu0 %v2105_v12  ;;  %v2144_v12 = vld [vmem:[%s2450_s2 + $0x10] sm:$0xff]  ;;  %476 = vmatpush1.msra.mxu1 %v2132_v17 }
  0x4e   : > { %441 = vmatmul.mubr.f32.vlgmr.msra.gmra.mxu0 %v306_v14  ;;  %2503 = vst [vmem:[#allocation26_spill] sm:$0xff] %v2144_v12  ;;  %616 = vmatprep.subr.mxu0 %v1766_v18 }
  0x4f   : > { %617 = vmatpush1.msra.mxu0 %v1771_v19  ;;  %477 = vmatprep.subr.mxu1 %v2138_v22 }
  0x50   : > { %618 = vmatprep.subr.mxu0 %v1776_v20  ;;  %478 = vmatpush1.msra.mxu1 %v2144_v12 }
  0x51   : > { %619 = vmatpush1.msra.mxu0 %v1782_v21  ;;  %512 = vmatmul.mubr.f32.vlgmr.msra.gmra.mxu1 %v306_v14  ;;  %v2504_v14 = vld [vmem:[#allocation20_spill] sm:$0xff] }
  0x52   : > { %687 = vmatprep.subr.mxu1 %v1813_v27  ;;  %620 = vmatprep.subr.mxu0 %v1789_v23 }
  0x53   : > { %688 = vmatpush1.msra.mxu1 %v1825_v29  ;;  %621 = vmatpush1.msra.mxu0 %v1796_v24 }
  0x54   : > { %689 = vmatprep.subr.mxu1 %v1837_v31  ;;  %622 = vmatprep.subr.mxu0 %v1802_v25 }
  0x55   : > { %690 = vmatpush1.msra.mxu1 %v1842_v32  ;;  %623 = vmatpush1.msra.mxu0 %v1808_v26 }
  0x56   : > { %691 = vmatprep.subr.mxu1 %v1854_v34  ;;  %624 = vmatprep.subr.mxu0 %v1819_v28 }
  0x57   : > { %692 = vmatpush1.msra.mxu1 %v1866_v36  ;;  %625 = vmatpush1.msra.mxu0 %v1831_v30 }
  0x58   : > { %693 = vmatprep.subr.mxu1 %v1871_v37  ;;  %626 = vmatprep.subr.mxu0 %v1848_v33 }
  0x59   : > { %694 = vmatpush1.msra.mxu1 %v1883_v39  ;;  %627 = vmatpush1.msra.mxu0 %v1860_v35 }
  0x5a   : > { %695 = vmatprep.subr.mxu1 %v1895_v41  ;;  %628 = vmatprep.subr.mxu0 %v1877_v38 }
  0x5b   : > { %696 = vmatpush1.msra.mxu1 %v1907_v43  ;;  %629 = vmatpush1.msra.mxu0 %v1889_v40 }
  0x5c   : > { %697 = vmatprep.subr.mxu1 %v1919_v45  ;;  %630 = vmatprep.subr.mxu0 %v1901_v42 }
  0x5d   : > { %698 = vmatpush1.msra.mxu1 %v1931_v47  ;;  %631 = vmatpush1.msra.mxu0 %v1913_v44 }
  0x5e   : > { %699 = vmatprep.subr.mxu1 %v1943_v49  ;;  %632 = vmatprep.subr.mxu0 %v1925_v46 }
  0x5f   : > { %700 = vmatpush1.msra.mxu1 %v1955_v51  ;;  %633 = vmatpush1.msra.mxu0 %v1937_v48 }
  0x60   : > { %701 = vmatprep.subr.mxu1 %v1967_v53  ;;  %634 = vmatprep.subr.mxu0 %v1949_v50 }
  0x61   : > { %702 = vmatpush1.msra.mxu1 %v1979_v55  ;;  %635 = vmatpush1.msra.mxu0 %v1961_v52 }
  0x62   : > { %703 = vmatprep.subr.mxu1 %v1991_v57  ;;  %636 = vmatprep.subr.mxu0 %v1973_v54 }
  0x63   : > { %704 = vmatpush1.msra.mxu1 %v2003_v59  ;;  %637 = vmatpush1.msra.mxu0 %v1985_v56 }
  0x64   : > { %705 = vmatprep.subr.mxu1 %v2015_v61  ;;  %638 = vmatprep.subr.mxu0 %v1997_v58 }
  0x65   : > { %706 = vmatpush1.msra.mxu1 %v2027_v63  ;;  %639 = vmatpush1.msra.mxu0 %v2009_v60 }
  0x66   : > { %707 = vmatprep.subr.mxu1 %v2039_v1  ;;  %640 = vmatprep.subr.mxu0 %v2021_v62 }
  0x67   : > { %708 = vmatpush1.msra.mxu1 %v2051_v3  ;;  %641 = vmatpush1.msra.mxu0 %v2033_v0 }
  0x68   : > { %709 = vmatprep.subr.mxu1 %v2063_v5  ;;  %642 = vmatprep.subr.mxu0 %v2045_v2  ;;  %v311_v2 = vld [vmem:[%s1754_s13 + $0x18] sm:$0xff] }
  0x69   : > { %710 = vmatpush1.msra.mxu1 %v2075_v7  ;;  %643 = vmatpush1.msra.mxu0 %v2057_v4  ;;  %v2505_v4 = vmov 0.0  }
  0x6a   : > { %711 = vmatprep.subr.mxu1 %v2087_v9  ;;  %644 = vmatprep.subr.mxu0 %v2069_v6 }
  0x6b   : > { %712 = vmatpush1.msra.mxu1 %v2099_v11  ;;  %645 = vmatpush1.msra.mxu0 %v2081_v8  ;;  %v310_v11 = vld [vmem:[%s1754_s13 + $0x10] sm:$0xff] }
  0x6c   : > { %713 = vmatprep.subr.mxu1 %v2111_v13  ;;  %646 = vmatprep.subr.mxu0 %v2093_v10  ;;  %v308_v10 = vld [vmem:[%s1754_s13] sm:$0xff] }
  0x6d   : > { %714 = vmatpush1.msra.mxu1 %v2118_v15  ;;  %647 = vmatpush1.msra.mxu0 %v2504_v14 }
  0x6e   : > { %715 = vmatprep.subr.mxu1 %v2125_v16  ;;  %680 = vmatprep.mubr.f32.mxu0 %v2505_v4  ;;  %v309_v16 = vld [vmem:[%s1754_s13 + $0x8] sm:$0xff] }
  0x6f   : > { %716 = vmatpush1.msra.mxu1 %v2132_v17  ;;  %751 = vmatprep.mubr.f32.mxu1 %v2505_v4 }
  0x70   : > { %717 = vmatprep.subr.mxu1 %v2138_v22  ;;  %857 = vmatprep.subr.mxu0 %v1766_v18 }
  0x71   : > { %718 = vmatpush1.msra.mxu1 %v2144_v12 }
  0x72   : > { %928 = vmatprep.subr.mxu1 %v1813_v27 }
 0x10e   : > { %v442_v8 = vpop.f32.mrf.mxu0 }
 0x10f   : > { %v518_v14 = vadd.f32 %v442_v8, %v308_v10 }
 0x110   : > { %v444_v6 = vpop.f32.mrf.mxu0 }
 0x111   : > { %v1439_v17 = vmul.f32 -1.442695, %v518_v14  ;;  %v519_v15 = vadd.f32 %v444_v6, %v309_v16  ;;  %v513_v22 = vpop.f32.mrf.mxu1  ;;  %v307_v16 = vld [vmem:[#allocation3] sm:$0xff] }
 0x112   : > { %v520_v0 = vadd.f32 %v513_v22, %v310_v11  ;;  %v2523_v11 = vld [vmem:[#allocation26_spill] sm:$0xff] }
 0x113   : > { %1522 = vpow2.f32 %v1439_v17  ;;  %v1440_v13 = vmul.f32 -1.442695, %v519_v15  ;;  %v515_v4 = vpop.f32.mrf.mxu1 }
 0x114   : > { %v521_v12 = vadd.f32 %v515_v4, %v311_v2  ;;  %v2520_v4 = vld [vmem:[#allocation25_spill] sm:$0xff] }
 0x115   : > { %1524 = vpow2.f32 %v1440_v13 }
 0x116   : > { %v1441_v9 = vmul.f32 -1.442695, %v521_v12  ;;  %1526 = vtanh.f32 %v520_v0  ;;  %v2524_v12 = vld [vmem:[#allocation8_spill] sm:$0xff] }
 0x118   : > { %1528 = vpow2.f32 %v1441_v9  ;;  %v2522_v9 = vmov 0.0  }
 0x120   : > { %v1523_v18 = vpop.eup %1522 }
 0x121   : > { %v525_v62 = vadd.f32 1.0, %v1523_v18 }
 0x122   : > { %v1525_v27 = vpop.eup %1524 }
 0x123   : > { %1530 = vrcp.f32 %v525_v62  ;;  %v531_v8 = vadd.f32 1.0, %v1525_v27  ;;  %v1527_v6 = vpop.eup %1526  ;;  %v2506_v27 = vld [vmem:[#allocation15_spill] sm:$0xff]  ;;  %v2519_v62 = vld [vmem:[#allocation18_spill] sm:$0xff] }
 0x125   : > { %1532 = vrcp.f32 %v531_v8  ;;  %v1529_v10 = vpop.eup %1528  ;;  %v2525_v8 = vld [vmem:[#allocation9_spill] sm:$0xff] }
 0x126   : > { %v538_v17 = vadd.f32 1.0, %v1529_v10 }
 0x128   : > { %1534 = vrcp.f32 %v538_v17 }
 0x130   : > { %v1531_v15 = vpop.eup %1530 }
 0x131   : > { %v542_v7 = vmul.f32 %v1531_v15, %v1527_v6  ;;  %v1442_v6 = vld [vmem:[%s1754_s13 + $0x20] sm:$0xff]  ;;  %v1443_v15 = vld [vmem:[%s1754_s13 + $0x28] sm:$0xff] }
 0x132   : > { %v1533_v13 = vpop.eup %1532 }
 0x133   : > { %v541_v14 = vmul.f32 %v1533_v13, %v307_v16 }
 0x135   : > { %v2221_v2 = vadd.f32 %v542_v7, %v541_v14  ;;  %v1535_v18 = vpop.eup %1534  ;;  %v2521_v7 = vld [vmem:[#allocation20_spill] sm:$0xff] }
 0x137   : > { %1536 = vtanh.f32 %v2221_v2 }
 0x144   : > { %v1537_v22 = vpop.eup %1536 }
 0x145   : > { %v545_v0 = vmul.f32 %v1537_v22, %v1535_v18 }
 0x147   : > { %546 = vst [vmem:[%s1752_s12] sm:$0xff] %v545_v0  ;;  %681 = vmatmul.mubr.f32.vlgmr.msra.gmra.mxu0 %v545_v0  ;;  %752 = vmatmul.mubr.f32.vlgmr.msra.gmra.mxu1 %v545_v0  ;;  %v1445_v0 = vld [vmem:[%s1754_s13 + $0x38] sm:$0xff] }
 0x148   : > { %858 = vmatpush1.msra.mxu0 %v1771_v19  ;;  %929 = vmatpush1.msra.mxu1 %v1825_v29 }
 0x149   : > { %859 = vmatprep.subr.mxu0 %v1776_v20  ;;  %930 = vmatprep.subr.mxu1 %v1837_v31 }
 0x14a   : > { %860 = vmatpush1.msra.mxu0 %v1782_v21  ;;  %931 = vmatpush1.msra.mxu1 %v1842_v32 }
 0x14b   : > { %861 = vmatprep.subr.mxu0 %v1789_v23  ;;  %932 = vmatprep.subr.mxu1 %v1854_v34 }
 0x14c   : > { %862 = vmatpush1.msra.mxu0 %v1796_v24  ;;  %933 = vmatpush1.msra.mxu1 %v1866_v36 }
 0x14d   : > { %863 = vmatprep.subr.mxu0 %v1802_v25  ;;  %934 = vmatprep.subr.mxu1 %v1871_v37 }
 0x14e   : > { %864 = vmatpush1.msra.mxu0 %v1808_v26  ;;  %935 = vmatpush1.msra.mxu1 %v1883_v39 }
 0x14f   : > { %865 = vmatprep.subr.mxu0 %v1819_v28  ;;  %936 = vmatprep.subr.mxu1 %v1895_v41 }
 0x150   : > { %866 = vmatpush1.msra.mxu0 %v1831_v30  ;;  %937 = vmatpush1.msra.mxu1 %v1907_v43 }
 0x151   : > { %867 = vmatprep.subr.mxu0 %v1848_v33  ;;  %938 = vmatprep.subr.mxu1 %v1919_v45 }
 0x152   : > { %868 = vmatpush1.msra.mxu0 %v1860_v35  ;;  %939 = vmatpush1.msra.mxu1 %v1931_v47 }
 0x153   : > { %869 = vmatprep.subr.mxu0 %v1877_v38  ;;  %940 = vmatprep.subr.mxu1 %v1943_v49  ;;  %v2507_v38 = vld [vmem:[#allocation10_spill] sm:$0xff] }
 0x154   : > { %870 = vmatpush1.msra.mxu0 %v1889_v40  ;;  %941 = vmatpush1.msra.mxu1 %v1955_v51  ;;  %v2508_v40 = vld [vmem:[#allocation17_spill] sm:$0xff] }
 0x155   : > { %871 = vmatprep.subr.mxu0 %v1901_v42  ;;  %942 = vmatprep.subr.mxu1 %v1967_v53  ;;  %v2509_v42 = vld [vmem:[#allocation11_spill] sm:$0xff] }
 0x156   : > { %872 = vmatpush1.msra.mxu0 %v1913_v44  ;;  %943 = vmatpush1.msra.mxu1 %v1979_v55  ;;  %v2510_v44 = vld [vmem:[#allocation19_spill] sm:$0xff] }
 0x157   : > { %873 = vmatprep.subr.mxu0 %v1925_v46  ;;  %944 = vmatprep.subr.mxu1 %v1991_v57  ;;  %v2511_v46 = vld [vmem:[#allocation12_spill] sm:$0xff] }
 0x158   : > { %874 = vmatpush1.msra.mxu0 %v1937_v48  ;;  %945 = vmatpush1.msra.mxu1 %v2003_v59  ;;  %v2512_v48 = vld [vmem:[#allocation21_spill] sm:$0xff] }
 0x159   : > { %875 = vmatprep.subr.mxu0 %v1949_v50  ;;  %946 = vmatprep.subr.mxu1 %v2015_v61  ;;  %v2513_v50 = vld [vmem:[#allocation13_spill] sm:$0xff] }
 0x15a   : > { %876 = vmatpush1.msra.mxu0 %v1961_v52  ;;  %947 = vmatpush1.msra.mxu1 %v2027_v63  ;;  %v2514_v52 = vld [vmem:[#allocation22_spill] sm:$0xff] }
 0x15b   : > { %877 = vmatprep.subr.mxu0 %v1973_v54  ;;  %948 = vmatprep.subr.mxu1 %v2039_v1  ;;  %v2515_v54 = vld [vmem:[#allocation14_spill] sm:$0xff] }
 0x15c   : > { %878 = vmatpush1.msra.mxu0 %v1985_v56  ;;  %949 = vmatpush1.msra.mxu1 %v2051_v3  ;;  %v2516_v56 = vld [vmem:[#allocation23_spill] sm:$0xff] }
 0x15d   : > { %879 = vmatprep.subr.mxu0 %v1997_v58  ;;  %950 = vmatprep.subr.mxu1 %v2063_v5  ;;  %v2517_v58 = vld [vmem:[#allocation16_spill] sm:$0xff] }
 0x15e   : > { %880 = vmatpush1.msra.mxu0 %v2009_v60  ;;  %951 = vmatpush1.msra.mxu1 %v2506_v27  ;;  %v2518_v60 = vld [vmem:[#allocation24_spill] sm:$0xff] }
 0x15f   : > { %881 = vmatprep.subr.mxu0 %v2507_v38  ;;  %952 = vmatprep.subr.mxu1 %v2508_v40 }
 0x160   : > { %882 = vmatpush1.msra.mxu0 %v2509_v42  ;;  %953 = vmatpush1.msra.mxu1 %v2510_v44 }
 0x161   : > { %883 = vmatprep.subr.mxu0 %v2511_v46  ;;  %954 = vmatprep.subr.mxu1 %v2512_v48  ;;  %v1444_v46 = vld [vmem:[%s1754_s13 + $0x30] sm:$0xff] }
 0x162   : > { %884 = vmatpush1.msra.mxu0 %v2513_v50  ;;  %955 = vmatpush1.msra.mxu1 %v2514_v52 }
 0x163   : > { %885 = vmatprep.subr.mxu0 %v2515_v54  ;;  %956 = vmatprep.subr.mxu1 %v2516_v56 }
 0x164   : > { %886 = vmatpush1.msra.mxu0 %v2517_v58  ;;  %957 = vmatpush1.msra.mxu1 %v2518_v60 }
 0x165   : > { %887 = vmatprep.subr.mxu0 %v2519_v62  ;;  %958 = vmatprep.subr.mxu1 %v2520_v4 }
 0x166   : > { %888 = vmatpush1.msra.mxu0 %v2521_v7  ;;  %921 = vmatprep.mubr.f32.mxu0 %v2522_v9 }
 0x167   : > { %959 = vmatpush1.msra.mxu1 %v2523_v11  ;;  %992 = vmatprep.mubr.f32.mxu1 %v2522_v9 }
 0x168   : > { %1098 = vmatprep.subr.mxu0 %v2524_v12  ;;  %1169 = vmatprep.subr.mxu1 %v2525_v8 }
 0x207   : > { %v682_v10 = vpop.f32.mrf.mxu0  ;;  %v753_v18 = vpop.f32.mrf.mxu1 }
 0x208   : > { %v758_v16 = vadd.f32 %v1442_v6, %v682_v10  ;;  %v760_v58 = vadd.f32 %v1444_v46, %v753_v18 }
 0x209   : > { %v684_v13 = vpop.f32.mrf.mxu0  ;;  %v755_v38 = vpop.f32.mrf.mxu1 }
 0x20a   : > { %v1446_v17 = vmul.f32 -1.442695, %v758_v16  ;;  %v759_v14 = vadd.f32 %v1443_v15, %v684_v13  ;;  %v761_v42 = vadd.f32 %v1445_v0, %v755_v38 }
 0x20c   : > { %1538 = vpow2.f32 %v1446_v17  ;;  %v1447_v22 = vmul.f32 -1.442695, %v759_v14  ;;  %v1448_v50 = vmul.f32 -1.442695, %v761_v42 }
 0x20e   : > { %1540 = vpow2.f32 %v1447_v22 }
 0x20f   : > { %1542 = vpow2.f32 %v1448_v50 }
 0x219   : > { %v1539_v54 = vpop.eup %1538 }
 0x21a   : > { %v765_v62 = vadd.f32 1.0, %v1539_v54 }
 0x21b   : > { %v1541_v7 = vpop.eup %1540 }
 0x21c   : > { %1544 = vrcp.f32 %v765_v62  ;;  %v771_v12 = vadd.f32 1.0, %v1541_v7  ;;  %v1543_v8 = vpop.eup %1542  ;;  %v1458_v62 = vld [vmem:[%s1754_s13 + $0x60] sm:$0xff] }
 0x21d   : > { %1546 = vtanh.f32 %v760_v58  ;;  %v778_v16 = vadd.f32 1.0, %v1543_v8 }
 0x21e   : > { %1548 = vrcp.f32 %v771_v12  ;;  %v1459_v12 = vld [vmem:[%s1754_s13 + $0x68] sm:$0xff] }
 0x21f   : > { %1550 = vrcp.f32 %v778_v16 }
 0x229   : > { %v1545_v6 = vpop.eup %1544 }
 0x22a   : > { %v1547_v10 = vpop.eup %1546 }
 0x22b   : > { %v1549_v15 = vpop.eup %1548  ;;  %v782_v13 = vmul.f32 %v1547_v10, %v1545_v6 }
 0x22c   : > { %v781_v17 = vmul.f32 %v1549_v15, %v2221_v2  ;;  %v1551_v18 = vpop.eup %1550 }
 0x22e   : > { %v2296_v14 = vadd.f32 %v782_v13, %v781_v17  ;;  %v1461_v17 = vld [vmem:[%s1754_s13 + $0x78] sm:$0xff] }
 0x230   : > { %1552 = vtanh.f32 %v2296_v14 }
 0x23d   : > { %v1553_v22 = vpop.eup %1552 }
 0x23e   : > { %v785_v0 = vmul.f32 %v1553_v22, %v1551_v18  ;;  %v1460_v22 = vld [vmem:[%s1754_s13 + $0x70] sm:$0xff] }
 0x240   : > { %1449 = vst [vmem:[%s1752_s12 + $0x8] sm:$0xff] %v785_v0  ;;  %922 = vmatmul.mubr.f32.vlgmr.msra.gmra.mxu0 %v785_v0  ;;  %993 = vmatmul.mubr.f32.vlgmr.msra.gmra.mxu1 %v785_v0 }
 0x241   : > { %1099 = vmatpush1.msra.mxu0 %v1771_v19  ;;  %1170 = vmatpush1.msra.mxu1 %v1825_v29  ;;  %v1071_v19 = vld [vmem:[%s2450_s2 + $0x128] sm:$0xff] }
 0x242   : > { %1100 = vmatprep.subr.mxu0 %v1776_v20  ;;  %1171 = vmatprep.subr.mxu1 %v1837_v31  ;;  %v1070_v20 = vld [vmem:[%s2450_s2 + $0x120] sm:$0xff]  ;;  %v1055_v29 = vld [vmem:[%s2450_s2 + $0xa8] sm:$0xff] }
 0x243   : > { %1101 = vmatpush1.msra.mxu0 %v1782_v21  ;;  %1172 = vmatpush1.msra.mxu1 %v1842_v32  ;;  %v1067_v21 = vld [vmem:[%s2450_s2 + $0x108] sm:$0xff]  ;;  %v1050_v32 = vld [vmem:[%s2450_s2 + $0x80] sm:$0xff] }
 0x244   : > { %1102 = vmatprep.subr.mxu0 %v1789_v23  ;;  %1173 = vmatprep.subr.mxu1 %v1854_v34  ;;  %v1066_v23 = vld [vmem:[%s2450_s2 + $0x100] sm:$0xff]  ;;  %v1051_v31 = vld [vmem:[%s2450_s2 + $0x88] sm:$0xff] }
 0x245   : > { %1103 = vmatpush1.msra.mxu0 %v1796_v24  ;;  %1174 = vmatpush1.msra.mxu1 %v1866_v36  ;;  %v1063_v24 = vld [vmem:[%s2450_s2 + $0xe8] sm:$0xff]  ;;  %v1046_v34 = vld [vmem:[%s2450_s2 + $0x60] sm:$0xff] }
 0x246   : > { %1104 = vmatprep.subr.mxu0 %v1802_v25  ;;  %1175 = vmatprep.subr.mxu1 %v1871_v37  ;;  %v1062_v25 = vld [vmem:[%s2450_s2 + $0xe0] sm:$0xff]  ;;  %v1039_v37 = vld [vmem:[%s2450_s2 + $0x28] sm:$0xff] }
 0x247   : > { %1105 = vmatpush1.msra.mxu0 %v1808_v26  ;;  %1176 = vmatpush1.msra.mxu1 %v1883_v39  ;;  %v1059_v26 = vld [vmem:[%s2450_s2 + $0xc8] sm:$0xff]  ;;  %v1042_v36 = vld [vmem:[%s2450_s2 + $0x40] sm:$0xff] }
 0x248   : > { %1106 = vmatprep.subr.mxu0 %v1819_v28  ;;  %1177 = vmatprep.subr.mxu1 %v1895_v41  ;;  %v1058_v28 = vld [vmem:[%s2450_s2 + $0xc0] sm:$0xff]  ;;  %v1035_v41 = vld [vmem:[%s2450_s2 + $0x8] sm:$0xff] }
 0x249   : > { %1107 = vmatpush1.msra.mxu0 %v1831_v30  ;;  %1178 = vmatpush1.msra.mxu1 %v1907_v43  ;;  %v1054_v30 = vld [vmem:[%s2450_s2 + $0xa0] sm:$0xff] }
 0x24a   : > { %1108 = vmatprep.subr.mxu0 %v1848_v33  ;;  %1179 = vmatprep.subr.mxu1 %v1919_v45  ;;  %v1047_v33 = vld [vmem:[%s2450_s2 + $0x68] sm:$0xff]  ;;  %v1038_v39 = vld [vmem:[%s2450_s2 + $0x20] sm:$0xff]  ;;  %v1450_v45 = vld [vmem:[%s1754_s13 + $0x40] sm:$0xff] }
 0x24b   : > { %1109 = vmatpush1.msra.mxu0 %v1860_v35  ;;  %1180 = vmatpush1.msra.mxu1 %v1931_v47  ;;  %v1043_v35 = vld [vmem:[%s2450_s2 + $0x48] sm:$0xff]  ;;  %v1034_v43 = vld [vmem:[%s2450_s2] sm:$0xff] }
 0x24c   : > { %1181 = vmatprep.subr.mxu1 %v1943_v49  ;;  %1162 = vmatprep.mubr.f32.mxu0 %v2522_v9  ;;  %v1451_v49 = vld [vmem:[%s1754_s13 + $0x48] sm:$0xff] }
 0x24d   : > { %1182 = vmatpush1.msra.mxu1 %v1955_v51  ;;  %1233 = vmatprep.mubr.f32.mxu1 %v2522_v9 }
 0x24e   : > { %1183 = vmatprep.subr.mxu1 %v1967_v53  ;;  %1110 = vmatprep.subr.mxu0 %v1071_v19 }
 0x24f   : > { %1184 = vmatpush1.msra.mxu1 %v1979_v55  ;;  %1111 = vmatpush1.msra.mxu0 %v1070_v20 }
 0x250   : > { %1185 = vmatprep.subr.mxu1 %v1991_v57  ;;  %1112 = vmatprep.subr.mxu0 %v1067_v21 }
 0x251   : > { %1186 = vmatpush1.msra.mxu1 %v2003_v59  ;;  %1113 = vmatpush1.msra.mxu0 %v1066_v23 }
 0x252   : > { %1187 = vmatprep.subr.mxu1 %v2015_v61  ;;  %1114 = vmatprep.subr.mxu0 %v1063_v24 }
 0x253   : > { %1188 = vmatpush1.msra.mxu1 %v2027_v63  ;;  %1115 = vmatpush1.msra.mxu0 %v1062_v25  ;;  %v1453_v63 = vld [vmem:[%s1754_s13 + $0x58] sm:$0xff] }
 0x254   : > { %1189 = vmatprep.subr.mxu1 %v2039_v1  ;;  %1116 = vmatprep.subr.mxu0 %v1059_v26 }
 0x255   : > { %1190 = vmatpush1.msra.mxu1 %v2051_v3  ;;  %1117 = vmatpush1.msra.mxu0 %v1058_v28 }
 0x256   : > { %1191 = vmatprep.subr.mxu1 %v2063_v5  ;;  %1118 = vmatprep.subr.mxu0 %v1055_v29  ;;  %v1452_v5 = vld [vmem:[%s1754_s13 + $0x50] sm:$0xff] }
 0x257   : > { %1192 = vmatpush1.msra.mxu1 %v2506_v27  ;;  %1119 = vmatpush1.msra.mxu0 %v1054_v30 }
 0x258   : > { %1193 = vmatprep.subr.mxu1 %v2508_v40  ;;  %1120 = vmatprep.subr.mxu0 %v1051_v31 }
 0x259   : > { %1194 = vmatpush1.msra.mxu1 %v2510_v44  ;;  %1121 = vmatpush1.msra.mxu0 %v1050_v32 }
 0x25a   : > { %1195 = vmatprep.subr.mxu1 %v2512_v48  ;;  %1122 = vmatprep.subr.mxu0 %v1047_v33 }
 0x25b   : > { %1196 = vmatpush1.msra.mxu1 %v2514_v52  ;;  %1123 = vmatpush1.msra.mxu0 %v1046_v34 }
 0x25c   : > { %1197 = vmatprep.subr.mxu1 %v2516_v56  ;;  %1124 = vmatprep.subr.mxu0 %v1043_v35 }
 0x25d   : > { %1198 = vmatpush1.msra.mxu1 %v2518_v60  ;;  %1125 = vmatpush1.msra.mxu0 %v1042_v36 }
 0x25e   : > { %1199 = vmatprep.subr.mxu1 %v2520_v4  ;;  %1126 = vmatprep.subr.mxu0 %v1039_v37 }
 0x25f   : > { %1200 = vmatpush1.msra.mxu1 %v2523_v11  ;;  %1127 = vmatpush1.msra.mxu0 %v1038_v39 }
 0x260   : > { %1128 = vmatprep.subr.mxu0 %v1035_v41 }
 0x261   : > { %1129 = vmatpush1.msra.mxu0 %v1034_v43 }
 0x300   : > { %v923_v47 = vpop.f32.mrf.mxu0  ;;  %v994_v59 = vpop.f32.mrf.mxu1 }
 0x301   : > { %v999_v51 = vadd.f32 %v1450_v45, %v923_v47  ;;  %v1001_v40 = vadd.f32 %v1452_v5, %v994_v59 }
 0x302   : > { %v925_v53 = vpop.f32.mrf.mxu0  ;;  %v996_v1 = vpop.f32.mrf.mxu1 }
 0x303   : > { %v1454_v55 = vmul.f32 -1.442695, %v999_v51  ;;  %v1000_v57 = vadd.f32 %v1451_v49, %v925_v53  ;;  %v1002_v3 = vadd.f32 %v1453_v63, %v996_v1 }
 0x305   : > { %1554 = vpow2.f32 %v1454_v55  ;;  %v1455_v61 = vmul.f32 -1.442695, %v1000_v57  ;;  %v1456_v2 = vmul.f32 -1.442695, %v1002_v3 }
 0x307   : > { %1556 = vpow2.f32 %v1455_v61 }
 0x308   : > { %1558 = vpow2.f32 %v1456_v2 }
 0x312   : > { %v1555_v27 = vpop.eup %1554 }
 0x313   : > { %v1006_v44 = vadd.f32 1.0, %v1555_v27 }
 0x314   : > { %v1557_v48 = vpop.eup %1556 }
 0x315   : > { %1560 = vrcp.f32 %v1006_v44  ;;  %v1012_v52 = vadd.f32 1.0, %v1557_v48  ;;  %v1559_v56 = vpop.eup %1558 }
 0x316   : > { %1562 = vtanh.f32 %v1001_v40  ;;  %v1019_v11 = vadd.f32 1.0, %v1559_v56 }
 0x317   : > { %1564 = vrcp.f32 %v1012_v52 }
 0x318   : > { %1566 = vrcp.f32 %v1019_v11 }
 0x322   : > { %v1561_v60 = vpop.eup %1560 }
 0x323   : > { %v1563_v4 = vpop.eup %1562 }
 0x324   : > { %v1565_v9 = vpop.eup %1564  ;;  %v1023_v38 = vmul.f32 %v1563_v4, %v1561_v60 }
 0x325   : > { %v1022_v42 = vmul.f32 %v1565_v9, %v2296_v14  ;;  %v1567_v50 = vpop.eup %1566 }
 0x327   : > { %v1024_v46 = vadd.f32 %v1023_v38, %v1022_v42 }
 0x329   : > { %1568 = vtanh.f32 %v1024_v46 }
 0x336   : > { %v1569_v54 = vpop.eup %1568 }
 0x337   : > { %v1026_v58 = vmul.f32 %v1569_v54, %v1567_v50 }
 0x339   : > { %1457 = vst [vmem:[%s1752_s12 + $0x10] sm:$0xff] %v1026_v58  ;;  %1163 = vmatmul.mubr.f32.vlgmr.msra.gmra.mxu0 %v1026_v58  ;;  %1234 = vmatmul.mubr.f32.vlgmr.msra.gmra.mxu1 %v1026_v58 }
 0x3f9   : > { %v1164_v7 = vpop.f32.mrf.mxu0  ;;  %v1235_v16 = vpop.f32.mrf.mxu1 }
 0x3fa   : > { %v1240_v8 = vadd.f32 %v1458_v62, %v1164_v7  ;;  %v1242_v20 = vadd.f32 %v1460_v22, %v1235_v16 }
 0x3fb   : > { %v1166_v6 = vpop.f32.mrf.mxu0  ;;  %v1237_v14 = vpop.f32.mrf.mxu1 }
 0x3fc   : > { %v1462_v10 = vmul.f32 -1.442695, %v1240_v8  ;;  %v1241_v15 = vadd.f32 %v1459_v12, %v1166_v6  ;;  %v1243_v18 = vadd.f32 %v1461_v17, %v1237_v14 }
 0x3fe   : > { %1570 = vpow2.f32 %v1462_v10  ;;  %v1463_v13 = vmul.f32 -1.442695, %v1241_v15  ;;  %v1464_v0 = vmul.f32 -1.442695, %v1243_v18 }
 0x400   : > { %1572 = vpow2.f32 %v1463_v13 }
 0x401   : > { %1574 = vpow2.f32 %v1464_v0 }
 0x40b   : > { %v1571_v19 = vpop.eup %1570 }
 0x40c   : > { %v1247_v21 = vadd.f32 1.0, %v1571_v19 }
 0x40d   : > { %v1573_v23 = vpop.eup %1572 }
 0x40e   : > { %1576 = vrcp.f32 %v1247_v21  ;;  %v1253_v24 = vadd.f32 1.0, %v1573_v23  ;;  %v1575_v25 = vpop.eup %1574 }
 0x40f   : > { %1578 = vtanh.f32 %v1242_v20  ;;  %v1260_v30 = vadd.f32 1.0, %v1575_v25 }
 0x410   : > { %1580 = vrcp.f32 %v1253_v24 }
 0x411   : > { %1582 = vrcp.f32 %v1260_v30 }
 0x41b   : > { %v1577_v26 = vpop.eup %1576 }
 0x41c   : > { %v1579_v28 = vpop.eup %1578 }
 0x41d   : > { %v1581_v29 = vpop.eup %1580  ;;  %v1264_v31 = vmul.f32 %v1579_v28, %v1577_v26 }
 0x41e   : > { %v1263_v32 = vmul.f32 %v1581_v29, %v1024_v46  ;;  %v1583_v34 = vpop.eup %1582 }
 0x420   : > { %v1265_v33 = vadd.f32 %v1264_v31, %v1263_v32 }
 0x422   : > { %1584 = vtanh.f32 %v1265_v33  ;;  %1271 = vst [vmem:[#allocation3] sm:$0xff] %v1265_v33 }
 0x42e   : > { %1275 = sbr.rel (%p1466_p11) target bundleno = 1076 (0x434), region = 63 }
 0x42f   : > { %v1585_v35 = vpop.eup %1584 }
 0x430   : > { %v1267_v36 = vmul.f32 %v1585_v35, %v1583_v34 }
 0x432   : > { %1465 = vst [vmem:[%s1752_s12 + $0x18] sm:$0xff] %v1267_v36  ;;  %1270 = vst [vmem:[#allocation2] sm:$0xff] %v1267_v36 }
 0x433   : > { %1276 = vst [vmem:[#allocation5] sm:$0xff] %v1267_v36  ;;  %1278 = vst [vmem:[#allocation5 + $0x8] sm:$0xff] %v1265_v33 }
 0x434 PF: > { %p2418_p12 = scmp.eq.s32.totalorder %s1409_s20, 1  ;;  %s1655_s15 = smov [#allocation5]  }
 0x435   : > { %s1299_s23 = sshll.u32 %s1655_s15, 4  ;;  %s1300_s23 = int_to_ptr.vmem [resolvable:$true] %s1299_s23 }
 0x436   : > { %s1586_s25 = scalar_lea.vmem %s1300_s23, 256  ;;  %p1593_p2 = scmp.lt.s32.totalorder %s1300_s23, %s1300_s23 }
 0x437   : > { %p1587_p13 = scmp.ne.s32.totalorder %s1300_s23, %s1586_s25  ;;  %p1594_p3 = scmp.lt.s32.totalorder %s1586_s25, %s1586_s25 }
 0x439   : > { %p1588_p0 = pnand %p1587_p13, %p2418_p12  ;;  %p1595_p4 = por %p1594_p3, %p1593_p2 }
 0x43b   : > { %p1589_p1 = pneg %p1588_p0 }
 0x43d   : > { %p1596_p5 = pnand %p1595_p4, %p1589_p1 }
 0x43f   : > { %1599 = shalt.err (!%p1596_p5)
}
 0x440   : > { %s1656_s17 = smov 128   ;;  %s1657_s20 = smov 8  }
 0x441   : > { %1473 = dma.vmem_to_hbm [thread:$0]  (%p2418_p12), %s1300_s23, 256, %s2452_s4, [#allocation6], %s1656_s17, %s1656_s17, %s1657_s20  }
 0x442   : > { %1631 = dma.done.wait (%p2418_p12), [#allocation6], 256  }
 0x443   : > { %1633 = vsyncadd (%p2418_p12), [#allocation6], 4294967040 }
 0x444 PF: > { %s16_s19 = sadd.s32 1, %s1652_s19   ;;  %s2527_s15 = smov %s1640_s16 }
 0x445   : > { %p13_p6 = scmp.ge.s32.totalorder %s16_s19, 4   ;;  %s2528_s16 = smov %s1719_s24 }
 0x446   : > { %s2529_s17 = smov %s1648_s18  ;;  %s2530_s18 = smov %s2532_s21 }
 0x447   :  { %15 = sbr.rel (!%p13_p6) target bundleno = 3 (0x3), region = 119 }
 0x44c   :  { %1326 = vsyncpa [#allocation6], 1 }
 0x44d   :  { %1328 = vsyncpa [#allocation6 + $0x1], 1 }

// kernel: seq2seq_forward.4
= control target key start
LH: loop header
LB: loop body
LE: loop exit
PB: predicated region body
PF: predicated region fallthrough
CT: control target
= control target key end

     0   :  { %8 = vsyncpa [#allocation4], 0  ;;  %s1279_s12 = smov [#allocation3]   ;;  %s1738_s0 = inlined_call_operand.vmem [shape: f32[64,256], index: 0, kind: input, shape index: {}]   ;;  %s1739_s1 = inlined_call_operand.hbm [shape: f32[256,1024], index: 1, kind: input, shape index: {}]   ;;  %s1740_s2 = inlined_call_operand.vmem [shape: f32[1,1024], index: 2, kind: input, shape index: {}]   ;;  %s1741_s3 = inlined_call_operand.vmem [shape: f32[64,1024], index: 3, kind: output, shape index: {}]  }
   0x1   :  { %s16_s13 = sshll.u32 %s1279_s12, 4  ;;  %s17_s13 = int_to_ptr.vmem [resolvable:$true] %s16_s13 }
   0x2   :  { %s1265_s14 = scalar_lea.vmem %s17_s13, 32768  ;;  %p1270_p1 = scmp.lt.s32.totalorder %s17_s13, %s17_s13 }
   0x3   :  { %p1266_p0 = scmp.ne.s32.totalorder %s17_s13, %s1265_s14  ;;  %p1271_p2 = scmp.lt.s32.totalorder %s1265_s14, %s1265_s14 }
   0x5   :  { %p1272_p3 = por %p1271_p2, %p1270_p1 }
   0x7   :  { %p1273_p4 = pnand %p1272_p3, %p1266_p0 }
   0x9   :  { %1276 = shalt.err (!%p1273_p4)
}
   0xa   :  { %s1280_s15 = smov 1024   ;;  %s1281_s16 = smov 64  }
   0xb   :  { %22 = dma.hbm_to_vmem [thread:$0]  %s1739_s1, 32768, %s17_s13, [#allocation4], %s1280_s15, %s1280_s15, %s1281_s16  }
   0xc   :  { %1277 = dma.done.wait [#allocation4], 32768  }
   0xd   :  { %1278 = vsyncadd [#allocation4], 4294934528  ;;  %v297_v0 = vld [vmem:[#allocation3 + $0x3c8] sm:$0xff]  ;;  %v299_v1 = vld [vmem:[#allocation3 + $0x3d8] sm:$0xff] }
   0xe   :  { %v296_v2 = vld [vmem:[#allocation3 + $0x3c0] sm:$0xff]  ;;  %432 = vmatprep.subr.mxu0 %v297_v0  ;;  %545 = vmatprep.subr.mxu1 %v299_v1  ;;  %v298_v3 = vld [vmem:[#allocation3 + $0x3d0] sm:$0xff]  ;;  %v289_v4 = vld [vmem:[#allocation3 + $0x388] sm:$0xff] }
   0xf   :  { %v291_v5 = vld [vmem:[#allocation3 + $0x398] sm:$0xff]  ;;  %433 = vmatpush1.msra.mxu0 %v296_v2  ;;  %546 = vmatpush1.msra.mxu1 %v298_v3  ;;  %v288_v6 = vld [vmem:[#allocation3 + $0x380] sm:$0xff]  ;;  %v290_v7 = vld [vmem:[#allocation3 + $0x390] sm:$0xff] }
  0x10   :  { %v281_v8 = vld [vmem:[#allocation3 + $0x348] sm:$0xff]  ;;  %434 = vmatprep.subr.mxu0 %v289_v4  ;;  %547 = vmatprep.subr.mxu1 %v291_v5  ;;  %v283_v9 = vld [vmem:[#allocation3 + $0x358] sm:$0xff]  ;;  %v280_v10 = vld [vmem:[#allocation3 + $0x340] sm:$0xff] }
  0x11   :  { %v282_v11 = vld [vmem:[#allocation3 + $0x350] sm:$0xff]  ;;  %435 = vmatpush1.msra.mxu0 %v288_v6  ;;  %548 = vmatpush1.msra.mxu1 %v290_v7  ;;  %v273_v12 = vld [vmem:[#allocation3 + $0x308] sm:$0xff]  ;;  %v275_v13 = vld [vmem:[#allocation3 + $0x318] sm:$0xff] }
  0x12   :  { %436 = vmatprep.subr.mxu0 %v281_v8  ;;  %549 = vmatprep.subr.mxu1 %v283_v9  ;;  %v272_v14 = vld [vmem:[#allocation3 + $0x300] sm:$0xff]  ;;  %v274_v15 = vld [vmem:[#allocation3 + $0x310] sm:$0xff]  ;;  %v265_v16 = vld [vmem:[#allocation3 + $0x2c8] sm:$0xff] }
  0x13   :  { %437 = vmatpush1.msra.mxu0 %v280_v10  ;;  %550 = vmatpush1.msra.mxu1 %v282_v11  ;;  %v267_v17 = vld [vmem:[#allocation3 + $0x2d8] sm:$0xff]  ;;  %v264_v18 = vld [vmem:[#allocation3 + $0x2c0] sm:$0xff]  ;;  %v266_v19 = vld [vmem:[#allocation3 + $0x2d0] sm:$0xff] }
  0x14   :  { %438 = vmatprep.subr.mxu0 %v273_v12  ;;  %551 = vmatprep.subr.mxu1 %v275_v13  ;;  %v257_v20 = vld [vmem:[#allocation3 + $0x288] sm:$0xff]  ;;  %v259_v21 = vld [vmem:[#allocation3 + $0x298] sm:$0xff]  ;;  %v256_v22 = vld [vmem:[#allocation3 + $0x280] sm:$0xff] }
  0x15   :  { %439 = vmatpush1.msra.mxu0 %v272_v14  ;;  %552 = vmatpush1.msra.mxu1 %v274_v15  ;;  %v258_v23 = vld [vmem:[#allocation3 + $0x290] sm:$0xff]  ;;  %v249_v24 = vld [vmem:[#allocation3 + $0x248] sm:$0xff]  ;;  %v251_v25 = vld [vmem:[#allocation3 + $0x258] sm:$0xff] }
  0x16   :  { %440 = vmatprep.subr.mxu0 %v265_v16  ;;  %553 = vmatprep.subr.mxu1 %v267_v17  ;;  %v248_v26 = vld [vmem:[#allocation3 + $0x240] sm:$0xff]  ;;  %v250_v27 = vld [vmem:[#allocation3 + $0x250] sm:$0xff]  ;;  %v241_v28 = vld [vmem:[#allocation3 + $0x208] sm:$0xff] }
  0x17   :  { %441 = vmatpush1.msra.mxu0 %v264_v18  ;;  %554 = vmatpush1.msra.mxu1 %v266_v19  ;;  %v243_v29 = vld [vmem:[#allocation3 + $0x218] sm:$0xff]  ;;  %v240_v30 = vld [vmem:[#allocation3 + $0x200] sm:$0xff]  ;;  %v242_v31 = vld [vmem:[#allocation3 + $0x210] sm:$0xff] }
  0x18   :  { %442 = vmatprep.subr.mxu0 %v257_v20  ;;  %555 = vmatprep.subr.mxu1 %v259_v21  ;;  %v233_v32 = vld [vmem:[#allocation3 + $0x1c8] sm:$0xff]  ;;  %v235_v33 = vld [vmem:[#allocation3 + $0x1d8] sm:$0xff]  ;;  %v232_v34 = vld [vmem:[#allocation3 + $0x1c0] sm:$0xff] }
  0x19   :  { %443 = vmatpush1.msra.mxu0 %v256_v22  ;;  %556 = vmatpush1.msra.mxu1 %v258_v23  ;;  %v234_v35 = vld [vmem:[#allocation3 + $0x1d0] sm:$0xff]  ;;  %v225_v36 = vld [vmem:[#allocation3 + $0x188] sm:$0xff]  ;;  %v227_v37 = vld [vmem:[#allocation3 + $0x198] sm:$0xff] }
  0x1a   :  { %444 = vmatprep.subr.mxu0 %v249_v24  ;;  %557 = vmatprep.subr.mxu1 %v251_v25  ;;  %v224_v38 = vld [vmem:[#allocation3 + $0x180] sm:$0xff]  ;;  %v226_v39 = vld [vmem:[#allocation3 + $0x190] sm:$0xff]  ;;  %v217_v40 = vld [vmem:[#allocation3 + $0x148] sm:$0xff] }
  0x1b   :  { %445 = vmatpush1.msra.mxu0 %v248_v26  ;;  %558 = vmatpush1.msra.mxu1 %v250_v27  ;;  %v219_v41 = vld [vmem:[#allocation3 + $0x158] sm:$0xff]  ;;  %v216_v42 = vld [vmem:[#allocation3 + $0x140] sm:$0xff]  ;;  %v218_v43 = vld [vmem:[#allocation3 + $0x150] sm:$0xff] }
  0x1c   :  { %446 = vmatprep.subr.mxu0 %v241_v28  ;;  %559 = vmatprep.subr.mxu1 %v243_v29  ;;  %v209_v44 = vld [vmem:[#allocation3 + $0x108] sm:$0xff]  ;;  %v211_v45 = vld [vmem:[#allocation3 + $0x118] sm:$0xff]  ;;  %v208_v46 = vld [vmem:[#allocation3 + $0x100] sm:$0xff] }
  0x1d   :  { %447 = vmatpush1.msra.mxu0 %v240_v30  ;;  %560 = vmatpush1.msra.mxu1 %v242_v31  ;;  %v210_v47 = vld [vmem:[#allocation3 + $0x110] sm:$0xff]  ;;  %v201_v48 = vld [vmem:[#allocation3 + $0xc8] sm:$0xff]  ;;  %v203_v49 = vld [vmem:[#allocation3 + $0xd8] sm:$0xff] }
  0x1e   :  { %448 = vmatprep.subr.mxu0 %v233_v32  ;;  %561 = vmatprep.subr.mxu1 %v235_v33  ;;  %v200_v50 = vld [vmem:[#allocation3 + $0xc0] sm:$0xff]  ;;  %v202_v51 = vld [vmem:[#allocation3 + $0xd0] sm:$0xff]  ;;  %v193_v52 = vld [vmem:[#allocation3 + $0x88] sm:$0xff] }
  0x1f   :  { %449 = vmatpush1.msra.mxu0 %v232_v34  ;;  %562 = vmatpush1.msra.mxu1 %v234_v35  ;;  %v195_v53 = vld [vmem:[#allocation3 + $0x98] sm:$0xff]  ;;  %v192_v54 = vld [vmem:[#allocation3 + $0x80] sm:$0xff]  ;;  %v194_v55 = vld [vmem:[#allocation3 + $0x90] sm:$0xff] }
  0x20   :  { %450 = vmatprep.subr.mxu0 %v225_v36  ;;  %563 = vmatprep.subr.mxu1 %v227_v37  ;;  %v185_v56 = vld [vmem:[#allocation3 + $0x48] sm:$0xff]  ;;  %v187_v57 = vld [vmem:[#allocation3 + $0x58] sm:$0xff]  ;;  %v184_v58 = vld [vmem:[#allocation3 + $0x40] sm:$0xff] }
  0x21   :  { %451 = vmatpush1.msra.mxu0 %v224_v38  ;;  %564 = vmatpush1.msra.mxu1 %v226_v39  ;;  %v186_v59 = vld [vmem:[#allocation3 + $0x50] sm:$0xff]  ;;  %v177_v60 = vld [vmem:[#allocation3 + $0x8] sm:$0xff]  ;;  %v179_v61 = vld [vmem:[#allocation3 + $0x18] sm:$0xff] }
  0x22   :  { %452 = vmatprep.subr.mxu0 %v217_v40  ;;  %565 = vmatprep.subr.mxu1 %v219_v41  ;;  %v176_v62 = vld [vmem:[#allocation3] sm:$0xff]  ;;  %v178_v63 = vld [vmem:[#allocation3 + $0x10] sm:$0xff]  ;;  %v425_v0 = vld [vmem:[#allocation3 + $0x7c8] sm:$0xff] }
  0x23   :  { %453 = vmatpush1.msra.mxu0 %v216_v42  ;;  %566 = vmatpush1.msra.mxu1 %v218_v43  ;;  %v427_v1 = vld [vmem:[#allocation3 + $0x7d8] sm:$0xff]  ;;  %v424_v2 = vld [vmem:[#allocation3 + $0x7c0] sm:$0xff]  ;;  %v426_v3 = vld [vmem:[#allocation3 + $0x7d0] sm:$0xff] }
  0x24   :  { %454 = vmatprep.subr.mxu0 %v209_v44  ;;  %567 = vmatprep.subr.mxu1 %v211_v45  ;;  %v417_v4 = vld [vmem:[#allocation3 + $0x788] sm:$0xff]  ;;  %v419_v5 = vld [vmem:[#allocation3 + $0x798] sm:$0xff]  ;;  %v416_v6 = vld [vmem:[#allocation3 + $0x780] sm:$0xff] }
  0x25   :  { %455 = vmatpush1.msra.mxu0 %v208_v46  ;;  %568 = vmatpush1.msra.mxu1 %v210_v47  ;;  %v418_v7 = vld [vmem:[#allocation3 + $0x790] sm:$0xff]  ;;  %v409_v8 = vld [vmem:[#allocation3 + $0x748] sm:$0xff]  ;;  %v411_v9 = vld [vmem:[#allocation3 + $0x758] sm:$0xff] }
  0x26   :  { %456 = vmatprep.subr.mxu0 %v201_v48  ;;  %569 = vmatprep.subr.mxu1 %v203_v49  ;;  %v408_v10 = vld [vmem:[#allocation3 + $0x740] sm:$0xff]  ;;  %v410_v11 = vld [vmem:[#allocation3 + $0x750] sm:$0xff]  ;;  %v401_v12 = vld [vmem:[#allocation3 + $0x708] sm:$0xff] }
  0x27   :  { %457 = vmatpush1.msra.mxu0 %v200_v50  ;;  %570 = vmatpush1.msra.mxu1 %v202_v51  ;;  %v403_v13 = vld [vmem:[#allocation3 + $0x718] sm:$0xff]  ;;  %v400_v14 = vld [vmem:[#allocation3 + $0x700] sm:$0xff]  ;;  %v402_v15 = vld [vmem:[#allocation3 + $0x710] sm:$0xff] }
  0x28   :  { %458 = vmatprep.subr.mxu0 %v193_v52  ;;  %571 = vmatprep.subr.mxu1 %v195_v53  ;;  %v393_v16 = vld [vmem:[#allocation3 + $0x6c8] sm:$0xff]  ;;  %v395_v17 = vld [vmem:[#allocation3 + $0x6d8] sm:$0xff]  ;;  %v392_v18 = vld [vmem:[#allocation3 + $0x6c0] sm:$0xff] }
  0x29   :  { %459 = vmatpush1.msra.mxu0 %v192_v54  ;;  %572 = vmatpush1.msra.mxu1 %v194_v55  ;;  %v394_v19 = vld [vmem:[#allocation3 + $0x6d0] sm:$0xff]  ;;  %v385_v20 = vld [vmem:[#allocation3 + $0x688] sm:$0xff]  ;;  %v387_v21 = vld [vmem:[#allocation3 + $0x698] sm:$0xff] }
  0x2a   :  { %460 = vmatprep.subr.mxu0 %v185_v56  ;;  %573 = vmatprep.subr.mxu1 %v187_v57  ;;  %v384_v22 = vld [vmem:[#allocation3 + $0x680] sm:$0xff]  ;;  %v386_v23 = vld [vmem:[#allocation3 + $0x690] sm:$0xff]  ;;  %v377_v24 = vld [vmem:[#allocation3 + $0x648] sm:$0xff] }
  0x2b   :  { %461 = vmatpush1.msra.mxu0 %v184_v58  ;;  %574 = vmatpush1.msra.mxu1 %v186_v59  ;;  %v379_v25 = vld [vmem:[#allocation3 + $0x658] sm:$0xff]  ;;  %v376_v26 = vld [vmem:[#allocation3 + $0x640] sm:$0xff]  ;;  %v378_v27 = vld [vmem:[#allocation3 + $0x650] sm:$0xff] }
  0x2c   :  { %462 = vmatprep.subr.mxu0 %v177_v60  ;;  %575 = vmatprep.subr.mxu1 %v179_v61  ;;  %v369_v28 = vld [vmem:[#allocation3 + $0x608] sm:$0xff]  ;;  %v371_v29 = vld [vmem:[#allocation3 + $0x618] sm:$0xff]  ;;  %v368_v30 = vld [vmem:[#allocation3 + $0x600] sm:$0xff] }
  0x2d   :  { %463 = vmatpush1.msra.mxu0 %v176_v62  ;;  %576 = vmatpush1.msra.mxu1 %v178_v63  ;;  %v370_v31 = vld [vmem:[#allocation3 + $0x610] sm:$0xff]  ;;  %v361_v32 = vld [vmem:[#allocation3 + $0x5c8] sm:$0xff]  ;;  %v363_v33 = vld [vmem:[#allocation3 + $0x5d8] sm:$0xff] }
  0x2e   :  { %464 = vmatprep.subr.mxu0 %v425_v0  ;;  %577 = vmatprep.subr.mxu1 %v427_v1  ;;  %v360_v34 = vld [vmem:[#allocation3 + $0x5c0] sm:$0xff]  ;;  %v362_v35 = vld [vmem:[#allocation3 + $0x5d0] sm:$0xff]  ;;  %v353_v36 = vld [vmem:[#allocation3 + $0x588] sm:$0xff] }
  0x2f   :  { %465 = vmatpush2.msra.mxu0 %v424_v2  ;;  %578 = vmatpush2.msra.mxu1 %v426_v3  ;;  %v355_v37 = vld [vmem:[#allocation3 + $0x598] sm:$0xff]  ;;  %v352_v38 = vld [vmem:[#allocation3 + $0x580] sm:$0xff]  ;;  %v354_v39 = vld [vmem:[#allocation3 + $0x590] sm:$0xff] }
  0x30   :  { %466 = vmatprep.subr.mxu0 %v417_v4  ;;  %579 = vmatprep.subr.mxu1 %v419_v5  ;;  %v345_v40 = vld [vmem:[#allocation3 + $0x548] sm:$0xff]  ;;  %v347_v41 = vld [vmem:[#allocation3 + $0x558] sm:$0xff]  ;;  %v344_v42 = vld [vmem:[#allocation3 + $0x540] sm:$0xff] }
  0x31   :  { %467 = vmatpush2.msra.mxu0 %v416_v6  ;;  %580 = vmatpush2.msra.mxu1 %v418_v7  ;;  %v346_v43 = vld [vmem:[#allocation3 + $0x550] sm:$0xff]  ;;  %v337_v44 = vld [vmem:[#allocation3 + $0x508] sm:$0xff]  ;;  %v339_v45 = vld [vmem:[#allocation3 + $0x518] sm:$0xff] }
  0x32   :  { %468 = vmatprep.subr.mxu0 %v409_v8  ;;  %581 = vmatprep.subr.mxu1 %v411_v9  ;;  %v336_v46 = vld [vmem:[#allocation3 + $0x500] sm:$0xff]  ;;  %v338_v47 = vld [vmem:[#allocation3 + $0x510] sm:$0xff]  ;;  %v329_v48 = vld [vmem:[#allocation3 + $0x4c8] sm:$0xff] }
  0x33   :  { %469 = vmatpush2.msra.mxu0 %v408_v10  ;;  %582 = vmatpush2.msra.mxu1 %v410_v11  ;;  %v331_v49 = vld [vmem:[#allocation3 + $0x4d8] sm:$0xff]  ;;  %v328_v50 = vld [vmem:[#allocation3 + $0x4c0] sm:$0xff]  ;;  %v330_v51 = vld [vmem:[#allocation3 + $0x4d0] sm:$0xff] }
  0x34   :  { %470 = vmatprep.subr.mxu0 %v401_v12  ;;  %583 = vmatprep.subr.mxu1 %v403_v13  ;;  %v321_v52 = vld [vmem:[#allocation3 + $0x488] sm:$0xff]  ;;  %v323_v53 = vld [vmem:[#allocation3 + $0x498] sm:$0xff]  ;;  %v320_v54 = vld [vmem:[#allocation3 + $0x480] sm:$0xff] }
  0x35   :  { %471 = vmatpush2.msra.mxu0 %v400_v14  ;;  %584 = vmatpush2.msra.mxu1 %v402_v15  ;;  %v322_v55 = vld [vmem:[#allocation3 + $0x490] sm:$0xff]  ;;  %v313_v56 = vld [vmem:[#allocation3 + $0x448] sm:$0xff]  ;;  %v315_v57 = vld [vmem:[#allocation3 + $0x458] sm:$0xff] }
  0x36   :  { %472 = vmatprep.subr.mxu0 %v393_v16  ;;  %585 = vmatprep.subr.mxu1 %v395_v17  ;;  %v312_v58 = vld [vmem:[#allocation3 + $0x440] sm:$0xff]  ;;  %v314_v59 = vld [vmem:[#allocation3 + $0x450] sm:$0xff]  ;;  %v305_v60 = vld [vmem:[#allocation3 + $0x408] sm:$0xff] }
  0x37   :  { %473 = vmatpush2.msra.mxu0 %v392_v18  ;;  %586 = vmatpush2.msra.mxu1 %v394_v19  ;;  %v307_v61 = vld [vmem:[#allocation3 + $0x418] sm:$0xff]  ;;  %v304_v62 = vld [vmem:[#allocation3 + $0x400] sm:$0xff]  ;;  %v1308_v63 = vld [vmem:[%s1738_s0 + $0x8] sm:$0xff] }
  0x38   :  { %474 = vmatprep.subr.mxu0 %v385_v20  ;;  %587 = vmatprep.subr.mxu1 %v387_v21  ;;  %v306_v0 = vld [vmem:[#allocation3 + $0x410] sm:$0xff]  ;;  %v1313_v1 = vld [vmem:[%s1738_s0] sm:$0xff]  ;;  %v301_v2 = vld [vmem:[#allocation3 + $0x3e8] sm:$0xff] }
  0x39   :  { %475 = vmatpush2.msra.mxu0 %v384_v22  ;;  %588 = vmatpush2.msra.mxu1 %v386_v23  ;;  %v303_v3 = vld [vmem:[#allocation3 + $0x3f8] sm:$0xff]  ;;  %v300_v4 = vld [vmem:[#allocation3 + $0x3e0] sm:$0xff]  ;;  %v302_v5 = vld [vmem:[#allocation3 + $0x3f0] sm:$0xff] }
  0x3a   :  { %476 = vmatprep.subr.mxu0 %v377_v24  ;;  %589 = vmatprep.subr.mxu1 %v379_v25  ;;  %v293_v6 = vld [vmem:[#allocation3 + $0x3a8] sm:$0xff]  ;;  %v295_v7 = vld [vmem:[#allocation3 + $0x3b8] sm:$0xff]  ;;  %v292_v8 = vld [vmem:[#allocation3 + $0x3a0] sm:$0xff] }
  0x3b   :  { %477 = vmatpush2.msra.mxu0 %v376_v26  ;;  %590 = vmatpush2.msra.mxu1 %v378_v27  ;;  %v294_v9 = vld [vmem:[#allocation3 + $0x3b0] sm:$0xff]  ;;  %v285_v10 = vld [vmem:[#allocation3 + $0x368] sm:$0xff]  ;;  %v287_v11 = vld [vmem:[#allocation3 + $0x378] sm:$0xff] }
  0x3c   :  { %478 = vmatprep.subr.mxu0 %v369_v28  ;;  %591 = vmatprep.subr.mxu1 %v371_v29  ;;  %v284_v12 = vld [vmem:[#allocation3 + $0x360] sm:$0xff]  ;;  %v286_v13 = vld [vmem:[#allocation3 + $0x370] sm:$0xff]  ;;  %v277_v14 = vld [vmem:[#allocation3 + $0x328] sm:$0xff] }
  0x3d   :  { %479 = vmatpush2.msra.mxu0 %v368_v30  ;;  %592 = vmatpush2.msra.mxu1 %v370_v31  ;;  %v279_v15 = vld [vmem:[#allocation3 + $0x338] sm:$0xff]  ;;  %v276_v16 = vld [vmem:[#allocation3 + $0x320] sm:$0xff]  ;;  %v278_v17 = vld [vmem:[#allocation3 + $0x330] sm:$0xff] }
  0x3e   :  { %480 = vmatprep.subr.mxu0 %v361_v32  ;;  %593 = vmatprep.subr.mxu1 %v363_v33  ;;  %v269_v18 = vld [vmem:[#allocation3 + $0x2e8] sm:$0xff]  ;;  %v271_v19 = vld [vmem:[#allocation3 + $0x2f8] sm:$0xff]  ;;  %v268_v20 = vld [vmem:[#allocation3 + $0x2e0] sm:$0xff] }
  0x3f   :  { %481 = vmatpush2.msra.mxu0 %v360_v34  ;;  %594 = vmatpush2.msra.mxu1 %v362_v35  ;;  %v270_v21 = vld [vmem:[#allocation3 + $0x2f0] sm:$0xff]  ;;  %v261_v22 = vld [vmem:[#allocation3 + $0x2a8] sm:$0xff]  ;;  %v263_v23 = vld [vmem:[#allocation3 + $0x2b8] sm:$0xff] }
  0x40   :  { %482 = vmatprep.subr.mxu0 %v353_v36  ;;  %595 = vmatprep.subr.mxu1 %v355_v37  ;;  %v260_v24 = vld [vmem:[#allocation3 + $0x2a0] sm:$0xff]  ;;  %v262_v25 = vld [vmem:[#allocation3 + $0x2b0] sm:$0xff]  ;;  %v253_v26 = vld [vmem:[#allocation3 + $0x268] sm:$0xff] }
  0x41   :  { %483 = vmatpush2.msra.mxu0 %v352_v38  ;;  %596 = vmatpush2.msra.mxu1 %v354_v39  ;;  %v255_v27 = vld [vmem:[#allocation3 + $0x278] sm:$0xff]  ;;  %v252_v28 = vld [vmem:[#allocation3 + $0x260] sm:$0xff]  ;;  %v254_v29 = vld [vmem:[#allocation3 + $0x270] sm:$0xff] }
  0x42   :  { %484 = vmatprep.subr.mxu0 %v345_v40  ;;  %597 = vmatprep.subr.mxu1 %v347_v41  ;;  %v245_v30 = vld [vmem:[#allocation3 + $0x228] sm:$0xff]  ;;  %v247_v31 = vld [vmem:[#allocation3 + $0x238] sm:$0xff]  ;;  %v244_v32 = vld [vmem:[#allocation3 + $0x220] sm:$0xff] }
  0x43   :  { %485 = vmatpush2.msra.mxu0 %v344_v42  ;;  %598 = vmatpush2.msra.mxu1 %v346_v43  ;;  %v246_v33 = vld [vmem:[#allocation3 + $0x230] sm:$0xff]  ;;  %v237_v34 = vld [vmem:[#allocation3 + $0x1e8] sm:$0xff]  ;;  %v239_v35 = vld [vmem:[#allocation3 + $0x1f8] sm:$0xff] }
  0x44   :  { %486 = vmatprep.subr.mxu0 %v337_v44  ;;  %599 = vmatprep.subr.mxu1 %v339_v45  ;;  %v236_v36 = vld [vmem:[#allocation3 + $0x1e0] sm:$0xff]  ;;  %v238_v37 = vld [vmem:[#allocation3 + $0x1f0] sm:$0xff]  ;;  %v229_v38 = vld [vmem:[#allocation3 + $0x1a8] sm:$0xff] }
  0x45   :  { %487 = vmatpush2.msra.mxu0 %v336_v46  ;;  %600 = vmatpush2.msra.mxu1 %v338_v47  ;;  %v231_v39 = vld [vmem:[#allocation3 + $0x1b8] sm:$0xff]  ;;  %v228_v40 = vld [vmem:[#allocation3 + $0x1a0] sm:$0xff]  ;;  %v230_v41 = vld [vmem:[#allocation3 + $0x1b0] sm:$0xff] }
  0x46   :  { %488 = vmatprep.subr.mxu0 %v329_v48  ;;  %601 = vmatprep.subr.mxu1 %v331_v49  ;;  %v221_v42 = vld [vmem:[#allocation3 + $0x168] sm:$0xff]  ;;  %v223_v43 = vld [vmem:[#allocation3 + $0x178] sm:$0xff]  ;;  %v220_v44 = vld [vmem:[#allocation3 + $0x160] sm:$0xff] }
  0x47   :  { %489 = vmatpush2.msra.mxu0 %v328_v50  ;;  %602 = vmatpush2.msra.mxu1 %v330_v51  ;;  %v222_v45 = vld [vmem:[#allocation3 + $0x170] sm:$0xff]  ;;  %v213_v46 = vld [vmem:[#allocation3 + $0x128] sm:$0xff]  ;;  %v215_v47 = vld [vmem:[#allocation3 + $0x138] sm:$0xff] }
  0x48   :  { %490 = vmatprep.subr.mxu0 %v321_v52  ;;  %603 = vmatprep.subr.mxu1 %v323_v53  ;;  %v212_v48 = vld [vmem:[#allocation3 + $0x120] sm:$0xff]  ;;  %v214_v49 = vld [vmem:[#allocation3 + $0x130] sm:$0xff]  ;;  %v205_v50 = vld [vmem:[#allocation3 + $0xe8] sm:$0xff] }
  0x49   :  { %491 = vmatpush2.msra.mxu0 %v320_v54  ;;  %604 = vmatpush2.msra.mxu1 %v322_v55  ;;  %v207_v51 = vld [vmem:[#allocation3 + $0xf8] sm:$0xff]  ;;  %v204_v52 = vld [vmem:[#allocation3 + $0xe0] sm:$0xff]  ;;  %v206_v53 = vld [vmem:[#allocation3 + $0xf0] sm:$0xff] }
  0x4a   :  { %492 = vmatprep.subr.mxu0 %v313_v56  ;;  %605 = vmatprep.subr.mxu1 %v315_v57  ;;  %v197_v54 = vld [vmem:[#allocation3 + $0xa8] sm:$0xff]  ;;  %v199_v55 = vld [vmem:[#allocation3 + $0xb8] sm:$0xff]  ;;  %v196_v56 = vld [vmem:[#allocation3 + $0xa0] sm:$0xff] }
  0x4b   :  { %493 = vmatpush2.msra.mxu0 %v312_v58  ;;  %606 = vmatpush2.msra.mxu1 %v314_v59  ;;  %v198_v57 = vld [vmem:[#allocation3 + $0xb0] sm:$0xff]  ;;  %v189_v58 = vld [vmem:[#allocation3 + $0x68] sm:$0xff]  ;;  %v191_v59 = vld [vmem:[#allocation3 + $0x78] sm:$0xff] }
  0x4c   :  { %494 = vmatprep.subr.mxu0 %v305_v60  ;;  %607 = vmatprep.subr.mxu1 %v307_v61  ;;  %v188_v60 = vld [vmem:[#allocation3 + $0x60] sm:$0xff]  ;;  %v190_v61 = vld [vmem:[#allocation3 + $0x70] sm:$0xff] }
  0x4d   :  { %495 = vmatpush2.msra.mxu0 %v304_v62  ;;  %496 = vmatprep.mubr.f32.mxu0 %v1308_v63  ;;  %v181_v62 = vld [vmem:[#allocation3 + $0x28] sm:$0xff] }
  0x4e   :  { %608 = vmatpush2.msra.mxu1 %v306_v0  ;;  %609 = vmatprep.mubr.f32.mxu1 %v1308_v63  ;;  %v183_v0 = vld [vmem:[#allocation3 + $0x38] sm:$0xff] }
  0x4f   :  { %497 = vmatmul.mubr.f32.vlgmr.msra.gmra.mxu0 %v1313_v1  ;;  %610 = vmatmul.mubr.f32.vlgmr.msra.gmra.mxu1 %v1313_v1 }
  0x50   :  { %658 = vmatprep.subr.mxu0 %v301_v2  ;;  %771 = vmatprep.subr.mxu1 %v303_v3  ;;  %v180_v2 = vld [vmem:[#allocation3 + $0x20] sm:$0xff]  ;;  %v182_v3 = vld [vmem:[#allocation3 + $0x30] sm:$0xff] }
  0x51   :  { %659 = vmatpush1.msra.mxu0 %v300_v4  ;;  %772 = vmatpush1.msra.mxu1 %v302_v5  ;;  %v429_v4 = vld [vmem:[#allocation3 + $0x7e8] sm:$0xff]  ;;  %v431_v5 = vld [vmem:[#allocation3 + $0x7f8] sm:$0xff] }
  0x52   :  { %660 = vmatprep.subr.mxu0 %v293_v6  ;;  %773 = vmatprep.subr.mxu1 %v295_v7  ;;  %v1322_v6 = vld [vmem:[%s1738_s0 + $0x18] sm:$0xff]  ;;  %v428_v7 = vld [vmem:[#allocation3 + $0x7e0] sm:$0xff] }
  0x53   :  { %661 = vmatpush1.msra.mxu0 %v292_v8  ;;  %774 = vmatpush1.msra.mxu1 %v294_v9  ;;  %v430_v8 = vld [vmem:[#allocation3 + $0x7f0] sm:$0xff] }
  0x54   :  { %662 = vmatprep.subr.mxu0 %v285_v10  ;;  %775 = vmatprep.subr.mxu1 %v287_v11  ;;  %v1327_v9 = vld [vmem:[%s1738_s0 + $0x10] sm:$0xff]  ;;  %v421_v10 = vld [vmem:[#allocation3 + $0x7a8] sm:$0xff]  ;;  %v423_v11 = vld [vmem:[#allocation3 + $0x7b8] sm:$0xff] }
  0x55   :  { %663 = vmatpush1.msra.mxu0 %v284_v12  ;;  %776 = vmatpush1.msra.mxu1 %v286_v13  ;;  %v420_v12 = vld [vmem:[#allocation3 + $0x7a0] sm:$0xff]  ;;  %v422_v13 = vld [vmem:[#allocation3 + $0x7b0] sm:$0xff] }
  0x56   :  { %664 = vmatprep.subr.mxu0 %v277_v14  ;;  %777 = vmatprep.subr.mxu1 %v279_v15  ;;  %v413_v14 = vld [vmem:[#allocation3 + $0x768] sm:$0xff]  ;;  %v415_v15 = vld [vmem:[#allocation3 + $0x778] sm:$0xff] }
  0x57   :  { %665 = vmatpush1.msra.mxu0 %v276_v16  ;;  %778 = vmatpush1.msra.mxu1 %v278_v17  ;;  %v1336_v16 = vld [vmem:[%s1738_s0 + $0x28] sm:$0xff]  ;;  %v412_v17 = vld [vmem:[#allocation3 + $0x760] sm:$0xff] }
  0x58   :  { %666 = vmatprep.subr.mxu0 %v269_v18  ;;  %779 = vmatprep.subr.mxu1 %v271_v19  ;;  %v414_v18 = vld [vmem:[#allocation3 + $0x770] sm:$0xff]  ;;  %v1341_v19 = vld [vmem:[%s1738_s0 + $0x20] sm:$0xff] }
  0x59   :  { %667 = vmatpush1.msra.mxu0 %v268_v20  ;;  %780 = vmatpush1.msra.mxu1 %v270_v21  ;;  %v405_v20 = vld [vmem:[#allocation3 + $0x728] sm:$0xff]  ;;  %v407_v21 = vld [vmem:[#allocation3 + $0x738] sm:$0xff] }
  0x5a   :  { %668 = vmatprep.subr.mxu0 %v261_v22  ;;  %781 = vmatprep.subr.mxu1 %v263_v23  ;;  %v404_v22 = vld [vmem:[#allocation3 + $0x720] sm:$0xff]  ;;  %v406_v23 = vld [vmem:[#allocation3 + $0x730] sm:$0xff] }
  0x5b   :  { %669 = vmatpush1.msra.mxu0 %v260_v24  ;;  %782 = vmatpush1.msra.mxu1 %v262_v25  ;;  %v397_v24 = vld [vmem:[#allocation3 + $0x6e8] sm:$0xff]  ;;  %v399_v25 = vld [vmem:[#allocation3 + $0x6f8] sm:$0xff] }
  0x5c   :  { %670 = vmatprep.subr.mxu0 %v253_v26  ;;  %783 = vmatprep.subr.mxu1 %v255_v27  ;;  %v1350_v26 = vld [vmem:[%s1738_s0 + $0x38] sm:$0xff]  ;;  %v396_v27 = vld [vmem:[#allocation3 + $0x6e0] sm:$0xff] }
  0x5d   :  { %671 = vmatpush1.msra.mxu0 %v252_v28  ;;  %784 = vmatpush1.msra.mxu1 %v254_v29  ;;  %v398_v28 = vld [vmem:[#allocation3 + $0x6f0] sm:$0xff] }
  0x5e   :  { %672 = vmatprep.subr.mxu0 %v245_v30  ;;  %785 = vmatprep.subr.mxu1 %v247_v31  ;;  %v1355_v29 = vld [vmem:[%s1738_s0 + $0x30] sm:$0xff]  ;;  %v389_v30 = vld [vmem:[#allocation3 + $0x6a8] sm:$0xff]  ;;  %v391_v31 = vld [vmem:[#allocation3 + $0x6b8] sm:$0xff] }
  0x5f   :  { %673 = vmatpush1.msra.mxu0 %v244_v32  ;;  %786 = vmatpush1.msra.mxu1 %v246_v33  ;;  %v388_v32 = vld [vmem:[#allocation3 + $0x6a0] sm:$0xff]  ;;  %v390_v33 = vld [vmem:[#allocation3 + $0x6b0] sm:$0xff] }
  0x60   :  { %674 = vmatprep.subr.mxu0 %v237_v34  ;;  %787 = vmatprep.subr.mxu1 %v239_v35  ;;  %v381_v34 = vld [vmem:[#allocation3 + $0x668] sm:$0xff]  ;;  %v383_v35 = vld [vmem:[#allocation3 + $0x678] sm:$0xff] }
  0x61   :  { %675 = vmatpush1.msra.mxu0 %v236_v36  ;;  %788 = vmatpush1.msra.mxu1 %v238_v37  ;;  %v1364_v36 = vld [vmem:[%s1738_s0 + $0x48] sm:$0xff]  ;;  %v380_v37 = vld [vmem:[#allocation3 + $0x660] sm:$0xff] }
  0x62   :  { %676 = vmatprep.subr.mxu0 %v229_v38  ;;  %789 = vmatprep.subr.mxu1 %v231_v39  ;;  %v382_v38 = vld [vmem:[#allocation3 + $0x670] sm:$0xff]  ;;  %v1369_v39 = vld [vmem:[%s1738_s0 + $0x40] sm:$0xff] }
  0x63   :  { %677 = vmatpush1.msra.mxu0 %v228_v40  ;;  %790 = vmatpush1.msra.mxu1 %v230_v41  ;;  %v373_v40 = vld [vmem:[#allocation3 + $0x628] sm:$0xff]  ;;  %v375_v41 = vld [vmem:[#allocation3 + $0x638] sm:$0xff] }
  0x64   :  { %678 = vmatprep.subr.mxu0 %v221_v42  ;;  %791 = vmatprep.subr.mxu1 %v223_v43  ;;  %v372_v42 = vld [vmem:[#allocation3 + $0x620] sm:$0xff]  ;;  %v374_v43 = vld [vmem:[#allocation3 + $0x630] sm:$0xff] }
  0x65   :  { %679 = vmatpush1.msra.mxu0 %v220_v44  ;;  %792 = vmatpush1.msra.mxu1 %v222_v45  ;;  %v365_v44 = vld [vmem:[#allocation3 + $0x5e8] sm:$0xff]  ;;  %v367_v45 = vld [vmem:[#allocation3 + $0x5f8] sm:$0xff] }
  0x66   :  { %680 = vmatprep.subr.mxu0 %v213_v46  ;;  %793 = vmatprep.subr.mxu1 %v215_v47  ;;  %v1378_v46 = vld [vmem:[%s1738_s0 + $0x58] sm:$0xff]  ;;  %v364_v47 = vld [vmem:[#allocation3 + $0x5e0] sm:$0xff] }
  0x67   :  { %681 = vmatpush1.msra.mxu0 %v212_v48  ;;  %794 = vmatpush1.msra.mxu1 %v214_v49  ;;  %v366_v48 = vld [vmem:[#allocation3 + $0x5f0] sm:$0xff] }
  0x68   :  { %682 = vmatprep.subr.mxu0 %v205_v50  ;;  %795 = vmatprep.subr.mxu1 %v207_v51  ;;  %v1383_v49 = vld [vmem:[%s1738_s0 + $0x50] sm:$0xff]  ;;  %v357_v50 = vld [vmem:[#allocation3 + $0x5a8] sm:$0xff]  ;;  %v359_v51 = vld [vmem:[#allocation3 + $0x5b8] sm:$0xff] }
  0x69   :  { %683 = vmatpush1.msra.mxu0 %v204_v52  ;;  %796 = vmatpush1.msra.mxu1 %v206_v53  ;;  %v356_v52 = vld [vmem:[#allocation3 + $0x5a0] sm:$0xff]  ;;  %v358_v53 = vld [vmem:[#allocation3 + $0x5b0] sm:$0xff] }
  0x6a   :  { %684 = vmatprep.subr.mxu0 %v197_v54  ;;  %797 = vmatprep.subr.mxu1 %v199_v55  ;;  %v349_v54 = vld [vmem:[#allocation3 + $0x568] sm:$0xff]  ;;  %v351_v55 = vld [vmem:[#allocation3 + $0x578] sm:$0xff] }
  0x6b   :  { %685 = vmatpush1.msra.mxu0 %v196_v56  ;;  %798 = vmatpush1.msra.mxu1 %v198_v57  ;;  %v1392_v56 = vld [vmem:[%s1738_s0 + $0x68] sm:$0xff]  ;;  %v348_v57 = vld [vmem:[#allocation3 + $0x560] sm:$0xff] }
  0x6c   :  { %686 = vmatprep.subr.mxu0 %v189_v58  ;;  %799 = vmatprep.subr.mxu1 %v191_v59  ;;  %v350_v58 = vld [vmem:[#allocation3 + $0x570] sm:$0xff]  ;;  %v1397_v59 = vld [vmem:[%s1738_s0 + $0x60] sm:$0xff] }
  0x6d   :  { %687 = vmatpush1.msra.mxu0 %v188_v60  ;;  %800 = vmatpush1.msra.mxu1 %v190_v61  ;;  %v341_v60 = vld [vmem:[#allocation3 + $0x528] sm:$0xff]  ;;  %v343_v61 = vld [vmem:[#allocation3 + $0x538] sm:$0xff] }
  0x6e   :  { %688 = vmatprep.subr.mxu0 %v181_v62  ;;  %801 = vmatprep.subr.mxu1 %v183_v0  ;;  %v340_v62 = vld [vmem:[#allocation3 + $0x520] sm:$0xff]  ;;  %v342_v0 = vld [vmem:[#allocation3 + $0x530] sm:$0xff] }
  0x6f   :  { %689 = vmatpush1.msra.mxu0 %v180_v2  ;;  %802 = vmatpush1.msra.mxu1 %v182_v3  ;;  %v333_v2 = vld [vmem:[#allocation3 + $0x4e8] sm:$0xff]  ;;  %v335_v3 = vld [vmem:[#allocation3 + $0x4f8] sm:$0xff] }
  0x70   :  { %690 = vmatprep.subr.mxu0 %v429_v4  ;;  %803 = vmatprep.subr.mxu1 %v431_v5  ;;  %v1406_v4 = vld [vmem:[%s1738_s0 + $0x78] sm:$0xff]  ;;  %v332_v5 = vld [vmem:[#allocation3 + $0x4e0] sm:$0xff] }
  0x71   :  { %502 = vmatprep.mubr.f32.mxu0 %v1322_v6  ;;  %615 = vmatprep.mubr.f32.mxu1 %v1322_v6 }
  0x72   :  { %691 = vmatpush2.msra.mxu0 %v428_v7  ;;  %804 = vmatpush2.msra.mxu1 %v430_v8  ;;  %v334_v7 = vld [vmem:[#allocation3 + $0x4f0] sm:$0xff] }
  0x73   :  { %503 = vmatmul.mubr.f32.gmra.mxu0 %v1327_v9  ;;  %616 = vmatmul.mubr.f32.gmra.mxu1 %v1327_v9  ;;  %v174_v8 = vld [vmem:[%s1738_s0 + $0x70] sm:$0xff] }
  0x74   :  { %692 = vmatprep.subr.mxu0 %v421_v10  ;;  %805 = vmatprep.subr.mxu1 %v423_v11  ;;  %v325_v10 = vld [vmem:[#allocation3 + $0x4a8] sm:$0xff]  ;;  %v327_v11 = vld [vmem:[#allocation3 + $0x4b8] sm:$0xff] }
  0x75   :  { %693 = vmatpush2.msra.mxu0 %v420_v12  ;;  %806 = vmatpush2.msra.mxu1 %v422_v13  ;;  %v324_v12 = vld [vmem:[#allocation3 + $0x4a0] sm:$0xff]  ;;  %v326_v13 = vld [vmem:[#allocation3 + $0x4b0] sm:$0xff] }
  0x76   :  { %694 = vmatprep.subr.mxu0 %v413_v14  ;;  %807 = vmatprep.subr.mxu1 %v415_v15  ;;  %v317_v14 = vld [vmem:[#allocation3 + $0x468] sm:$0xff]  ;;  %v319_v15 = vld [vmem:[#allocation3 + $0x478] sm:$0xff] }
  0x77   :  { %508 = vmatprep.mubr.f32.mxu0 %v1336_v16  ;;  %621 = vmatprep.mubr.f32.mxu1 %v1336_v16 }
  0x78   :  { %695 = vmatpush2.msra.mxu0 %v412_v17  ;;  %808 = vmatpush2.msra.mxu1 %v414_v18  ;;  %v316_v17 = vld [vmem:[#allocation3 + $0x460] sm:$0xff]  ;;  %v318_v18 = vld [vmem:[#allocation3 + $0x470] sm:$0xff] }
  0x79   :  { %509 = vmatmul.mubr.f32.gmra.mxu0 %v1341_v19  ;;  %622 = vmatmul.mubr.f32.gmra.mxu1 %v1341_v19 }
  0x7a   :  { %696 = vmatprep.subr.mxu0 %v405_v20  ;;  %809 = vmatprep.subr.mxu1 %v407_v21  ;;  %v309_v20 = vld [vmem:[#allocation3 + $0x428] sm:$0xff]  ;;  %v311_v21 = vld [vmem:[#allocation3 + $0x438] sm:$0xff] }
  0x7b   :  { %697 = vmatpush2.msra.mxu0 %v404_v22  ;;  %810 = vmatpush2.msra.mxu1 %v406_v23  ;;  %v308_v22 = vld [vmem:[#allocation3 + $0x420] sm:$0xff]  ;;  %v310_v23 = vld [vmem:[#allocation3 + $0x430] sm:$0xff] }
  0x7c   :  { %698 = vmatprep.subr.mxu0 %v397_v24  ;;  %811 = vmatprep.subr.mxu1 %v399_v25 }
  0x7d   :  { %514 = vmatprep.mubr.f32.mxu0 %v1350_v26  ;;  %627 = vmatprep.mubr.f32.mxu1 %v1350_v26 }
  0x7e   :  { %699 = vmatpush2.msra.mxu0 %v396_v27  ;;  %812 = vmatpush2.msra.mxu1 %v398_v28 }
  0x7f   :  { %515 = vmatmul.mubr.f32.gmra.mxu0 %v1355_v29  ;;  %628 = vmatmul.mubr.f32.gmra.mxu1 %v1355_v29 }
  0x80   :  { %700 = vmatprep.subr.mxu0 %v389_v30  ;;  %813 = vmatprep.subr.mxu1 %v391_v31 }
  0x81   :  { %701 = vmatpush2.msra.mxu0 %v388_v32  ;;  %814 = vmatpush2.msra.mxu1 %v390_v33 }
  0x82   :  { %702 = vmatprep.subr.mxu0 %v381_v34  ;;  %815 = vmatprep.subr.mxu1 %v383_v35 }
  0x83   :  { %520 = vmatprep.mubr.f32.mxu0 %v1364_v36  ;;  %633 = vmatprep.mubr.f32.mxu1 %v1364_v36 }
  0x84   :  { %703 = vmatpush2.msra.mxu0 %v380_v37  ;;  %816 = vmatpush2.msra.mxu1 %v382_v38 }
  0x85   :  { %521 = vmatmul.mubr.f32.gmra.mxu0 %v1369_v39  ;;  %634 = vmatmul.mubr.f32.gmra.mxu1 %v1369_v39 }
  0x86   :  { %704 = vmatprep.subr.mxu0 %v373_v40  ;;  %817 = vmatprep.subr.mxu1 %v375_v41 }
  0x87   :  { %705 = vmatpush2.msra.mxu0 %v372_v42  ;;  %818 = vmatpush2.msra.mxu1 %v374_v43 }
  0x88   :  { %706 = vmatprep.subr.mxu0 %v365_v44  ;;  %819 = vmatprep.subr.mxu1 %v367_v45 }
  0x89   :  { %526 = vmatprep.mubr.f32.mxu0 %v1378_v46  ;;  %639 = vmatprep.mubr.f32.mxu1 %v1378_v46 }
  0x8a   :  { %707 = vmatpush2.msra.mxu0 %v364_v47  ;;  %820 = vmatpush2.msra.mxu1 %v366_v48 }
  0x8b   :  { %527 = vmatmul.mubr.f32.gmra.mxu0 %v1383_v49  ;;  %640 = vmatmul.mubr.f32.gmra.mxu1 %v1383_v49 }
  0x8c   :  { %708 = vmatprep.subr.mxu0 %v357_v50  ;;  %821 = vmatprep.subr.mxu1 %v359_v51 }
  0x8d   :  { %709 = vmatpush2.msra.mxu0 %v356_v52  ;;  %822 = vmatpush2.msra.mxu1 %v358_v53 }
  0x8e   :  { %710 = vmatprep.subr.mxu0 %v349_v54  ;;  %823 = vmatprep.subr.mxu1 %v351_v55 }
  0x8f   :  { %532 = vmatprep.mubr.f32.mxu0 %v1392_v56  ;;  %645 = vmatprep.mubr.f32.mxu1 %v1392_v56 }
  0x90   :  { %711 = vmatpush2.msra.mxu0 %v348_v57  ;;  %824 = vmatpush2.msra.mxu1 %v350_v58 }
  0x91   :  { %533 = vmatmul.mubr.f32.gmra.mxu0 %v1397_v59  ;;  %646 = vmatmul.mubr.f32.gmra.mxu1 %v1397_v59 }
  0x92   :  { %712 = vmatprep.subr.mxu0 %v341_v60  ;;  %825 = vmatprep.subr.mxu1 %v343_v61 }
  0x93   :  { %713 = vmatpush2.msra.mxu0 %v340_v62  ;;  %826 = vmatpush2.msra.mxu1 %v342_v0 }
  0x94   :  { %714 = vmatprep.subr.mxu0 %v333_v2  ;;  %827 = vmatprep.subr.mxu1 %v335_v3 }
  0x95   :  { %538 = vmatprep.mubr.f32.mxu0 %v1406_v4  ;;  %651 = vmatprep.mubr.f32.mxu1 %v1406_v4 }
  0x96   :  { %715 = vmatpush2.msra.mxu0 %v332_v5  ;;  %828 = vmatpush2.msra.mxu1 %v334_v7 }
  0x97   :  { %539 = vmatmul.mubr.f32.gmra.mxu0 %v174_v8  ;;  %652 = vmatmul.mubr.f32.gmra.mxu1 %v174_v8 }
  0x98   :  { %716 = vmatprep.subr.mxu0 %v325_v10  ;;  %829 = vmatprep.subr.mxu1 %v327_v11 }
  0x99   :  { %717 = vmatpush2.msra.mxu0 %v324_v12  ;;  %830 = vmatpush2.msra.mxu1 %v326_v13 }
  0x9a   :  { %718 = vmatprep.subr.mxu0 %v317_v14  ;;  %831 = vmatprep.subr.mxu1 %v319_v15 }
  0x9b   :  { %719 = vmatpush2.msra.mxu0 %v316_v17  ;;  %832 = vmatpush2.msra.mxu1 %v318_v18 }
  0x9c   :  { %720 = vmatprep.subr.mxu0 %v309_v20  ;;  %833 = vmatprep.subr.mxu1 %v311_v21 }
  0x9d   :  { %721 = vmatpush2.msra.mxu0 %v308_v22  ;;  %722 = vmatprep.mubr.f32.mxu0 %v1308_v63 }
  0x9e   :  { %834 = vmatpush2.msra.mxu1 %v310_v23  ;;  %835 = vmatprep.mubr.f32.mxu1 %v1308_v63  ;;  %v1081_v63 = vlaneseq }
  0x9f   :  { %723 = vmatmul.mubr.f32.vlgmr.msra.gmra.mxu0 %v1313_v1  ;;  %836 = vmatmul.mubr.f32.vlgmr.msra.gmra.mxu1 %v1313_v1 }
  0xa0   :  { %728 = vmatprep.mubr.f32.mxu0 %v1322_v6  ;;  %841 = vmatprep.mubr.f32.mxu1 %v1322_v6  ;;  %v1443_v1 = vshrl.u32 %v1081_v63, 7 }
  0xa2   :  { %v1083_v6 = vsub.s32 0, %v1443_v1  ;;  %v1095_v24 = vsub.s32 3, %v1443_v1 }
  0xa3   :  { %729 = vmatmul.mubr.f32.gmra.mxu0 %v1327_v9  ;;  %842 = vmatmul.mubr.f32.gmra.mxu1 %v1327_v9  ;;  %v1091_v9 = vsub.s32 2, %v1443_v1 }
  0xa4   :  { %734 = vmatprep.mubr.f32.mxu0 %v1336_v16  ;;  %847 = vmatprep.mubr.f32.mxu1 %v1336_v16  ;;  %v1450_v16 = vld [vmem:[%s1740_s2] sm:$0xff] }
  0xa5   :  { %v1455_v25 = vrot.slane %v1450_v16, %v1083_v6  ;;  %v1464_v28 = vrot.slane %v1450_v16, %v1095_v24 }
  0xa7   :  { %735 = vmatmul.mubr.f32.gmra.mxu0 %v1341_v19  ;;  %848 = vmatmul.mubr.f32.gmra.mxu1 %v1341_v19  ;;  %v1087_v19 = vsub.s32 1, %v1443_v1 }
  0xa8   :  { %740 = vmatprep.mubr.f32.mxu0 %v1350_v26  ;;  %853 = vmatprep.mubr.f32.mxu1 %v1350_v26  ;;  %v1458_v26 = vrot.slane %v1450_v16, %v1091_v9 }
  0xa9   :  { %v1461_v27 = vrot.slane %v1450_v16, %v1087_v19 }
  0xab   :  { %741 = vmatmul.mubr.f32.gmra.mxu0 %v1355_v29  ;;  %854 = vmatmul.mubr.f32.gmra.mxu1 %v1355_v29 }
  0xac   :  { %746 = vmatprep.mubr.f32.mxu0 %v1364_v36  ;;  %859 = vmatprep.mubr.f32.mxu1 %v1364_v36 }
  0xaf   :  { %747 = vmatmul.mubr.f32.gmra.mxu0 %v1369_v39  ;;  %860 = vmatmul.mubr.f32.gmra.mxu1 %v1369_v39 }
  0xb0   :  { %752 = vmatprep.mubr.f32.mxu0 %v1378_v46  ;;  %865 = vmatprep.mubr.f32.mxu1 %v1378_v46 }
  0xb3   :  { %753 = vmatmul.mubr.f32.gmra.mxu0 %v1383_v49  ;;  %866 = vmatmul.mubr.f32.gmra.mxu1 %v1383_v49 }
  0xb4   :  { %758 = vmatprep.mubr.f32.mxu0 %v1392_v56  ;;  %871 = vmatprep.mubr.f32.mxu1 %v1392_v56 }
  0xb7   :  { %759 = vmatmul.mubr.f32.gmra.mxu0 %v1397_v59  ;;  %872 = vmatmul.mubr.f32.gmra.mxu1 %v1397_v59 }
  0xb8   :  { %764 = vmatprep.mubr.f32.mxu0 %v1406_v4  ;;  %877 = vmatprep.mubr.f32.mxu1 %v1406_v4 }
  0xbb   :  { %765 = vmatmul.mubr.f32.gmra.mxu0 %v174_v8  ;;  %878 = vmatmul.mubr.f32.gmra.mxu1 %v174_v8 }
 0x10f   :  { %v498_v29 = vpop.f32.mrf.mxu0  ;;  %v611_v30 = vpop.f32.mrf.mxu1 }
 0x110   :  { %v1121_v31 = vadd.f32 %v1455_v25, %v498_v29  ;;  %v1123_v32 = vadd.f32 %v1458_v26, %v611_v30 }
 0x111   :  { %v500_v33 = vpop.f32.mrf.mxu0  ;;  %v613_v34 = vpop.f32.mrf.mxu1 }
 0x112   :  { %1185 = vst [vmem:[%s1741_s3] sm:$0xff] %v1121_v31  ;;  %1187 = vst [vmem:[%s1741_s3 + $0x10] sm:$0xff] %v1123_v32  ;;  %v1122_v35 = vadd.f32 %v1461_v27, %v500_v33  ;;  %v1124_v36 = vadd.f32 %v1464_v28, %v613_v34  ;;  %v1099_v31 = vsub.s32 4, %v1443_v1  ;;  %v1107_v32 = vsub.s32 6, %v1443_v1 }
 0x114   :  { %1186 = vst [vmem:[%s1741_s3 + $0x8] sm:$0xff] %v1122_v35  ;;  %1188 = vst [vmem:[%s1741_s3 + $0x18] sm:$0xff] %v1124_v36  ;;  %v1111_v36 = vsub.s32 7, %v1443_v1 }
 0x133   :  { %v504_v37 = vpop.f32.mrf.mxu0  ;;  %v617_v38 = vpop.f32.mrf.mxu1 }
 0x134   :  { %v1129_v39 = vadd.f32 %v1455_v25, %v504_v37  ;;  %v1131_v40 = vadd.f32 %v1458_v26, %v617_v38  ;;  %v1599_v37 = vrot.slane %v1450_v16, %v1099_v31  ;;  %v1602_v38 = vrot.slane %v1450_v16, %v1107_v32 }
 0x135   :  { %v506_v41 = vpop.f32.mrf.mxu0  ;;  %v619_v42 = vpop.f32.mrf.mxu1 }
 0x136   :  { %1193 = vst [vmem:[%s1741_s3 + $0x40] sm:$0xff] %v1129_v39  ;;  %1195 = vst [vmem:[%s1741_s3 + $0x50] sm:$0xff] %v1131_v40  ;;  %v1130_v43 = vadd.f32 %v1461_v27, %v506_v41  ;;  %v1132_v44 = vadd.f32 %v1464_v28, %v619_v42 }
 0x138   :  { %1194 = vst [vmem:[%s1741_s3 + $0x48] sm:$0xff] %v1130_v43  ;;  %1196 = vst [vmem:[%s1741_s3 + $0x58] sm:$0xff] %v1132_v44 }
 0x139   :  { %v510_v45 = vpop.f32.mrf.mxu0  ;;  %v623_v46 = vpop.f32.mrf.mxu1 }
 0x13a   :  { %v1137_v47 = vadd.f32 %v1455_v25, %v510_v45  ;;  %v1139_v48 = vadd.f32 %v1458_v26, %v623_v46 }
 0x13b   :  { %v512_v49 = vpop.f32.mrf.mxu0  ;;  %v625_v50 = vpop.f32.mrf.mxu1 }
 0x13c   :  { %1201 = vst [vmem:[%s1741_s3 + $0x80] sm:$0xff] %v1137_v47  ;;  %1203 = vst [vmem:[%s1741_s3 + $0x90] sm:$0xff] %v1139_v48  ;;  %v1138_v51 = vadd.f32 %v1461_v27, %v512_v49  ;;  %v1140_v52 = vadd.f32 %v1464_v28, %v625_v50 }
 0x13e   :  { %1202 = vst [vmem:[%s1741_s3 + $0x88] sm:$0xff] %v1138_v51  ;;  %1204 = vst [vmem:[%s1741_s3 + $0x98] sm:$0xff] %v1140_v52 }
 0x13f   :  { %v516_v53 = vpop.f32.mrf.mxu0  ;;  %v629_v54 = vpop.f32.mrf.mxu1 }
 0x140   :  { %v1145_v55 = vadd.f32 %v1455_v25, %v516_v53  ;;  %v1147_v56 = vadd.f32 %v1458_v26, %v629_v54 }
 0x141   :  { %v518_v57 = vpop.f32.mrf.mxu0  ;;  %v631_v58 = vpop.f32.mrf.mxu1 }
 0x142   :  { %1209 = vst [vmem:[%s1741_s3 + $0xc0] sm:$0xff] %v1145_v55  ;;  %1211 = vst [vmem:[%s1741_s3 + $0xd0] sm:$0xff] %v1147_v56  ;;  %v1146_v59 = vadd.f32 %v1461_v27, %v518_v57  ;;  %v1148_v60 = vadd.f32 %v1464_v28, %v631_v58 }
 0x144   :  { %1210 = vst [vmem:[%s1741_s3 + $0xc8] sm:$0xff] %v1146_v59  ;;  %1212 = vst [vmem:[%s1741_s3 + $0xd8] sm:$0xff] %v1148_v60 }
 0x145   :  { %v522_v61 = vpop.f32.mrf.mxu0  ;;  %v635_v62 = vpop.f32.mrf.mxu1 }
 0x146   :  { %v1153_v0 = vadd.f32 %v1455_v25, %v522_v61  ;;  %v1155_v2 = vadd.f32 %v1458_v26, %v635_v62 }
 0x147   :  { %v524_v3 = vpop.f32.mrf.mxu0  ;;  %v637_v4 = vpop.f32.mrf.mxu1 }
 0x148   :  { %1217 = vst [vmem:[%s1741_s3 + $0x100] sm:$0xff] %v1153_v0  ;;  %1219 = vst [vmem:[%s1741_s3 + $0x110] sm:$0xff] %v1155_v2  ;;  %v1154_v5 = vadd.f32 %v1461_v27, %v524_v3  ;;  %v1156_v7 = vadd.f32 %v1464_v28, %v637_v4 }
 0x14a   :  { %1218 = vst [vmem:[%s1741_s3 + $0x108] sm:$0xff] %v1154_v5  ;;  %1220 = vst [vmem:[%s1741_s3 + $0x118] sm:$0xff] %v1156_v7 }
 0x14b   :  { %v528_v8 = vpop.f32.mrf.mxu0  ;;  %v641_v10 = vpop.f32.mrf.mxu1 }
 0x14c   :  { %v1161_v11 = vadd.f32 %v1455_v25, %v528_v8  ;;  %v1163_v12 = vadd.f32 %v1458_v26, %v641_v10 }
 0x14d   :  { %v530_v13 = vpop.f32.mrf.mxu0  ;;  %v643_v14 = vpop.f32.mrf.mxu1 }
 0x14e   :  { %1225 = vst [vmem:[%s1741_s3 + $0x140] sm:$0xff] %v1161_v11  ;;  %1227 = vst [vmem:[%s1741_s3 + $0x150] sm:$0xff] %v1163_v12  ;;  %v1162_v15 = vadd.f32 %v1461_v27, %v530_v13  ;;  %v1164_v17 = vadd.f32 %v1464_v28, %v643_v14 }
 0x150   :  { %1226 = vst [vmem:[%s1741_s3 + $0x148] sm:$0xff] %v1162_v15  ;;  %1228 = vst [vmem:[%s1741_s3 + $0x158] sm:$0xff] %v1164_v17 }
 0x151   :  { %v534_v18 = vpop.f32.mrf.mxu0  ;;  %v647_v20 = vpop.f32.mrf.mxu1 }
 0x152   :  { %v1169_v21 = vadd.f32 %v1455_v25, %v534_v18  ;;  %v1171_v22 = vadd.f32 %v1458_v26, %v647_v20 }
 0x153   :  { %v536_v23 = vpop.f32.mrf.mxu0  ;;  %v649_v63 = vpop.f32.mrf.mxu1 }
 0x154   :  { %1233 = vst [vmem:[%s1741_s3 + $0x180] sm:$0xff] %v1169_v21  ;;  %1235 = vst [vmem:[%s1741_s3 + $0x190] sm:$0xff] %v1171_v22  ;;  %v1170_v6 = vadd.f32 %v1461_v27, %v536_v23  ;;  %v1172_v9 = vadd.f32 %v1464_v28, %v649_v63 }
 0x156   :  { %1234 = vst [vmem:[%s1741_s3 + $0x188] sm:$0xff] %v1170_v6  ;;  %1236 = vst [vmem:[%s1741_s3 + $0x198] sm:$0xff] %v1172_v9 }
 0x157   :  { %v540_v19 = vpop.f32.mrf.mxu0  ;;  %v653_v24 = vpop.f32.mrf.mxu1 }
 0x158   :  { %v1177_v29 = vadd.f32 %v1455_v25, %v540_v19  ;;  %v1179_v30 = vadd.f32 %v1458_v26, %v653_v24  ;;  %v1103_v26 = vsub.s32 5, %v1443_v1 }
 0x159   :  { %v542_v33 = vpop.f32.mrf.mxu0  ;;  %v655_v34 = vpop.f32.mrf.mxu1 }
 0x15a   :  { %1241 = vst [vmem:[%s1741_s3 + $0x1c0] sm:$0xff] %v1177_v29  ;;  %1243 = vst [vmem:[%s1741_s3 + $0x1d0] sm:$0xff] %v1179_v30  ;;  %v1178_v35 = vadd.f32 %v1461_v27, %v542_v33  ;;  %v1180_v25 = vadd.f32 %v1464_v28, %v655_v34  ;;  %v1605_v27 = vrot.slane %v1450_v16, %v1103_v26 }
 0x15b   :  { %v1608_v28 = vrot.slane %v1450_v16, %v1111_v36 }
 0x15c   :  { %1242 = vst [vmem:[%s1741_s3 + $0x1c8] sm:$0xff] %v1178_v35  ;;  %1244 = vst [vmem:[%s1741_s3 + $0x1d8] sm:$0xff] %v1180_v25 }
 0x15f   :  { %v724_v1 = vpop.f32.mrf.mxu0  ;;  %v837_v39 = vpop.f32.mrf.mxu1 }
 0x160   :  { %v1125_v40 = vadd.f32 %v1599_v37, %v724_v1  ;;  %v1127_v41 = vadd.f32 %v1602_v38, %v837_v39 }
 0x161   :  { %v726_v42 = vpop.f32.mrf.mxu0  ;;  %v839_v43 = vpop.f32.mrf.mxu1 }
 0x162   :  { %1189 = vst [vmem:[%s1741_s3 + $0x20] sm:$0xff] %v1125_v40  ;;  %1191 = vst [vmem:[%s1741_s3 + $0x30] sm:$0xff] %v1127_v41  ;;  %v1126_v44 = vadd.f32 %v1605_v27, %v726_v42  ;;  %v1128_v16 = vadd.f32 %v1608_v28, %v839_v43 }
 0x163   :  { %v730_v45 = vpop.f32.mrf.mxu0  ;;  %v843_v46 = vpop.f32.mrf.mxu1 }
 0x164   :  { %1190 = vst [vmem:[%s1741_s3 + $0x28] sm:$0xff] %v1126_v44  ;;  %1192 = vst [vmem:[%s1741_s3 + $0x38] sm:$0xff] %v1128_v16  ;;  %v1133_v47 = vadd.f32 %v1599_v37, %v730_v45  ;;  %v1135_v48 = vadd.f32 %v1602_v38, %v843_v46 }
 0x165   :  { %v732_v49 = vpop.f32.mrf.mxu0  ;;  %v845_v50 = vpop.f32.mrf.mxu1 }
 0x166   :  { %1197 = vst [vmem:[%s1741_s3 + $0x60] sm:$0xff] %v1133_v47  ;;  %1199 = vst [vmem:[%s1741_s3 + $0x70] sm:$0xff] %v1135_v48  ;;  %v1134_v51 = vadd.f32 %v1605_v27, %v732_v49  ;;  %v1136_v52 = vadd.f32 %v1608_v28, %v845_v50 }
 0x167   :  { %v736_v53 = vpop.f32.mrf.mxu0  ;;  %v849_v54 = vpop.f32.mrf.mxu1 }
 0x168   :  { %1198 = vst [vmem:[%s1741_s3 + $0x68] sm:$0xff] %v1134_v51  ;;  %1200 = vst [vmem:[%s1741_s3 + $0x78] sm:$0xff] %v1136_v52  ;;  %v1141_v55 = vadd.f32 %v1599_v37, %v736_v53  ;;  %v1143_v56 = vadd.f32 %v1602_v38, %v849_v54 }
 0x169   :  { %v738_v57 = vpop.f32.mrf.mxu0  ;;  %v851_v58 = vpop.f32.mrf.mxu1 }
 0x16a   :  { %1205 = vst [vmem:[%s1741_s3 + $0xa0] sm:$0xff] %v1141_v55  ;;  %1207 = vst [vmem:[%s1741_s3 + $0xb0] sm:$0xff] %v1143_v56  ;;  %v1142_v59 = vadd.f32 %v1605_v27, %v738_v57  ;;  %v1144_v60 = vadd.f32 %v1608_v28, %v851_v58 }
 0x16b   :  { %v742_v61 = vpop.f32.mrf.mxu0  ;;  %v855_v62 = vpop.f32.mrf.mxu1 }
 0x16c   :  { %1206 = vst [vmem:[%s1741_s3 + $0xa8] sm:$0xff] %v1142_v59  ;;  %1208 = vst [vmem:[%s1741_s3 + $0xb8] sm:$0xff] %v1144_v60  ;;  %v1149_v0 = vadd.f32 %v1599_v37, %v742_v61  ;;  %v1151_v2 = vadd.f32 %v1602_v38, %v855_v62 }
 0x16d   :  { %v744_v3 = vpop.f32.mrf.mxu0  ;;  %v857_v4 = vpop.f32.mrf.mxu1 }
 0x16e   :  { %1213 = vst [vmem:[%s1741_s3 + $0xe0] sm:$0xff] %v1149_v0  ;;  %1215 = vst [vmem:[%s1741_s3 + $0xf0] sm:$0xff] %v1151_v2  ;;  %v1150_v5 = vadd.f32 %v1605_v27, %v744_v3  ;;  %v1152_v7 = vadd.f32 %v1608_v28, %v857_v4 }
 0x16f   :  { %v748_v8 = vpop.f32.mrf.mxu0  ;;  %v861_v10 = vpop.f32.mrf.mxu1 }
 0x170   :  { %1214 = vst [vmem:[%s1741_s3 + $0xe8] sm:$0xff] %v1150_v5  ;;  %1216 = vst [vmem:[%s1741_s3 + $0xf8] sm:$0xff] %v1152_v7  ;;  %v1157_v11 = vadd.f32 %v1599_v37, %v748_v8  ;;  %v1159_v12 = vadd.f32 %v1602_v38, %v861_v10 }
 0x171   :  { %v750_v13 = vpop.f32.mrf.mxu0  ;;  %v863_v14 = vpop.f32.mrf.mxu1 }
 0x172   :  { %1221 = vst [vmem:[%s1741_s3 + $0x120] sm:$0xff] %v1157_v11  ;;  %1223 = vst [vmem:[%s1741_s3 + $0x130] sm:$0xff] %v1159_v12  ;;  %v1158_v15 = vadd.f32 %v1605_v27, %v750_v13  ;;  %v1160_v17 = vadd.f32 %v1608_v28, %v863_v14 }
 0x173   :  { %v754_v18 = vpop.f32.mrf.mxu0  ;;  %v867_v20 = vpop.f32.mrf.mxu1 }
 0x174   :  { %1222 = vst [vmem:[%s1741_s3 + $0x128] sm:$0xff] %v1158_v15  ;;  %1224 = vst [vmem:[%s1741_s3 + $0x138] sm:$0xff] %v1160_v17  ;;  %v1165_v21 = vadd.f32 %v1599_v37, %v754_v18  ;;  %v1167_v22 = vadd.f32 %v1602_v38, %v867_v20 }
 0x175   :  { %v756_v23 = vpop.f32.mrf.mxu0  ;;  %v869_v63 = vpop.f32.mrf.mxu1 }
 0x176   :  { %1229 = vst [vmem:[%s1741_s3 + $0x160] sm:$0xff] %v1165_v21  ;;  %1231 = vst [vmem:[%s1741_s3 + $0x170] sm:$0xff] %v1167_v22  ;;  %v1166_v6 = vadd.f32 %v1605_v27, %v756_v23  ;;  %v1168_v9 = vadd.f32 %v1608_v28, %v869_v63 }
 0x177   :  { %v760_v19 = vpop.f32.mrf.mxu0  ;;  %v873_v24 = vpop.f32.mrf.mxu1 }
 0x178   :  { %1230 = vst [vmem:[%s1741_s3 + $0x168] sm:$0xff] %v1166_v6  ;;  %1232 = vst [vmem:[%s1741_s3 + $0x178] sm:$0xff] %v1168_v9  ;;  %v1173_v29 = vadd.f32 %v1599_v37, %v760_v19  ;;  %v1175_v30 = vadd.f32 %v1602_v38, %v873_v24 }
 0x179   :  { %v762_v31 = vpop.f32.mrf.mxu0  ;;  %v875_v32 = vpop.f32.mrf.mxu1 }
 0x17a   :  { %1237 = vst [vmem:[%s1741_s3 + $0x1a0] sm:$0xff] %v1173_v29  ;;  %1239 = vst [vmem:[%s1741_s3 + $0x1b0] sm:$0xff] %v1175_v30  ;;  %v1174_v33 = vadd.f32 %v1605_v27, %v762_v31  ;;  %v1176_v34 = vadd.f32 %v1608_v28, %v875_v32 }
 0x17b   :  { %v766_v35 = vpop.f32.mrf.mxu0  ;;  %v879_v25 = vpop.f32.mrf.mxu1 }
 0x17c   :  { %1238 = vst [vmem:[%s1741_s3 + $0x1a8] sm:$0xff] %v1174_v33  ;;  %1240 = vst [vmem:[%s1741_s3 + $0x1b8] sm:$0xff] %v1176_v34  ;;  %v1181_v26 = vadd.f32 %v1599_v37, %v766_v35  ;;  %v1183_v36 = vadd.f32 %v1602_v38, %v879_v25 }
 0x17d   :  { %v768_v1 = vpop.f32.mrf.mxu0  ;;  %v881_v39 = vpop.f32.mrf.mxu1 }
 0x17e   :  { %1245 = vst [vmem:[%s1741_s3 + $0x1e0] sm:$0xff] %v1181_v26  ;;  %1247 = vst [vmem:[%s1741_s3 + $0x1f0] sm:$0xff] %v1183_v36  ;;  %v1182_v40 = vadd.f32 %v1605_v27, %v768_v1  ;;  %v1184_v41 = vadd.f32 %v1608_v28, %v881_v39 }
 0x180   :  { %1246 = vst [vmem:[%s1741_s3 + $0x1e8] sm:$0xff] %v1182_v40  ;;  %1248 = vst [vmem:[%s1741_s3 + $0x1f8] sm:$0xff] %v1184_v41 }
 0x181   :  { %1253 = vsyncpa [#allocation4], 1 }

// kernel: seq2seq_forward.7
= control target key start
LH: loop header
LB: loop body
LE: loop exit
PB: predicated region body
PF: predicated region fallthrough
CT: control target
= control target key end

     0   :  { %v1104_v3 = vmov 0.0   ;;  %s1902_s1 = inlined_call_operand.vmem [shape: f32[128,1024], index: 1, kind: input, shape index: {}]   ;;  %s1903_s0 = inlined_call_operand.vmem [shape: f32[64,128], index: 0, kind: input, shape index: {}]   ;;  %s1904_s2 = inlined_call_operand.vmem [shape: f32[1,1024], index: 2, kind: input, shape index: {}]   ;;  %s1905_s3 = inlined_call_operand.vmem [shape: f32[64,1024], index: 3, kind: output, shape index: {}]  }
   0x1   :  { %v275_v0 = vld [vmem:[%s1902_s1 + $0x3c8] sm:$0xff]  ;;  %v277_v1 = vld [vmem:[%s1902_s1 + $0x3d8] sm:$0xff]  ;;  %v274_v2 = vld [vmem:[%s1902_s1 + $0x3c0] sm:$0xff]  ;;  %346 = vmatprep.mubr.f32.mxu0 %v1104_v3  ;;  %459 = vmatprep.mubr.f32.mxu1 %v1104_v3 }
   0x2   :  { %282 = vmatprep.subr.mxu0 %v275_v0  ;;  %395 = vmatprep.subr.mxu1 %v277_v1  ;;  %v276_v4 = vld [vmem:[%s1902_s1 + $0x3d0] sm:$0xff]  ;;  %v267_v5 = vld [vmem:[%s1902_s1 + $0x388] sm:$0xff]  ;;  %v269_v6 = vld [vmem:[%s1902_s1 + $0x398] sm:$0xff] }
   0x3   :  { %283 = vmatpush1.msra.mxu0 %v274_v2  ;;  %396 = vmatpush1.msra.mxu1 %v276_v4  ;;  %v266_v7 = vld [vmem:[%s1902_s1 + $0x380] sm:$0xff]  ;;  %v268_v8 = vld [vmem:[%s1902_s1 + $0x390] sm:$0xff]  ;;  %v259_v9 = vld [vmem:[%s1902_s1 + $0x348] sm:$0xff] }
   0x4   :  { %284 = vmatprep.subr.mxu0 %v267_v5  ;;  %397 = vmatprep.subr.mxu1 %v269_v6  ;;  %v261_v10 = vld [vmem:[%s1902_s1 + $0x358] sm:$0xff]  ;;  %v258_v11 = vld [vmem:[%s1902_s1 + $0x340] sm:$0xff]  ;;  %v260_v12 = vld [vmem:[%s1902_s1 + $0x350] sm:$0xff] }
   0x5   :  { %285 = vmatpush1.msra.mxu0 %v266_v7  ;;  %398 = vmatpush1.msra.mxu1 %v268_v8  ;;  %v251_v13 = vld [vmem:[%s1902_s1 + $0x308] sm:$0xff]  ;;  %v253_v14 = vld [vmem:[%s1902_s1 + $0x318] sm:$0xff]  ;;  %v250_v15 = vld [vmem:[%s1902_s1 + $0x300] sm:$0xff] }
   0x6   :  { %286 = vmatprep.subr.mxu0 %v259_v9  ;;  %399 = vmatprep.subr.mxu1 %v261_v10  ;;  %v252_v16 = vld [vmem:[%s1902_s1 + $0x310] sm:$0xff]  ;;  %v243_v17 = vld [vmem:[%s1902_s1 + $0x2c8] sm:$0xff]  ;;  %v245_v18 = vld [vmem:[%s1902_s1 + $0x2d8] sm:$0xff] }
   0x7   :  { %287 = vmatpush1.msra.mxu0 %v258_v11  ;;  %400 = vmatpush1.msra.mxu1 %v260_v12  ;;  %v242_v19 = vld [vmem:[%s1902_s1 + $0x2c0] sm:$0xff]  ;;  %v244_v20 = vld [vmem:[%s1902_s1 + $0x2d0] sm:$0xff]  ;;  %v235_v21 = vld [vmem:[%s1902_s1 + $0x288] sm:$0xff] }
   0x8   :  { %288 = vmatprep.subr.mxu0 %v251_v13  ;;  %401 = vmatprep.subr.mxu1 %v253_v14  ;;  %v237_v22 = vld [vmem:[%s1902_s1 + $0x298] sm:$0xff]  ;;  %v234_v23 = vld [vmem:[%s1902_s1 + $0x280] sm:$0xff]  ;;  %v236_v24 = vld [vmem:[%s1902_s1 + $0x290] sm:$0xff] }
   0x9   :  { %289 = vmatpush1.msra.mxu0 %v250_v15  ;;  %402 = vmatpush1.msra.mxu1 %v252_v16  ;;  %v227_v25 = vld [vmem:[%s1902_s1 + $0x248] sm:$0xff]  ;;  %v229_v26 = vld [vmem:[%s1902_s1 + $0x258] sm:$0xff]  ;;  %v226_v27 = vld [vmem:[%s1902_s1 + $0x240] sm:$0xff] }
   0xa   :  { %290 = vmatprep.subr.mxu0 %v243_v17  ;;  %403 = vmatprep.subr.mxu1 %v245_v18  ;;  %v228_v28 = vld [vmem:[%s1902_s1 + $0x250] sm:$0xff]  ;;  %v219_v29 = vld [vmem:[%s1902_s1 + $0x208] sm:$0xff]  ;;  %v221_v30 = vld [vmem:[%s1902_s1 + $0x218] sm:$0xff] }
   0xb   :  { %291 = vmatpush1.msra.mxu0 %v242_v19  ;;  %404 = vmatpush1.msra.mxu1 %v244_v20  ;;  %v218_v31 = vld [vmem:[%s1902_s1 + $0x200] sm:$0xff]  ;;  %v220_v32 = vld [vmem:[%s1902_s1 + $0x210] sm:$0xff]  ;;  %v211_v33 = vld [vmem:[%s1902_s1 + $0x1c8] sm:$0xff] }
   0xc   :  { %292 = vmatprep.subr.mxu0 %v235_v21  ;;  %405 = vmatprep.subr.mxu1 %v237_v22  ;;  %v213_v34 = vld [vmem:[%s1902_s1 + $0x1d8] sm:$0xff]  ;;  %v210_v35 = vld [vmem:[%s1902_s1 + $0x1c0] sm:$0xff]  ;;  %v212_v36 = vld [vmem:[%s1902_s1 + $0x1d0] sm:$0xff] }
   0xd   :  { %293 = vmatpush1.msra.mxu0 %v234_v23  ;;  %406 = vmatpush1.msra.mxu1 %v236_v24  ;;  %v203_v37 = vld [vmem:[%s1902_s1 + $0x188] sm:$0xff]  ;;  %v205_v38 = vld [vmem:[%s1902_s1 + $0x198] sm:$0xff]  ;;  %v202_v39 = vld [vmem:[%s1902_s1 + $0x180] sm:$0xff] }
   0xe   :  { %294 = vmatprep.subr.mxu0 %v227_v25  ;;  %407 = vmatprep.subr.mxu1 %v229_v26  ;;  %v204_v40 = vld [vmem:[%s1902_s1 + $0x190] sm:$0xff]  ;;  %v195_v41 = vld [vmem:[%s1902_s1 + $0x148] sm:$0xff]  ;;  %v197_v42 = vld [vmem:[%s1902_s1 + $0x158] sm:$0xff] }
   0xf   :  { %295 = vmatpush1.msra.mxu0 %v226_v27  ;;  %408 = vmatpush1.msra.mxu1 %v228_v28  ;;  %v194_v43 = vld [vmem:[%s1902_s1 + $0x140] sm:$0xff]  ;;  %v196_v44 = vld [vmem:[%s1902_s1 + $0x150] sm:$0xff]  ;;  %v187_v45 = vld [vmem:[%s1902_s1 + $0x108] sm:$0xff] }
  0x10   :  { %296 = vmatprep.subr.mxu0 %v219_v29  ;;  %409 = vmatprep.subr.mxu1 %v221_v30  ;;  %v189_v46 = vld [vmem:[%s1902_s1 + $0x118] sm:$0xff]  ;;  %v186_v47 = vld [vmem:[%s1902_s1 + $0x100] sm:$0xff]  ;;  %v188_v48 = vld [vmem:[%s1902_s1 + $0x110] sm:$0xff] }
  0x11   :  { %297 = vmatpush1.msra.mxu0 %v218_v31  ;;  %410 = vmatpush1.msra.mxu1 %v220_v32  ;;  %v179_v49 = vld [vmem:[%s1902_s1 + $0xc8] sm:$0xff]  ;;  %v181_v50 = vld [vmem:[%s1902_s1 + $0xd8] sm:$0xff]  ;;  %v178_v51 = vld [vmem:[%s1902_s1 + $0xc0] sm:$0xff] }
  0x12   :  { %298 = vmatprep.subr.mxu0 %v211_v33  ;;  %411 = vmatprep.subr.mxu1 %v213_v34  ;;  %v180_v52 = vld [vmem:[%s1902_s1 + $0xd0] sm:$0xff]  ;;  %v171_v53 = vld [vmem:[%s1902_s1 + $0x88] sm:$0xff]  ;;  %v173_v54 = vld [vmem:[%s1902_s1 + $0x98] sm:$0xff] }
  0x13   :  { %299 = vmatpush1.msra.mxu0 %v210_v35  ;;  %412 = vmatpush1.msra.mxu1 %v212_v36  ;;  %v170_v55 = vld [vmem:[%s1902_s1 + $0x80] sm:$0xff]  ;;  %v172_v56 = vld [vmem:[%s1902_s1 + $0x90] sm:$0xff]  ;;  %v163_v57 = vld [vmem:[%s1902_s1 + $0x48] sm:$0xff] }
  0x14   :  { %300 = vmatprep.subr.mxu0 %v203_v37  ;;  %413 = vmatprep.subr.mxu1 %v205_v38  ;;  %v165_v58 = vld [vmem:[%s1902_s1 + $0x58] sm:$0xff]  ;;  %v162_v59 = vld [vmem:[%s1902_s1 + $0x40] sm:$0xff]  ;;  %v164_v60 = vld [vmem:[%s1902_s1 + $0x50] sm:$0xff] }
  0x15   :  { %301 = vmatpush1.msra.mxu0 %v202_v39  ;;  %414 = vmatpush1.msra.mxu1 %v204_v40  ;;  %v155_v61 = vld [vmem:[%s1902_s1 + $0x8] sm:$0xff]  ;;  %v157_v62 = vld [vmem:[%s1902_s1 + $0x18] sm:$0xff]  ;;  %v154_v63 = vld [vmem:[%s1902_s1] sm:$0xff] }
  0x16   :  { %302 = vmatprep.subr.mxu0 %v195_v41  ;;  %415 = vmatprep.subr.mxu1 %v197_v42  ;;  %v156_v0 = vld [vmem:[%s1902_s1 + $0x10] sm:$0xff]  ;;  %v1322_v1 = vld [vmem:[%s1903_s0] sm:$0xff]  ;;  %v279_v2 = vld [vmem:[%s1902_s1 + $0x3e8] sm:$0xff] }
  0x17   :  { %303 = vmatpush1.msra.mxu0 %v194_v43  ;;  %416 = vmatpush1.msra.mxu1 %v196_v44  ;;  %v281_v4 = vld [vmem:[%s1902_s1 + $0x3f8] sm:$0xff]  ;;  %v278_v5 = vld [vmem:[%s1902_s1 + $0x3e0] sm:$0xff]  ;;  %v280_v6 = vld [vmem:[%s1902_s1 + $0x3f0] sm:$0xff] }
  0x18   :  { %304 = vmatprep.subr.mxu0 %v187_v45  ;;  %417 = vmatprep.subr.mxu1 %v189_v46  ;;  %v271_v7 = vld [vmem:[%s1902_s1 + $0x3a8] sm:$0xff]  ;;  %v273_v8 = vld [vmem:[%s1902_s1 + $0x3b8] sm:$0xff]  ;;  %v270_v9 = vld [vmem:[%s1902_s1 + $0x3a0] sm:$0xff] }
  0x19   :  { %305 = vmatpush1.msra.mxu0 %v186_v47  ;;  %418 = vmatpush1.msra.mxu1 %v188_v48  ;;  %v272_v10 = vld [vmem:[%s1902_s1 + $0x3b0] sm:$0xff]  ;;  %v1353_v11 = vld [vmem:[%s1903_s0 + $0x8] sm:$0xff]  ;;  %v265_v13 = vld [vmem:[%s1902_s1 + $0x378] sm:$0xff] }
  0x1a   :  { %306 = vmatprep.subr.mxu0 %v179_v49  ;;  %419 = vmatprep.subr.mxu1 %v181_v50  ;;  %v263_v12 = vld [vmem:[%s1902_s1 + $0x368] sm:$0xff]  ;;  %v262_v14 = vld [vmem:[%s1902_s1 + $0x360] sm:$0xff]  ;;  %v264_v15 = vld [vmem:[%s1902_s1 + $0x370] sm:$0xff] }
  0x1b   :  { %307 = vmatpush1.msra.mxu0 %v178_v51  ;;  %420 = vmatpush1.msra.mxu1 %v180_v52  ;;  %v255_v16 = vld [vmem:[%s1902_s1 + $0x328] sm:$0xff]  ;;  %v257_v17 = vld [vmem:[%s1902_s1 + $0x338] sm:$0xff]  ;;  %v254_v18 = vld [vmem:[%s1902_s1 + $0x320] sm:$0xff] }
  0x1c   :  { %308 = vmatprep.subr.mxu0 %v171_v53  ;;  %421 = vmatprep.subr.mxu1 %v173_v54  ;;  %v256_v19 = vld [vmem:[%s1902_s1 + $0x330] sm:$0xff]  ;;  %v247_v21 = vld [vmem:[%s1902_s1 + $0x2e8] sm:$0xff]  ;;  %v249_v22 = vld [vmem:[%s1902_s1 + $0x2f8] sm:$0xff] }
  0x1d   :  { %309 = vmatpush1.msra.mxu0 %v170_v55  ;;  %422 = vmatpush1.msra.mxu1 %v172_v56  ;;  %v1386_v20 = vld [vmem:[%s1903_s0 + $0x10] sm:$0xff]  ;;  %v246_v23 = vld [vmem:[%s1902_s1 + $0x2e0] sm:$0xff]  ;;  %v239_v25 = vld [vmem:[%s1902_s1 + $0x2a8] sm:$0xff] }
  0x1e   :  { %310 = vmatprep.subr.mxu0 %v163_v57  ;;  %423 = vmatprep.subr.mxu1 %v165_v58  ;;  %v248_v24 = vld [vmem:[%s1902_s1 + $0x2f0] sm:$0xff]  ;;  %v241_v26 = vld [vmem:[%s1902_s1 + $0x2b8] sm:$0xff]  ;;  %v238_v27 = vld [vmem:[%s1902_s1 + $0x2a0] sm:$0xff] }
  0x1f   :  { %311 = vmatpush1.msra.mxu0 %v162_v59  ;;  %424 = vmatpush1.msra.mxu1 %v164_v60  ;;  %v240_v28 = vld [vmem:[%s1902_s1 + $0x2b0] sm:$0xff]  ;;  %v1419_v29 = vld [vmem:[%s1903_s0 + $0x18] sm:$0xff]  ;;  %v231_v30 = vld [vmem:[%s1902_s1 + $0x268] sm:$0xff] }
  0x20   :  { %312 = vmatprep.subr.mxu0 %v155_v61  ;;  %425 = vmatprep.subr.mxu1 %v157_v62  ;;  %v233_v31 = vld [vmem:[%s1902_s1 + $0x278] sm:$0xff]  ;;  %v230_v32 = vld [vmem:[%s1902_s1 + $0x260] sm:$0xff]  ;;  %v232_v33 = vld [vmem:[%s1902_s1 + $0x270] sm:$0xff] }
  0x21   :  { %313 = vmatpush1.msra.mxu0 %v154_v63  ;;  %426 = vmatpush1.msra.mxu1 %v156_v0  ;;  %v223_v34 = vld [vmem:[%s1902_s1 + $0x228] sm:$0xff]  ;;  %v225_v35 = vld [vmem:[%s1902_s1 + $0x238] sm:$0xff]  ;;  %v222_v36 = vld [vmem:[%s1902_s1 + $0x220] sm:$0xff] }
  0x22   :  { %347 = vmatmul.mubr.f32.vlgmr.msra.gmra.mxu0 %v1322_v1  ;;  %460 = vmatmul.mubr.f32.vlgmr.msra.gmra.mxu1 %v1322_v1  ;;  %v224_v37 = vld [vmem:[%s1902_s1 + $0x230] sm:$0xff]  ;;  %v1452_v38 = vld [vmem:[%s1903_s0 + $0x20] sm:$0xff]  ;;  %v215_v39 = vld [vmem:[%s1902_s1 + $0x1e8] sm:$0xff] }
  0x23   :  { %508 = vmatprep.subr.mxu0 %v279_v2  ;;  %621 = vmatprep.subr.mxu1 %v281_v4  ;;  %v217_v40 = vld [vmem:[%s1902_s1 + $0x1f8] sm:$0xff]  ;;  %v214_v41 = vld [vmem:[%s1902_s1 + $0x1e0] sm:$0xff]  ;;  %v216_v42 = vld [vmem:[%s1902_s1 + $0x1f0] sm:$0xff] }
  0x24   :  { %509 = vmatpush1.msra.mxu0 %v278_v5  ;;  %622 = vmatpush1.msra.mxu1 %v280_v6  ;;  %v207_v43 = vld [vmem:[%s1902_s1 + $0x1a8] sm:$0xff]  ;;  %v209_v44 = vld [vmem:[%s1902_s1 + $0x1b8] sm:$0xff]  ;;  %v206_v45 = vld [vmem:[%s1902_s1 + $0x1a0] sm:$0xff] }
  0x25   :  { %510 = vmatprep.subr.mxu0 %v271_v7  ;;  %623 = vmatprep.subr.mxu1 %v273_v8  ;;  %v208_v46 = vld [vmem:[%s1902_s1 + $0x1b0] sm:$0xff]  ;;  %v1485_v47 = vld [vmem:[%s1903_s0 + $0x28] sm:$0xff]  ;;  %v201_v49 = vld [vmem:[%s1902_s1 + $0x178] sm:$0xff] }
  0x26   :  { %352 = vmatprep.mubr.f32.mxu0 %v1104_v3  ;;  %465 = vmatprep.mubr.f32.mxu1 %v1104_v3  ;;  %v199_v48 = vld [vmem:[%s1902_s1 + $0x168] sm:$0xff]  ;;  %v198_v50 = vld [vmem:[%s1902_s1 + $0x160] sm:$0xff]  ;;  %v200_v51 = vld [vmem:[%s1902_s1 + $0x170] sm:$0xff] }
  0x27   :  { %511 = vmatpush1.msra.mxu0 %v270_v9  ;;  %624 = vmatpush1.msra.mxu1 %v272_v10  ;;  %v191_v52 = vld [vmem:[%s1902_s1 + $0x128] sm:$0xff]  ;;  %v193_v53 = vld [vmem:[%s1902_s1 + $0x138] sm:$0xff]  ;;  %v190_v54 = vld [vmem:[%s1902_s1 + $0x120] sm:$0xff] }
  0x28   :  { %353 = vmatmul.mubr.f32.gmra.mxu0 %v1353_v11  ;;  %466 = vmatmul.mubr.f32.gmra.mxu1 %v1353_v11  ;;  %v192_v55 = vld [vmem:[%s1902_s1 + $0x130] sm:$0xff]  ;;  %v183_v57 = vld [vmem:[%s1902_s1 + $0xe8] sm:$0xff]  ;;  %v185_v58 = vld [vmem:[%s1902_s1 + $0xf8] sm:$0xff] }
  0x29   :  { %512 = vmatprep.subr.mxu0 %v263_v12  ;;  %625 = vmatprep.subr.mxu1 %v265_v13  ;;  %v1518_v56 = vld [vmem:[%s1903_s0 + $0x30] sm:$0xff]  ;;  %v182_v59 = vld [vmem:[%s1902_s1 + $0xe0] sm:$0xff]  ;;  %v175_v61 = vld [vmem:[%s1902_s1 + $0xa8] sm:$0xff] }
  0x2a   :  { %513 = vmatpush1.msra.mxu0 %v262_v14  ;;  %626 = vmatpush1.msra.mxu1 %v264_v15  ;;  %v184_v60 = vld [vmem:[%s1902_s1 + $0xf0] sm:$0xff]  ;;  %v177_v62 = vld [vmem:[%s1902_s1 + $0xb8] sm:$0xff]  ;;  %v174_v63 = vld [vmem:[%s1902_s1 + $0xa0] sm:$0xff] }
  0x2b   :  { %514 = vmatprep.subr.mxu0 %v255_v16  ;;  %627 = vmatprep.subr.mxu1 %v257_v17  ;;  %v176_v0 = vld [vmem:[%s1902_s1 + $0xb0] sm:$0xff]  ;;  %v153_v2 = vld [vmem:[%s1903_s0 + $0x38] sm:$0xff]  ;;  %v167_v4 = vld [vmem:[%s1902_s1 + $0x68] sm:$0xff] }
  0x2c   :  { %358 = vmatprep.mubr.f32.mxu0 %v1104_v3  ;;  %471 = vmatprep.mubr.f32.mxu1 %v1104_v3  ;;  %v169_v5 = vld [vmem:[%s1902_s1 + $0x78] sm:$0xff]  ;;  %v166_v6 = vld [vmem:[%s1902_s1 + $0x60] sm:$0xff]  ;;  %v168_v7 = vld [vmem:[%s1902_s1 + $0x70] sm:$0xff] }
  0x2d   :  { %515 = vmatpush1.msra.mxu0 %v254_v18  ;;  %628 = vmatpush1.msra.mxu1 %v256_v19  ;;  %v159_v8 = vld [vmem:[%s1902_s1 + $0x28] sm:$0xff]  ;;  %v161_v9 = vld [vmem:[%s1902_s1 + $0x38] sm:$0xff]  ;;  %v158_v10 = vld [vmem:[%s1902_s1 + $0x20] sm:$0xff] }
  0x2e   :  { %359 = vmatmul.mubr.f32.gmra.mxu0 %v1386_v20  ;;  %472 = vmatmul.mubr.f32.gmra.mxu1 %v1386_v20  ;;  %v160_v12 = vld [vmem:[%s1902_s1 + $0x30] sm:$0xff]  ;;  %v1614_v15 = vld [vmem:[%s1904_s2] sm:$0xff] }
  0x2f   :  { %516 = vmatprep.subr.mxu0 %v247_v21  ;;  %629 = vmatprep.subr.mxu1 %v249_v22 }
  0x30   :  { %517 = vmatpush1.msra.mxu0 %v246_v23  ;;  %630 = vmatpush1.msra.mxu1 %v248_v24 }
  0x31   :  { %518 = vmatprep.subr.mxu0 %v239_v25  ;;  %631 = vmatprep.subr.mxu1 %v241_v26 }
  0x32   :  { %364 = vmatprep.mubr.f32.mxu0 %v1104_v3  ;;  %477 = vmatprep.mubr.f32.mxu1 %v1104_v3 }
  0x33   :  { %519 = vmatpush1.msra.mxu0 %v238_v27  ;;  %632 = vmatpush1.msra.mxu1 %v240_v28 }
  0x34   :  { %365 = vmatmul.mubr.f32.gmra.mxu0 %v1419_v29  ;;  %478 = vmatmul.mubr.f32.gmra.mxu1 %v1419_v29 }
  0x35   :  { %520 = vmatprep.subr.mxu0 %v231_v30  ;;  %633 = vmatprep.subr.mxu1 %v233_v31 }
  0x36   :  { %521 = vmatpush1.msra.mxu0 %v230_v32  ;;  %634 = vmatpush1.msra.mxu1 %v232_v33 }
  0x37   :  { %522 = vmatprep.subr.mxu0 %v223_v34  ;;  %635 = vmatprep.subr.mxu1 %v225_v35 }
  0x38   :  { %370 = vmatprep.mubr.f32.mxu0 %v1104_v3  ;;  %483 = vmatprep.mubr.f32.mxu1 %v1104_v3 }
  0x39   :  { %523 = vmatpush1.msra.mxu0 %v222_v36  ;;  %636 = vmatpush1.msra.mxu1 %v224_v37 }
  0x3a   :  { %371 = vmatmul.mubr.f32.gmra.mxu0 %v1452_v38  ;;  %484 = vmatmul.mubr.f32.gmra.mxu1 %v1452_v38 }
  0x3b   :  { %524 = vmatprep.subr.mxu0 %v215_v39  ;;  %637 = vmatprep.subr.mxu1 %v217_v40 }
  0x3c   :  { %525 = vmatpush1.msra.mxu0 %v214_v41  ;;  %638 = vmatpush1.msra.mxu1 %v216_v42 }
  0x3d   :  { %526 = vmatprep.subr.mxu0 %v207_v43  ;;  %639 = vmatprep.subr.mxu1 %v209_v44 }
  0x3e   :  { %376 = vmatprep.mubr.f32.mxu0 %v1104_v3  ;;  %489 = vmatprep.mubr.f32.mxu1 %v1104_v3 }
  0x3f   :  { %527 = vmatpush1.msra.mxu0 %v206_v45  ;;  %640 = vmatpush1.msra.mxu1 %v208_v46 }
  0x40   :  { %377 = vmatmul.mubr.f32.gmra.mxu0 %v1485_v47  ;;  %490 = vmatmul.mubr.f32.gmra.mxu1 %v1485_v47 }
  0x41   :  { %528 = vmatprep.subr.mxu0 %v199_v48  ;;  %641 = vmatprep.subr.mxu1 %v201_v49 }
  0x42   :  { %529 = vmatpush1.msra.mxu0 %v198_v50  ;;  %642 = vmatpush1.msra.mxu1 %v200_v51 }
  0x43   :  { %530 = vmatprep.subr.mxu0 %v191_v52  ;;  %643 = vmatprep.subr.mxu1 %v193_v53 }
  0x44   :  { %382 = vmatprep.mubr.f32.mxu0 %v1104_v3  ;;  %495 = vmatprep.mubr.f32.mxu1 %v1104_v3 }
  0x45   :  { %531 = vmatpush1.msra.mxu0 %v190_v54  ;;  %644 = vmatpush1.msra.mxu1 %v192_v55 }
  0x46   :  { %383 = vmatmul.mubr.f32.gmra.mxu0 %v1518_v56  ;;  %496 = vmatmul.mubr.f32.gmra.mxu1 %v1518_v56 }
  0x47   :  { %532 = vmatprep.subr.mxu0 %v183_v57  ;;  %645 = vmatprep.subr.mxu1 %v185_v58 }
  0x48   :  { %533 = vmatpush1.msra.mxu0 %v182_v59  ;;  %646 = vmatpush1.msra.mxu1 %v184_v60 }
  0x49   :  { %534 = vmatprep.subr.mxu0 %v175_v61  ;;  %647 = vmatprep.subr.mxu1 %v177_v62 }
  0x4a   :  { %388 = vmatprep.mubr.f32.mxu0 %v1104_v3  ;;  %501 = vmatprep.mubr.f32.mxu1 %v1104_v3 }
  0x4b   :  { %535 = vmatpush1.msra.mxu0 %v174_v63  ;;  %648 = vmatpush1.msra.mxu1 %v176_v0 }
  0x4c   :  { %389 = vmatmul.mubr.f32.gmra.mxu0 %v153_v2  ;;  %502 = vmatmul.mubr.f32.gmra.mxu1 %v153_v2 }
  0x4d   :  { %536 = vmatprep.subr.mxu0 %v167_v4  ;;  %649 = vmatprep.subr.mxu1 %v169_v5 }
  0x4e   :  { %537 = vmatpush1.msra.mxu0 %v166_v6  ;;  %650 = vmatpush1.msra.mxu1 %v168_v7 }
  0x4f   :  { %538 = vmatprep.subr.mxu0 %v159_v8  ;;  %651 = vmatprep.subr.mxu1 %v161_v9 }
  0x50   :  { %539 = vmatpush1.msra.mxu0 %v158_v10  ;;  %572 = vmatprep.mubr.f32.mxu0 %v1104_v3 }
  0x51   :  { %652 = vmatpush1.msra.mxu1 %v160_v12  ;;  %685 = vmatprep.mubr.f32.mxu1 %v1104_v3 }
  0x52   :  { %573 = vmatmul.mubr.f32.vlgmr.msra.gmra.mxu0 %v1322_v1  ;;  %686 = vmatmul.mubr.f32.vlgmr.msra.gmra.mxu1 %v1322_v1  ;;  %v931_v1 = vlaneseq }
  0x53   :  { %578 = vmatprep.mubr.f32.mxu0 %v1104_v3  ;;  %691 = vmatprep.mubr.f32.mxu1 %v1104_v3 }
  0x56   :  { %579 = vmatmul.mubr.f32.gmra.mxu0 %v1353_v11  ;;  %692 = vmatmul.mubr.f32.gmra.mxu1 %v1353_v11  ;;  %v1607_v11 = vshrl.u32 %v931_v1, 7 }
  0x57   :  { %584 = vmatprep.mubr.f32.mxu0 %v1104_v3  ;;  %697 = vmatprep.mubr.f32.mxu1 %v1104_v3 }
  0x58   :  { %v933_v13 = vsub.s32 0, %v1607_v11  ;;  %v941_v14 = vsub.s32 2, %v1607_v11  ;;  %v937_v16 = vsub.s32 1, %v1607_v11  ;;  %v945_v17 = vsub.s32 3, %v1607_v11 }
  0x5a   :  { %585 = vmatmul.mubr.f32.gmra.mxu0 %v1386_v20  ;;  %698 = vmatmul.mubr.f32.gmra.mxu1 %v1386_v20  ;;  %v1622_v18 = vrot.slane %v1614_v15, %v941_v14  ;;  %v1625_v19 = vrot.slane %v1614_v15, %v937_v16  ;;  %v1628_v20 = vrot.slane %v1614_v15, %v945_v17  ;;  %v949_v16 = vsub.s32 4, %v1607_v11 }
  0x5b   :  { %590 = vmatprep.mubr.f32.mxu0 %v1104_v3  ;;  %703 = vmatprep.mubr.f32.mxu1 %v1104_v3  ;;  %v957_v17 = vsub.s32 6, %v1607_v11 }
  0x5e   :  { %591 = vmatmul.mubr.f32.gmra.mxu0 %v1419_v29  ;;  %704 = vmatmul.mubr.f32.gmra.mxu1 %v1419_v29 }
  0x5f   :  { %596 = vmatprep.mubr.f32.mxu0 %v1104_v3  ;;  %709 = vmatprep.mubr.f32.mxu1 %v1104_v3 }
  0x62   :  { %597 = vmatmul.mubr.f32.gmra.mxu0 %v1452_v38  ;;  %710 = vmatmul.mubr.f32.gmra.mxu1 %v1452_v38 }
  0x63   :  { %602 = vmatprep.mubr.f32.mxu0 %v1104_v3  ;;  %715 = vmatprep.mubr.f32.mxu1 %v1104_v3 }
  0x66   :  { %603 = vmatmul.mubr.f32.gmra.mxu0 %v1485_v47  ;;  %716 = vmatmul.mubr.f32.gmra.mxu1 %v1485_v47 }
  0x67   :  { %608 = vmatprep.mubr.f32.mxu0 %v1104_v3  ;;  %721 = vmatprep.mubr.f32.mxu1 %v1104_v3 }
  0x6a   :  { %609 = vmatmul.mubr.f32.gmra.mxu0 %v1518_v56  ;;  %722 = vmatmul.mubr.f32.gmra.mxu1 %v1518_v56 }
  0x6b   :  { %614 = vmatprep.mubr.f32.mxu0 %v1104_v3  ;;  %727 = vmatprep.mubr.f32.mxu1 %v1104_v3  ;;  %v1619_v3 = vrot.slane %v1614_v15, %v933_v13 }
  0x6e   :  { %615 = vmatmul.mubr.f32.gmra.mxu0 %v153_v2  ;;  %728 = vmatmul.mubr.f32.gmra.mxu1 %v153_v2 }
  0xe2   :  { %v348_v21 = vpop.f32.mrf.mxu0  ;;  %v461_v22 = vpop.f32.mrf.mxu1 }
  0xe3   :  { %v971_v23 = vadd.f32 %v1619_v3, %v348_v21  ;;  %v973_v24 = vadd.f32 %v1622_v18, %v461_v22 }
  0xe4   :  { %v350_v25 = vpop.f32.mrf.mxu0  ;;  %v463_v26 = vpop.f32.mrf.mxu1 }
  0xe5   :  { %1035 = vst [vmem:[%s1905_s3] sm:$0xff] %v971_v23  ;;  %1037 = vst [vmem:[%s1905_s3 + $0x10] sm:$0xff] %v973_v24  ;;  %v972_v27 = vadd.f32 %v1625_v19, %v350_v25  ;;  %v974_v28 = vadd.f32 %v1628_v20, %v463_v26  ;;  %v953_v25 = vsub.s32 5, %v1607_v11  ;;  %v961_v26 = vsub.s32 7, %v1607_v11 }
  0xe7   :  { %1036 = vst [vmem:[%s1905_s3 + $0x8] sm:$0xff] %v972_v27  ;;  %1038 = vst [vmem:[%s1905_s3 + $0x18] sm:$0xff] %v974_v28  ;;  %v1769_v11 = vrot.slane %v1614_v15, %v953_v25 }
  0xe8   :  { %v354_v29 = vpop.f32.mrf.mxu0  ;;  %v467_v30 = vpop.f32.mrf.mxu1 }
  0xe9   :  { %v979_v31 = vadd.f32 %v1619_v3, %v354_v29  ;;  %v981_v32 = vadd.f32 %v1622_v18, %v467_v30  ;;  %v1760_v30 = vrot.slane %v1614_v15, %v957_v17 }
  0xea   :  { %v356_v33 = vpop.f32.mrf.mxu0  ;;  %v469_v34 = vpop.f32.mrf.mxu1 }
  0xeb   :  { %1043 = vst [vmem:[%s1905_s3 + $0x40] sm:$0xff] %v979_v31  ;;  %1045 = vst [vmem:[%s1905_s3 + $0x50] sm:$0xff] %v981_v32  ;;  %v980_v35 = vadd.f32 %v1625_v19, %v356_v33  ;;  %v982_v36 = vadd.f32 %v1628_v20, %v469_v34 }
  0xed   :  { %1044 = vst [vmem:[%s1905_s3 + $0x48] sm:$0xff] %v980_v35  ;;  %1046 = vst [vmem:[%s1905_s3 + $0x58] sm:$0xff] %v982_v36 }
  0xee   :  { %v360_v37 = vpop.f32.mrf.mxu0  ;;  %v473_v38 = vpop.f32.mrf.mxu1 }
  0xef   :  { %v987_v39 = vadd.f32 %v1619_v3, %v360_v37  ;;  %v989_v40 = vadd.f32 %v1622_v18, %v473_v38 }
  0xf0   :  { %v362_v41 = vpop.f32.mrf.mxu0  ;;  %v475_v42 = vpop.f32.mrf.mxu1 }
  0xf1   :  { %1051 = vst [vmem:[%s1905_s3 + $0x80] sm:$0xff] %v987_v39  ;;  %1053 = vst [vmem:[%s1905_s3 + $0x90] sm:$0xff] %v989_v40  ;;  %v988_v43 = vadd.f32 %v1625_v19, %v362_v41  ;;  %v990_v44 = vadd.f32 %v1628_v20, %v475_v42 }
  0xf3   :  { %1052 = vst [vmem:[%s1905_s3 + $0x88] sm:$0xff] %v988_v43  ;;  %1054 = vst [vmem:[%s1905_s3 + $0x98] sm:$0xff] %v990_v44 }
  0xf4   :  { %v366_v45 = vpop.f32.mrf.mxu0  ;;  %v479_v46 = vpop.f32.mrf.mxu1 }
  0xf5   :  { %v995_v47 = vadd.f32 %v1619_v3, %v366_v45  ;;  %v997_v48 = vadd.f32 %v1622_v18, %v479_v46 }
  0xf6   :  { %v368_v49 = vpop.f32.mrf.mxu0  ;;  %v481_v50 = vpop.f32.mrf.mxu1 }
  0xf7   :  { %1059 = vst [vmem:[%s1905_s3 + $0xc0] sm:$0xff] %v995_v47  ;;  %1061 = vst [vmem:[%s1905_s3 + $0xd0] sm:$0xff] %v997_v48  ;;  %v996_v51 = vadd.f32 %v1625_v19, %v368_v49  ;;  %v998_v52 = vadd.f32 %v1628_v20, %v481_v50 }
  0xf9   :  { %1060 = vst [vmem:[%s1905_s3 + $0xc8] sm:$0xff] %v996_v51  ;;  %1062 = vst [vmem:[%s1905_s3 + $0xd8] sm:$0xff] %v998_v52 }
  0xfa   :  { %v372_v53 = vpop.f32.mrf.mxu0  ;;  %v485_v54 = vpop.f32.mrf.mxu1 }
  0xfb   :  { %v1003_v55 = vadd.f32 %v1619_v3, %v372_v53  ;;  %v1005_v56 = vadd.f32 %v1622_v18, %v485_v54 }
  0xfc   :  { %v374_v57 = vpop.f32.mrf.mxu0  ;;  %v487_v58 = vpop.f32.mrf.mxu1 }
  0xfd   :  { %1067 = vst [vmem:[%s1905_s3 + $0x100] sm:$0xff] %v1003_v55  ;;  %1069 = vst [vmem:[%s1905_s3 + $0x110] sm:$0xff] %v1005_v56  ;;  %v1004_v59 = vadd.f32 %v1625_v19, %v374_v57  ;;  %v1006_v60 = vadd.f32 %v1628_v20, %v487_v58 }
  0xff   :  { %1068 = vst [vmem:[%s1905_s3 + $0x108] sm:$0xff] %v1004_v59  ;;  %1070 = vst [vmem:[%s1905_s3 + $0x118] sm:$0xff] %v1006_v60 }
 0x100   :  { %v378_v61 = vpop.f32.mrf.mxu0  ;;  %v491_v62 = vpop.f32.mrf.mxu1 }
 0x101   :  { %v1011_v63 = vadd.f32 %v1619_v3, %v378_v61  ;;  %v1013_v0 = vadd.f32 %v1622_v18, %v491_v62 }
 0x102   :  { %v380_v2 = vpop.f32.mrf.mxu0  ;;  %v493_v4 = vpop.f32.mrf.mxu1 }
 0x103   :  { %1075 = vst [vmem:[%s1905_s3 + $0x140] sm:$0xff] %v1011_v63  ;;  %1077 = vst [vmem:[%s1905_s3 + $0x150] sm:$0xff] %v1013_v0  ;;  %v1012_v5 = vadd.f32 %v1625_v19, %v380_v2  ;;  %v1014_v6 = vadd.f32 %v1628_v20, %v493_v4 }
 0x105   :  { %1076 = vst [vmem:[%s1905_s3 + $0x148] sm:$0xff] %v1012_v5  ;;  %1078 = vst [vmem:[%s1905_s3 + $0x158] sm:$0xff] %v1014_v6 }
 0x106   :  { %v384_v7 = vpop.f32.mrf.mxu0  ;;  %v497_v8 = vpop.f32.mrf.mxu1 }
 0x107   :  { %v1019_v9 = vadd.f32 %v1619_v3, %v384_v7  ;;  %v1021_v10 = vadd.f32 %v1622_v18, %v497_v8 }
 0x108   :  { %v386_v12 = vpop.f32.mrf.mxu0  ;;  %v499_v1 = vpop.f32.mrf.mxu1 }
 0x109   :  { %1083 = vst [vmem:[%s1905_s3 + $0x180] sm:$0xff] %v1019_v9  ;;  %1085 = vst [vmem:[%s1905_s3 + $0x190] sm:$0xff] %v1021_v10  ;;  %v1020_v13 = vadd.f32 %v1625_v19, %v386_v12  ;;  %v1022_v14 = vadd.f32 %v1628_v20, %v499_v1 }
 0x10b   :  { %1084 = vst [vmem:[%s1905_s3 + $0x188] sm:$0xff] %v1020_v13  ;;  %1086 = vst [vmem:[%s1905_s3 + $0x198] sm:$0xff] %v1022_v14 }
 0x10c   :  { %v390_v21 = vpop.f32.mrf.mxu0  ;;  %v503_v22 = vpop.f32.mrf.mxu1 }
 0x10d   :  { %v1027_v23 = vadd.f32 %v1619_v3, %v390_v21  ;;  %v1029_v24 = vadd.f32 %v1622_v18, %v503_v22  ;;  %v1757_v18 = vrot.slane %v1614_v15, %v949_v16 }
 0x10e   :  { %v392_v27 = vpop.f32.mrf.mxu0  ;;  %v505_v28 = vpop.f32.mrf.mxu1 }
 0x10f   :  { %1091 = vst [vmem:[%s1905_s3 + $0x1c0] sm:$0xff] %v1027_v23  ;;  %1093 = vst [vmem:[%s1905_s3 + $0x1d0] sm:$0xff] %v1029_v24  ;;  %v1028_v29 = vadd.f32 %v1625_v19, %v392_v27  ;;  %v1030_v3 = vadd.f32 %v1628_v20, %v505_v28  ;;  %v1772_v19 = vrot.slane %v1614_v15, %v961_v26 }
 0x111   :  { %1092 = vst [vmem:[%s1905_s3 + $0x1c8] sm:$0xff] %v1028_v29  ;;  %1094 = vst [vmem:[%s1905_s3 + $0x1d8] sm:$0xff] %v1030_v3 }
 0x112   :  { %v574_v20 = vpop.f32.mrf.mxu0  ;;  %v687_v31 = vpop.f32.mrf.mxu1 }
 0x113   :  { %v975_v32 = vadd.f32 %v1757_v18, %v574_v20  ;;  %v977_v33 = vadd.f32 %v1760_v30, %v687_v31 }
 0x114   :  { %v576_v34 = vpop.f32.mrf.mxu0  ;;  %v689_v35 = vpop.f32.mrf.mxu1 }
 0x115   :  { %1039 = vst [vmem:[%s1905_s3 + $0x20] sm:$0xff] %v975_v32  ;;  %1041 = vst [vmem:[%s1905_s3 + $0x30] sm:$0xff] %v977_v33  ;;  %v976_v36 = vadd.f32 %v1769_v11, %v576_v34  ;;  %v978_v15 = vadd.f32 %v1772_v19, %v689_v35 }
 0x116   :  { %v580_v37 = vpop.f32.mrf.mxu0  ;;  %v693_v38 = vpop.f32.mrf.mxu1 }
 0x117   :  { %1040 = vst [vmem:[%s1905_s3 + $0x28] sm:$0xff] %v976_v36  ;;  %1042 = vst [vmem:[%s1905_s3 + $0x38] sm:$0xff] %v978_v15  ;;  %v983_v39 = vadd.f32 %v1757_v18, %v580_v37  ;;  %v985_v40 = vadd.f32 %v1760_v30, %v693_v38 }
 0x118   :  { %v582_v41 = vpop.f32.mrf.mxu0  ;;  %v695_v42 = vpop.f32.mrf.mxu1 }
 0x119   :  { %1047 = vst [vmem:[%s1905_s3 + $0x60] sm:$0xff] %v983_v39  ;;  %1049 = vst [vmem:[%s1905_s3 + $0x70] sm:$0xff] %v985_v40  ;;  %v984_v43 = vadd.f32 %v1769_v11, %v582_v41  ;;  %v986_v44 = vadd.f32 %v1772_v19, %v695_v42 }
 0x11a   :  { %v586_v45 = vpop.f32.mrf.mxu0  ;;  %v699_v46 = vpop.f32.mrf.mxu1 }
 0x11b   :  { %1048 = vst [vmem:[%s1905_s3 + $0x68] sm:$0xff] %v984_v43  ;;  %1050 = vst [vmem:[%s1905_s3 + $0x78] sm:$0xff] %v986_v44  ;;  %v991_v47 = vadd.f32 %v1757_v18, %v586_v45  ;;  %v993_v48 = vadd.f32 %v1760_v30, %v699_v46 }
 0x11c   :  { %v588_v49 = vpop.f32.mrf.mxu0  ;;  %v701_v50 = vpop.f32.mrf.mxu1 }
 0x11d   :  { %1055 = vst [vmem:[%s1905_s3 + $0xa0] sm:$0xff] %v991_v47  ;;  %1057 = vst [vmem:[%s1905_s3 + $0xb0] sm:$0xff] %v993_v48  ;;  %v992_v51 = vadd.f32 %v1769_v11, %v588_v49  ;;  %v994_v52 = vadd.f32 %v1772_v19, %v701_v50 }
 0x11e   :  { %v592_v53 = vpop.f32.mrf.mxu0  ;;  %v705_v54 = vpop.f32.mrf.mxu1 }
 0x11f   :  { %1056 = vst [vmem:[%s1905_s3 + $0xa8] sm:$0xff] %v992_v51  ;;  %1058 = vst [vmem:[%s1905_s3 + $0xb8] sm:$0xff] %v994_v52  ;;  %v999_v55 = vadd.f32 %v1757_v18, %v592_v53  ;;  %v1001_v56 = vadd.f32 %v1760_v30, %v705_v54 }
 0x120   :  { %v594_v57 = vpop.f32.mrf.mxu0  ;;  %v707_v58 = vpop.f32.mrf.mxu1 }
 0x121   :  { %1063 = vst [vmem:[%s1905_s3 + $0xe0] sm:$0xff] %v999_v55  ;;  %1065 = vst [vmem:[%s1905_s3 + $0xf0] sm:$0xff] %v1001_v56  ;;  %v1000_v59 = vadd.f32 %v1769_v11, %v594_v57  ;;  %v1002_v60 = vadd.f32 %v1772_v19, %v707_v58 }
 0x122   :  { %v598_v61 = vpop.f32.mrf.mxu0  ;;  %v711_v62 = vpop.f32.mrf.mxu1 }
 0x123   :  { %1064 = vst [vmem:[%s1905_s3 + $0xe8] sm:$0xff] %v1000_v59  ;;  %1066 = vst [vmem:[%s1905_s3 + $0xf8] sm:$0xff] %v1002_v60  ;;  %v1007_v63 = vadd.f32 %v1757_v18, %v598_v61  ;;  %v1009_v0 = vadd.f32 %v1760_v30, %v711_v62 }
 0x124   :  { %v600_v2 = vpop.f32.mrf.mxu0  ;;  %v713_v4 = vpop.f32.mrf.mxu1 }
 0x125   :  { %1071 = vst [vmem:[%s1905_s3 + $0x120] sm:$0xff] %v1007_v63  ;;  %1073 = vst [vmem:[%s1905_s3 + $0x130] sm:$0xff] %v1009_v0  ;;  %v1008_v5 = vadd.f32 %v1769_v11, %v600_v2  ;;  %v1010_v6 = vadd.f32 %v1772_v19, %v713_v4 }
 0x126   :  { %v604_v7 = vpop.f32.mrf.mxu0  ;;  %v717_v8 = vpop.f32.mrf.mxu1 }
 0x127   :  { %1072 = vst [vmem:[%s1905_s3 + $0x128] sm:$0xff] %v1008_v5  ;;  %1074 = vst [vmem:[%s1905_s3 + $0x138] sm:$0xff] %v1010_v6  ;;  %v1015_v9 = vadd.f32 %v1757_v18, %v604_v7  ;;  %v1017_v10 = vadd.f32 %v1760_v30, %v717_v8 }
 0x128   :  { %v606_v12 = vpop.f32.mrf.mxu0  ;;  %v719_v1 = vpop.f32.mrf.mxu1 }
 0x129   :  { %1079 = vst [vmem:[%s1905_s3 + $0x160] sm:$0xff] %v1015_v9  ;;  %1081 = vst [vmem:[%s1905_s3 + $0x170] sm:$0xff] %v1017_v10  ;;  %v1016_v13 = vadd.f32 %v1769_v11, %v606_v12  ;;  %v1018_v14 = vadd.f32 %v1772_v19, %v719_v1 }
 0x12a   :  { %v610_v16 = vpop.f32.mrf.mxu0  ;;  %v723_v17 = vpop.f32.mrf.mxu1 }
 0x12b   :  { %1080 = vst [vmem:[%s1905_s3 + $0x168] sm:$0xff] %v1016_v13  ;;  %1082 = vst [vmem:[%s1905_s3 + $0x178] sm:$0xff] %v1018_v14  ;;  %v1023_v21 = vadd.f32 %v1757_v18, %v610_v16  ;;  %v1025_v22 = vadd.f32 %v1760_v30, %v723_v17 }
 0x12c   :  { %v612_v23 = vpop.f32.mrf.mxu0  ;;  %v725_v24 = vpop.f32.mrf.mxu1 }
 0x12d   :  { %1087 = vst [vmem:[%s1905_s3 + $0x1a0] sm:$0xff] %v1023_v21  ;;  %1089 = vst [vmem:[%s1905_s3 + $0x1b0] sm:$0xff] %v1025_v22  ;;  %v1024_v25 = vadd.f32 %v1769_v11, %v612_v23  ;;  %v1026_v26 = vadd.f32 %v1772_v19, %v725_v24 }
 0x12e   :  { %v616_v27 = vpop.f32.mrf.mxu0  ;;  %v729_v28 = vpop.f32.mrf.mxu1 }
 0x12f   :  { %1088 = vst [vmem:[%s1905_s3 + $0x1a8] sm:$0xff] %v1024_v25  ;;  %1090 = vst [vmem:[%s1905_s3 + $0x1b8] sm:$0xff] %v1026_v26  ;;  %v1031_v29 = vadd.f32 %v1757_v18, %v616_v27  ;;  %v1033_v3 = vadd.f32 %v1760_v30, %v729_v28 }
 0x130   :  { %v618_v20 = vpop.f32.mrf.mxu0  ;;  %v731_v31 = vpop.f32.mrf.mxu1 }
 0x131   :  { %1095 = vst [vmem:[%s1905_s3 + $0x1e0] sm:$0xff] %v1031_v29  ;;  %1097 = vst [vmem:[%s1905_s3 + $0x1f0] sm:$0xff] %v1033_v3  ;;  %v1032_v32 = vadd.f32 %v1769_v11, %v618_v20  ;;  %v1034_v33 = vadd.f32 %v1772_v19, %v731_v31 }
 0x133   :  { %1096 = vst [vmem:[%s1905_s3 + $0x1e8] sm:$0xff] %v1032_v32  ;;  %1098 = vst [vmem:[%s1905_s3 + $0x1f8] sm:$0xff] %v1034_v33 }

</bundles_post_ra>
